<compile_context>
chip_gen: v7x
topology: tpu7x:2x2x1
jax: 0.10.0
libtpu: 0.0.40
codegen_flags: <defaults>
</compile_context>

<pallas_src>
import functools

import jax
import jax.numpy as jnp
import numpy as np
from jax import lax
from jax.experimental import pallas as pl
from jax.experimental.pallas import tpu as pltpu

EPS = 1e-5


def _vmem_budget_bytes():
    """~3/4 of physical VMEM, capped at 100 MiB (v5e/v6e -> 96 MiB, v7x -> 48 MiB)."""
    try:
        cap = int(getattr(pltpu.get_tpu_info(), "vmem_capacity_bytes", 0))
        if cap > 0:
            return min((cap * 3) // 4, 100 * 1024 * 1024)
    except Exception:
        pass
    return 64 * 1024 * 1024


VMEM_BUDGET = _vmem_budget_bytes()


def _pick_rb(hw, cout, budget):
    """Largest multiple-of-128 row chunk dividing H*W that keeps the heaviest
    (stage-4, f32 + f32 + bf16, double-buffered) blocks inside the budget."""
    if hw % 128 != 0:
        return hw        # TODO(synk): ragged H*W would need cdiv + masked tiling
    cap = min(1024, max(128, budget // (40 * max(cout, 1))))
    best, c = 128, 256
    while c <= cap:
        if hw % c == 0:
            best = c
        c += 128
    return best


def _pick_strip(h, w, p, dil, budget):
    """conv2 row-strip height: multiple of dil dividing H, strip*W rows divisible by 8,
    working set well under budget, and >= 2 strips when the shape allows it."""
    vmem_rows = max(dil, budget // (32 * w * max(p, 1)))
    target = min(h // 2 if h >= 2 * dil else h, vmem_rows)
    best = None
    s = dil
    while s <= target:
        if h % s == 0 and (s * w) % 8 == 0:
            best = s
        s += dil
    return best if best is not None else h


# ---------------- stage 1: conv1 (1x1) + bn1 partial stats -------------------
def conv1_kernel(x_ref, w1_ref, h1_ref, st_ref):
    xb = x_ref[0].astype(jnp.bfloat16)                                   # (Cin, RB)
    # transposed contraction: out[r, p] = sum_c x[c, r] * w1[c, p]  (NCHW read, no transpose pass)
    h = lax.dot_general(xb, w1_ref[...],
                        dimension_numbers=(((0,), (0,)), ((), ())),
                        preferred_element_type=jnp.float32)              # (RB, P)
    h1_ref[0] = h.astype(h1_ref.dtype)
    st_ref[0, 0] = jnp.concatenate(
        [jnp.sum(h, axis=0, keepdims=True),
         jnp.sum(h * h, axis=0, keepdims=True)], axis=-1)                # (1, 2P)


# -------- stage 2: bn1+relu -> conv2 (3x3 dilated, row strips) + bn2 stats ----
def conv2_kernel(top_ref, body_ref, bot_ref, s1_ref, t1_ref, w2_ref,
                 h2_ref, st_ref, pad_ref, acc_ref, *, W, P, dil, strip):
    s_idx = pl.program_id(1)
    is_first = s_idx == 0
    is_last = s_idx == pl.num_programs(1) - 1
    s1 = s1_ref[...]                                                     # (1, 1, P)
    t1 = t1_ref[...]

    def bn_relu(v):                                                      # (r, W, P) -> bf16
        return jnp.maximum(v.astype(jnp.float32) * s1 + t1, 0.0).astype(jnp.bfloat16)

    # left/right zero columns (written every step: scratch may be per-core on megacore)
    zero_col = jnp.zeros((strip + 2 * dil, dil, P), jnp.bfloat16)
    pad_ref[:, :dil, :] = zero_col
    pad_ref[:, W + dil:, :] = zero_col

    # top / bottom halos: neighbour-strip activations, or zeros at the image border
    a_top = bn_relu(top_ref[0])                                          # (dil, W, P)
    pad_ref[:dil, dil:W + dil, :] = jnp.where(is_first, jnp.zeros_like(a_top), a_top)
    a_bot = bn_relu(bot_ref[0])
    pad_ref[strip + dil:, dil:W + dil, :] = jnp.where(is_last, jnp.zeros_like(a_bot), a_bot)

    # strip interior
    pad_ref[dil:strip + dil, dil:W + dil, :] = bn_relu(body_ref[0])      # (strip, W, P)

    # 9 dilated taps accumulated into an f32 VMEM accumulator (no im2col concat buffer).
    # TODO(synk): on v5e/v6e a single K=9P contraction fed from a bf16 scratch would use
    #             the MXU K-dim better; per-tap accumulation keeps peak VMEM minimal.
    sw = strip * W
    for kt in range(9):
        kh, kw = kt // 3, kt % 3
        tap = pad_ref[kh * dil:kh * dil + strip, kw * dil:kw * dil + W, :].reshape(sw, P)
        contrib = jnp.dot(tap, w2_ref[kt], preferred_element_type=jnp.float32)
        if kt == 0:
            acc_ref[...] = contrib
        else:
            acc_ref[...] += contrib

    h2 = acc_ref[...]                                                    # (strip*W, P) f32
    h2_ref[0] = h2.astype(h2_ref.dtype)
    st_ref[0, 0] = jnp.concatenate(
        [jnp.sum(h2, axis=0, keepdims=True),
         jnp.sum(h2 * h2, axis=0, keepdims=True)], axis=-1)              # (1, 2P)


# ---------- stage 3: bn2+relu -> conv3 (1x1, channel-major out) + bn3 stats ---
def conv3_kernel(h2_ref, s2_ref, t2_ref, w3_ref, h3_ref, st_ref):
    a2 = jnp.maximum(h2_ref[0].astype(jnp.float32) * s2_ref[...] + t2_ref[...], 0.0)  # (RB, P)
    # out[cout, r] = sum_p w3[cout, p] * a2[r, p]  -> channel-major, lane-dense stores
    h = lax.dot_general(w3_ref[...], a2.astype(jnp.bfloat16),
                        dimension_numbers=(((1,), (1,)), ((), ())),
                        preferred_element_type=jnp.float32)              # (Cout, RB)
    h3_ref[0] = h.astype(h3_ref.dtype)
    st_ref[0, 0] = jnp.concatenate(
        [jnp.sum(h, axis=1, keepdims=True),
         jnp.sum(h * h, axis=1, keepdims=True)], axis=-1)                # (Cout, 2)


# ---------------- stage 4: bn3 + residual add + relu (NCHW output) ------------
def final_kernel(h3_ref, x_ref, s3_ref, t3_ref, o_ref):
    y = h3_ref[0].astype(jnp.float32) * s3_ref[...] + t3_ref[...]        # (Cout, RB)
    o_ref[0] = jnp.maximum(y + x_ref[0], 0.0).astype(o_ref.dtype)


# TODO(synk): sum/sumsq stats can lose precision for very large activations; a two-pass
#             or Welford reduction would be safer if stats precision ever matters.
def _bn_affine_from_packed(st, gamma, beta, count):
    c = gamma.shape[0]
    tot = st.reshape(-1, 2 * c).sum(axis=0)
    mean = tot[:c] / count
    var = tot[c:] / count - mean * mean
    scale = gamma * lax.rsqrt(var + EPS)
    shift = beta - mean * scale
    return scale, shift


def _bn_affine_from_pairs(st, gamma, beta, count):
    c = gamma.shape[0]
    tot = st.reshape(-1, c, 2).sum(axis=0)
    mean = tot[:, 0] / count
    var = tot[:, 1] / count - mean * mean
    scale = gamma * lax.rsqrt(var + EPS)
    shift = beta - mean * scale
    return scale, shift


def bottleneck_forward(x_nchw, conv1_w, conv2_w, conv3_w,
                       g1, b1, g2, b2, g3, b3, dilation=1):
    """x_nchw: (N, Cin, H, W) float32; conv weights in PyTorch OIHW layout."""
    N, Cin, H, W = x_nchw.shape
    P = conv1_w.shape[0]
    Cout = conv3_w.shape[0]
    assert Cout == 4 * P and Cin == Cout, "downsample=None requires Cin == 4*planes"
    HW = H * W
    RB = _pick_rb(HW, Cout, VMEM_BUDGET)
    S = HW // RB
    STRIP = _pick_strip(H, W, P, dilation, VMEM_BUDGET)
    n_strips = H // STRIP
    spd = max(STRIP // dilation, 1)          # strip height in dil-blocks (halo indexing)
    hb = max(H // dilation, 1)               # number of dil-blocks along H (for clamping)
    count = float(N * HW)
    f32, bf16 = jnp.float32, jnp.bfloat16

    # NCHW flat view (free reshape, no transpose pass over HBM)
    x_flat = x_nchw.reshape(N, Cin, HW)
    # weights: cast to bf16 once (MXU operands); accumulation stays f32 in the kernels
    w1 = jnp.transpose(conv1_w[:, :, 0, 0]).astype(bf16)                          # (Cin, P)
    w2 = jnp.transpose(conv2_w, (2, 3, 1, 0)).reshape(9, P, P).astype(bf16)        # (9, Pin, Pout)
    w3 = conv3_w[:, :, 0, 0].astype(bf16)                                          # (Cout, P)

    cp2 = pltpu.CompilerParams(dimension_semantics=("parallel", "parallel"),
                               vmem_limit_bytes=VMEM_BUDGET)

    # ---- stage 1: conv1 (1x1) ----
    h1, st1 = pl.pallas_call(
        conv1_kernel,
        grid=(N, S),
        in_specs=[pl.BlockSpec((1, Cin, RB), lambda n, s: (n, 0, s)),
                  pl.BlockSpec((Cin, P), lambda n, s: (0, 0))],
        out_specs=[pl.BlockSpec((1, RB, P), lambda n, s: (n, s, 0)),
                   pl.BlockSpec((1, 1, 1, 2 * P), lambda n, s: (n, s, 0, 0))],
        out_shape=[jax.ShapeDtypeStruct((N, HW, P), bf16),
                   jax.ShapeDtypeStruct((N, S, 1, 2 * P), f32)],
        compiler_params=cp2,
    )(x_flat, w1)
    s1, t1 = _bn_affine_from_packed(st1, g1, b1, count)

    # ---- stage 2: bn1+relu -> conv2 (3x3 dilated), row-strip tiled with halos ----
    h1_4d = h1.reshape(N, H, W, P)
    top_map = lambda n, s: (n, jnp.maximum(s * spd - 1, 0), 0, 0)
    body_map = lambda n, s: (n, s, 0, 0)
    bot_map = lambda n, s: (n, jnp.minimum((s + 1) * spd, hb - 1), 0, 0)
    kern2 = functools.partial(conv2_kernel, W=W, P=P, dil=dilation, strip=STRIP)
    h2, st2 = pl.pallas_call(
        kern2,
        grid=(N, n_strips),
        in_specs=[pl.BlockSpec((1, dilation, W, P), top_map),
                  pl.BlockSpec((1, STRIP, W, P), body_map),
                  pl.BlockSpec((1, dilation, W, P), bot_map),
                  pl.BlockSpec((1, 1, P), lambda n, s: (0, 0, 0)),
                  pl.BlockSpec((1, 1, P), lambda n, s: (0, 0, 0)),
                  pl.BlockSpec((9, P, P), lambda n, s: (0, 0, 0))],
        out_specs=[pl.BlockSpec((1, STRIP * W, P), lambda n, s: (n, s, 0)),
                   pl.BlockSpec((1, 1, 1, 2 * P), lambda n, s: (n, s, 0, 0))],
        out_shape=[jax.ShapeDtypeStruct((N, HW, P), bf16),
                   jax.ShapeDtypeStruct((N, n_strips, 1, 2 * P), f32)],
        scratch_shapes=[pltpu.VMEM((STRIP + 2 * dilation, W + 2 * dilation, P), bf16),
                        pltpu.VMEM((STRIP * W, P), f32)],
        compiler_params=cp2,
    )(h1_4d, h1_4d, h1_4d, s1.reshape(1, 1, P), t1.reshape(1, 1, P), w2)
    s2, t2 = _bn_affine_from_packed(st2, g2, b2, count)

    # ---- stage 3: bn2+relu -> conv3 (1x1), channel-major output ----
    h3, st3 = pl.pallas_call(
        conv3_kernel,
        grid=(N, S),
        in_specs=[pl.BlockSpec((1, RB, P), lambda n, s: (n, s, 0)),
                  pl.BlockSpec((1, P), lambda n, s: (0, 0)),
                  pl.BlockSpec((1, P), lambda n, s: (0, 0)),
                  pl.BlockSpec((Cout, P), lambda n, s: (0, 0))],
        out_specs=[pl.BlockSpec((1, Cout, RB), lambda n, s: (n, 0, s)),
                   pl.BlockSpec((1, 1, Cout, 2), lambda n, s: (n, s, 0, 0))],
        out_shape=[jax.ShapeDtypeStruct((N, Cout, HW), bf16),
                   jax.ShapeDtypeStruct((N, S, Cout, 2), f32)],
        compiler_params=cp2,
    )(h2, s2.reshape(1, P), t2.reshape(1, P), w3)
    s3, t3 = _bn_affine_from_pairs(st3, g3, b3, count)

    # ---- stage 4: bn3 + residual + relu, written directly in NCHW ----
    out_flat = pl.pallas_call(
        final_kernel,
        grid=(N, S),
        in_specs=[pl.BlockSpec((1, Cout, RB), lambda n, s: (n, 0, s)),
                  pl.BlockSpec((1, Cout, RB), lambda n, s: (n, 0, s)),
                  pl.BlockSpec((Cout, 1), lambda n, s: (0, 0)),
                  pl.BlockSpec((Cout, 1), lambda n, s: (0, 0))],
        out_specs=pl.BlockSpec((1, Cout, RB), lambda n, s: (n, 0, s)),
        out_shape=jax.ShapeDtypeStruct((N, Cout, HW), x_nchw.dtype),
        compiler_params=cp2,
    )(h3, x_flat, s3.reshape(Cout, 1), t3.reshape(Cout, 1))

    return out_flat.reshape(N, Cout, H, W)


def bottleneck_reference(x, conv1_w, conv2_w, conv3_w,
                         g1, b1, g2, b2, g3, b3, dilation=1):
    """Pure-JAX f32 reference (NCHW, mirrors the PyTorch forward)."""
    def conv(h, w, pad, dil):
        return lax.conv_general_dilated(
            h, w, window_strides=(1, 1), padding=[(pad, pad), (pad, pad)],
            rhs_dilation=(dil, dil),
            dimension_numbers=('NCHW', 'OIHW', 'NCHW'),
            precision=lax.Precision.HIGHEST)

    def bn(h, g, b):
        mean = jnp.mean(h, axis=(0, 2, 3), keepdims=True)
        var = jnp.mean((h - mean) ** 2, axis=(0, 2, 3), keepdims=True)
        return ((h - mean) * lax.rsqrt(var + EPS)
                * g.reshape(1, -1, 1, 1) + b.reshape(1, -1, 1, 1))

    out = jax.nn.relu(bn(conv(x, conv1_w, 0, 1), g1, b1))
    out = jax.nn.relu(bn(conv(out, conv2_w, dilation, dilation), g2, b2))
    out = bn(conv(out, conv3_w, 0, 1), g3, b3)
    return jax.nn.relu(out + x)


if __name__ == "__main__":
    # Small deterministic config: inplanes=32, planes=8 (expansion 4), 16x16 spatial.
    N, planes, H, W = 2, 8, 16, 16
    inplanes = planes * 4          # required for residual add with downsample=None
    dilation = 2                   # padding = dilation (DeepLab-style bottleneck)

    key = jax.random.PRNGKey(0)
    kx, k1, k2, k3 = jax.random.split(key, 4)
    x = jax.random.normal(kx, (N, inplanes, H, W), jnp.float32)

    conv1_w = 0.1 * jax.random.normal(k1, (planes, inplanes, 1, 1), jnp.float32)
    conv2_w = 0.1 * jax.random.normal(k2, (planes, planes, 3, 3), jnp.float32)
    conv3_w = 0.1 * jax.random.normal(k3, (planes * 4, planes, 1, 1), jnp.float32)

    # deterministic BatchNorm affine parameters
    g1 = 1.0 + 0.05 * jnp.arange(planes, dtype=jnp.float32)
    b1 = 0.02 * jnp.arange(planes, dtype=jnp.float32)
    g2 = 1.0 - 0.03 * jnp.arange(planes, dtype=jnp.float32)
    b2 = -0.01 * jnp.arange(planes, dtype=jnp.float32)
    g3 = 1.0 + 0.01 * jnp.arange(planes * 4, dtype=jnp.float32)
    b3 = 0.005 * jnp.arange(planes * 4, dtype=jnp.float32)

    fwd = jax.jit(bottleneck_forward, static_argnames=("dilation",))
    out = fwd(x, conv1_w, conv2_w, conv3_w,
              g1, b1, g2, b2, g3, b3, dilation=dilation)
    out = jax.block_until_ready(out)

    ref = bottleneck_reference(x, conv1_w, conv2_w, conv3_w,
                               g1, b1, g2, b2, g3, b3, dilation=dilation)
    ref = jax.block_until_ready(ref)

    # bf16 MXU operands + bf16 inter-stage activations (f32 accumulation / f32 BN stats)
    # through three conv+BN stages -> few-percent element-wise differences vs the f32
    # HIGHEST-precision reference are expected.
    np.testing.assert_allclose(np.asarray(out), np.asarray(ref),
                               atol=5e-2, rtol=5e-2)
    print("KERNEL_OK")
</pallas_src>

<mosaic_0001>
module attributes {stable_mosaic.version = 11 : i64} {
  func.func @conv1_kernel(%arg0: i32, %arg1: i32, %arg2: memref<1x32x256xf32, #tpu.memory_space<vmem>>, %arg3: memref<32x8xbf16, #tpu.memory_space<vmem>>, %arg4: memref<1x256x8xbf16, #tpu.memory_space<vmem>>, %arg5: memref<1x1x1x16xf32, #tpu.memory_space<vmem>>) attributes {dimension_semantics = [#tpu.dimension_semantics<parallel>, #tpu.dimension_semantics<parallel>], iteration_bounds = array<i64: 2, 1>, scalar_prefetch = 0 : i64, scratch_operands = 0 : i64, tpu.core_type = #tpu.core_type<tc>, window_params = [{transform_indices = @transform_0, window_bounds = array<i64: 1, 32, 256>}, {pipeline_mode = #tpu.pipeline_mode<synchronous>, transform_indices = @transform_1, window_bounds = array<i64: 32, 8>}, {transform_indices = @transform_2, window_bounds = array<i64: 1, 256, 8>}, {transform_indices = @transform_3, window_bounds = array<i64: 1, 1, 1, 16>}]} {
    %c0 = arith.constant 0 : index
    %c0_0 = arith.constant 0 : index
    %c0_1 = arith.constant 0 : index
    %0 = vector.load %arg2[%c0, %c0_0, %c0_1] : memref<1x32x256xf32, #tpu.memory_space<vmem>>, vector<1x32x256xf32>
    %1 = vector.shape_cast %0 : vector<1x32x256xf32> to vector<32x256xf32>
    %2 = arith.truncf %1 : vector<32x256xf32> to vector<32x256xbf16>
    %c0_2 = arith.constant 0 : index
    %c0_3 = arith.constant 0 : index
    %3 = vector.load %arg3[%c0_2, %c0_3] : memref<32x8xbf16, #tpu.memory_space<vmem>>, vector<32x8xbf16>
    %cst = arith.constant dense<0.000000e+00> : vector<256x8xf32>
    %4 = tpu.matmul %2, %3, %cst {dimension_numbers = #tpu.dot_dimension_numbers<[0], [0], [1], [1], [0, 1, 1, 1], [], []>} : vector<32x256xbf16>, vector<32x8xbf16>, vector<256x8xf32> -> vector<256x8xf32>
    %5 = arith.truncf %4 : vector<256x8xf32> to vector<256x8xbf16>
    %c0_4 = arith.constant 0 : index
    %c0_5 = arith.constant 0 : index
    %c0_6 = arith.constant 0 : index
    %6 = vector.load %arg4[%c0_4, %c0_5, %c0_6] : memref<1x256x8xbf16, #tpu.memory_space<vmem>>, vector<1x256x8xbf16>
    %7 = vector.shape_cast %6 : vector<1x256x8xbf16> to vector<256x8xbf16>
    %8 = vector.shape_cast %5 : vector<256x8xbf16> to vector<1x256x8xbf16>
    tpu.vector_store %arg4[%c0_4, %c0_5, %c0_6], %8 {strides = array<i32>} : memref<1x256x8xbf16, #tpu.memory_space<vmem>>, vector<1x256x8xbf16>,
    %cst_7 = arith.constant dense<0.000000e+00> : vector<8xf32>
    %9 = vector.multi_reduction <add>, %4, %cst_7 [0] : vector<256x8xf32> to vector<8xf32>
    %10 = vector.shape_cast %9 : vector<8xf32> to vector<1x8xf32>
    %11 = arith.mulf %4, %4 : vector<256x8xf32>
    %cst_8 = arith.constant dense<0.000000e+00> : vector<8xf32>
    %12 = vector.multi_reduction <add>, %11, %cst_8 [0] : vector<256x8xf32> to vector<8xf32>
    %13 = vector.shape_cast %12 : vector<8xf32> to vector<1x8xf32>
    %14 = tpu.concatenate %10, %13 in 1 : vector<1x8xf32>, vector<1x8xf32> -> vector<1x16xf32>
    %c0_9 = arith.constant 0 : index
    %c0_10 = arith.constant 0 : index
    %c0_11 = arith.constant 0 : index
    %c0_12 = arith.constant 0 : index
    %15 = vector.load %arg5[%c0_9, %c0_10, %c0_11, %c0_12] : memref<1x1x1x16xf32, #tpu.memory_space<vmem>>, vector<1x1x1x16xf32>
    %16 = vector.shape_cast %15 : vector<1x1x1x16xf32> to vector<1x16xf32>
    %17 = vector.shape_cast %14 : vector<1x16xf32> to vector<1x1x1x16xf32>
    tpu.vector_store %arg5[%c0_9, %c0_10, %c0_11, %c0_12], %17 {strides = array<i32>} : memref<1x1x1x16xf32, #tpu.memory_space<vmem>>, vector<1x1x1x16xf32>,
    return
  }
  func.func @transform_0(%arg0: i32, %arg1: i32) -> (i32, i32, i32) {
    %c0_i32 = arith.constant 0 : i32
    %c0_i32_0 = arith.constant 0 : i32
    return %arg0, %c0_i32, %arg1 : i32, i32, i32
  }
  func.func @transform_1(%arg0: i32, %arg1: i32) -> (i32, i32) {
    %c0_i32 = arith.constant 0 : i32
    %c0_i32_0 = arith.constant 0 : i32
    %c0_i32_1 = arith.constant 0 : i32
    return %c0_i32, %c0_i32_0 : i32, i32
  }
  func.func @transform_2(%arg0: i32, %arg1: i32) -> (i32, i32, i32) {
    %c0_i32 = arith.constant 0 : i32
    %c0_i32_0 = arith.constant 0 : i32
    return %arg0, %arg1, %c0_i32 : i32, i32, i32
  }
  func.func @transform_3(%arg0: i32, %arg1: i32) -> (i32, i32, i32, i32) {
    %c0_i32 = arith.constant 0 : i32
    %c0_i32_0 = arith.constant 0 : i32
    %c0_i32_1 = arith.constant 0 : i32
    return %arg0, %arg1, %c0_i32, %c0_i32_0 : i32, i32, i32, i32
  }
}

module attributes {stable_mosaic.version = 11 : i64} {
  func.func @conv3_kernel(%arg0: i32, %arg1: i32, %arg2: memref<1x256x8xbf16, #tpu.memory_space<vmem>>, %arg3: memref<1x8xf32, #tpu.memory_space<vmem>>, %arg4: memref<1x8xf32, #tpu.memory_space<vmem>>, %arg5: memref<32x8xbf16, #tpu.memory_space<vmem>>, %arg6: memref<1x32x256xbf16, #tpu.memory_space<vmem>>, %arg7: memref<1x1x32x2xf32, #tpu.memory_space<vmem>>) attributes {dimension_semantics = [#tpu.dimension_semantics<parallel>, #tpu.dimension_semantics<parallel>], iteration_bounds = array<i64: 2, 1>, scalar_prefetch = 0 : i64, scratch_operands = 0 : i64, tpu.core_type = #tpu.core_type<tc>, window_params = [{transform_indices = @transform_0, window_bounds = array<i64: 1, 256, 8>}, {pipeline_mode = #tpu.pipeline_mode<synchronous>, transform_indices = @transform_1, window_bounds = array<i64: 1, 8>}, {pipeline_mode = #tpu.pipeline_mode<synchronous>, transform_indices = @transform_2, window_bounds = array<i64: 1, 8>}, {pipeline_mode = #tpu.pipeline_mode<synchronous>, transform_indices = @transform_3, window_bounds = array<i64: 32, 8>}, {transform_indices = @transform_4, window_bounds = array<i64: 1, 32, 256>}, {transform_indices = @transform_5, window_bounds = array<i64: 1, 1, 32, 2>}]} {
    %c0 = arith.constant 0 : index
    %c0_0 = arith.constant 0 : index
    %c0_1 = arith.constant 0 : index
    %0 = vector.load %arg2[%c0, %c0_0, %c0_1] : memref<1x256x8xbf16, #tpu.memory_space<vmem>>, vector<1x256x8xbf16>
    %1 = vector.shape_cast %0 : vector<1x256x8xbf16> to vector<256x8xbf16>
    %2 = arith.extf %1 : vector<256x8xbf16> to vector<256x8xf32>
    %c0_2 = arith.constant 0 : index
    %c0_3 = arith.constant 0 : index
    %3 = vector.load %arg3[%c0_2, %c0_3] : memref<1x8xf32, #tpu.memory_space<vmem>>, vector<1x8xf32>
    %4 = vector.broadcast %3 : vector<1x8xf32> to vector<256x8xf32>
    %5 = arith.mulf %2, %4 : vector<256x8xf32>
    %c0_4 = arith.constant 0 : index
    %c0_5 = arith.constant 0 : index
    %6 = vector.load %arg4[%c0_4, %c0_5] : memref<1x8xf32, #tpu.memory_space<vmem>>, vector<1x8xf32>
    %7 = vector.broadcast %6 : vector<1x8xf32> to vector<256x8xf32>
    %8 = arith.addf %5, %7 : vector<256x8xf32>
    %cst = arith.constant 0.000000e+00 : f32
    %9 = vector.broadcast %cst : f32 to vector<256x8xf32>
    %10 = arith.maximumf %8, %9 : vector<256x8xf32>
    %c0_6 = arith.constant 0 : index
    %c0_7 = arith.constant 0 : index
    %11 = vector.load %arg5[%c0_6, %c0_7] : memref<32x8xbf16, #tpu.memory_space<vmem>>, vector<32x8xbf16>
    %12 = arith.truncf %10 : vector<256x8xf32> to vector<256x8xbf16>
    %cst_8 = arith.constant dense<0.000000e+00> : vector<32x256xf32>
    %13 = tpu.matmul %11, %12, %cst_8 {dimension_numbers = #tpu.dot_dimension_numbers<[1], [1], [0], [0], [0, 0, 1, 0], [], []>} : vector<32x8xbf16>, vector<256x8xbf16>, vector<32x256xf32> -> vector<32x256xf32>
    %14 = arith.truncf %13 : vector<32x256xf32> to vector<32x256xbf16>
    %c0_9 = arith.constant 0 : index
    %c0_10 = arith.constant 0 : index
    %c0_11 = arith.constant 0 : index
    %15 = vector.load %arg6[%c0_9, %c0_10, %c0_11] : memref<1x32x256xbf16, #tpu.memory_space<vmem>>, vector<1x32x256xbf16>
    %16 = vector.shape_cast %15 : vector<1x32x256xbf16> to vector<32x256xbf16>
    %17 = vector.shape_cast %14 : vector<32x256xbf16> to vector<1x32x256xbf16>
    tpu.vector_store %arg6[%c0_9, %c0_10, %c0_11], %17 {strides = array<i32>} : memref<1x32x256xbf16, #tpu.memory_space<vmem>>, vector<1x32x256xbf16>,
    %cst_12 = arith.constant dense<0.000000e+00> : vector<32xf32>
    %18 = vector.multi_reduction <add>, %13, %cst_12 [1] : vector<32x256xf32> to vector<32xf32>
    %19 = vector.shape_cast %18 : vector<32xf32> to vector<32x1xf32>
    %20 = arith.mulf %13, %13 : vector<32x256xf32>
    %cst_13 = arith.constant dense<0.000000e+00> : vector<32xf32>
    %21 = vector.multi_reduction <add>, %20, %cst_13 [1] : vector<32x256xf32> to vector<32xf32>
    %22 = vector.shape_cast %21 : vector<32xf32> to vector<32x1xf32>
    %23 = tpu.concatenate %19, %22 in 1 : vector<32x1xf32>, vector<32x1xf32> -> vector<32x2xf32>
    %c0_14 = arith.constant 0 : index
    %c0_15 = arith.constant 0 : index
    %c0_16 = arith.constant 0 : index
    %c0_17 = arith.constant 0 : index
    %24 = vector.load %arg7[%c0_14, %c0_15, %c0_16, %c0_17] : memref<1x1x32x2xf32, #tpu.memory_space<vmem>>, vector<1x1x32x2xf32>
    %25 = vector.shape_cast %24 : vector<1x1x32x2xf32> to vector<32x2xf32>
    %26 = vector.shape_cast %23 : vector<32x2xf32> to vector<1x1x32x2xf32>
    tpu.vector_store %arg7[%c0_14, %c0_15, %c0_16, %c0_17], %26 {strides = array<i32>} : memref<1x1x32x2xf32, #tpu.memory_space<vmem>>, vector<1x1x32x2xf32>,
    return
  }
  func.func @transform_0(%arg0: i32, %arg1: i32) -> (i32, i32, i32) {
    %c0_i32 = arith.constant 0 : i32
    %c0_i32_0 = arith.constant 0 : i32
    return %arg0, %arg1, %c0_i32 : i32, i32, i32
  }
  func.func @transform_1(%arg0: i32, %arg1: i32) -> (i32, i32) {
    %c0_i32 = arith.constant 0 : i32
    %c0_i32_0 = arith.constant 0 : i32
    %c0_i32_1 = arith.constant 0 : i32
    return %c0_i32, %c0_i32_0 : i32, i32
  }
  func.func @transform_2(%arg0: i32, %arg1: i32) -> (i32, i32) {
    %c0_i32 = arith.constant 0 : i32
    %c0_i32_0 = arith.constant 0 : i32
    %c0_i32_1 = arith.constant 0 : i32
    return %c0_i32, %c0_i32_0 : i32, i32
  }
  func.func @transform_3(%arg0: i32, %arg1: i32) -> (i32, i32) {
    %c0_i32 = arith.constant 0 : i32
    %c0_i32_0 = arith.constant 0 : i32
    %c0_i32_1 = arith.constant 0 : i32
    return %c0_i32, %c0_i32_0 : i32, i32
  }
  func.func @transform_4(%arg0: i32, %arg1: i32) -> (i32, i32, i32) {
    %c0_i32 = arith.constant 0 : i32
    %c0_i32_0 = arith.constant 0 : i32
    return %arg0, %c0_i32, %arg1 : i32, i32, i32
  }
  func.func @transform_5(%arg0: i32, %arg1: i32) -> (i32, i32, i32, i32) {
    %c0_i32 = arith.constant 0 : i32
    %c0_i32_0 = arith.constant 0 : i32
    %c0_i32_1 = arith.constant 0 : i32
    return %arg0, %arg1, %c0_i32, %c0_i32_0 : i32, i32, i32, i32
  }
}

module attributes {stable_mosaic.version = 11 : i64} {
  func.func @conv2_kernel(%arg0: i32, %arg1: i32, %arg2: memref<1x2x16x8xbf16, #tpu.memory_space<vmem>>, %arg3: memref<1x8x16x8xbf16, #tpu.memory_space<vmem>>, %arg4: memref<1x2x16x8xbf16, #tpu.memory_space<vmem>>, %arg5: memref<1x1x8xf32, #tpu.memory_space<vmem>>, %arg6: memref<1x1x8xf32, #tpu.memory_space<vmem>>, %arg7: memref<9x8x8xbf16, #tpu.memory_space<vmem>>, %arg8: memref<1x128x8xbf16, #tpu.memory_space<vmem>>, %arg9: memref<1x1x1x16xf32, #tpu.memory_space<vmem>>, %arg10: memref<12x20x8xbf16, #tpu.memory_space<vmem>>, %arg11: memref<128x8xf32, #tpu.memory_space<vmem>>) attributes {dimension_semantics = [#tpu.dimension_semantics<parallel>, #tpu.dimension_semantics<parallel>], iteration_bounds = array<i64: 2, 2>, scalar_prefetch = 0 : i64, scratch_operands = 2 : i64, tpu.core_type = #tpu.core_type<tc>, window_params = [{transform_indices = @transform_0, window_bounds = array<i64: 1, 2, 16, 8>}, {transform_indices = @transform_1, window_bounds = array<i64: 1, 8, 16, 8>}, {transform_indices = @transform_2, window_bounds = array<i64: 1, 2, 16, 8>}, {pipeline_mode = #tpu.pipeline_mode<synchronous>, transform_indices = @transform_3, window_bounds = array<i64: 1, 1, 8>}, {pipeline_mode = #tpu.pipeline_mode<synchronous>, transform_indices = @transform_4, window_bounds = array<i64: 1, 1, 8>}, {pipeline_mode = #tpu.pipeline_mode<synchronous>, transform_indices = @transform_5, window_bounds = array<i64: 9, 8, 8>}, {transform_indices = @transform_6, window_bounds = array<i64: 1, 128, 8>}, {transform_indices = @transform_7, window_bounds = array<i64: 1, 1, 1, 16>}]} {
    %c0_i32 = arith.constant 0 : i32
    %0 = arith.cmpi eq, %arg1, %c0_i32 : i32
    %c1_i32 = arith.constant 1 : i32
    %1 = arith.cmpi eq, %arg1, %c1_i32 : i32
    %c0 = arith.constant 0 : index
    %c0_0 = arith.constant 0 : index
    %c0_1 = arith.constant 0 : index
    %2 = vector.load %arg5[%c0, %c0_0, %c0_1] : memref<1x1x8xf32, #tpu.memory_space<vmem>>, vector<1x1x8xf32>
    %c0_2 = arith.constant 0 : index
    %c0_3 = arith.constant 0 : index
    %c0_4 = arith.constant 0 : index
    %3 = vector.load %arg6[%c0_2, %c0_3, %c0_4] : memref<1x1x8xf32, #tpu.memory_space<vmem>>, vector<1x1x8xf32>
    %cst = arith.constant 0.000000e+00 : bf16
    %4 = vector.broadcast %cst : bf16 to vector<12x2x8xbf16>
    %c0_5 = arith.constant 0 : index
    %c0_6 = arith.constant 0 : index
    %c0_7 = arith.constant 0 : index
    %5 = vector.load %arg10[%c0_5, %c0_6, %c0_7] : memref<12x20x8xbf16, #tpu.memory_space<vmem>>, vector<12x2x8xbf16>
    tpu.vector_store %arg10[%c0_5, %c0_6, %c0_7], %4 {strides = array<i32>} : memref<12x20x8xbf16, #tpu.memory_space<vmem>>, vector<12x2x8xbf16>,
    %c0_8 = arith.constant 0 : index
    %c18 = arith.constant 18 : index
    %c0_9 = arith.constant 0 : index
    %6 = vector.load %arg10[%c0_8, %c18, %c0_9] : memref<12x20x8xbf16, #tpu.memory_space<vmem>>, vector<12x2x8xbf16>
    tpu.vector_store %arg10[%c0_8, %c18, %c0_9], %4 {strides = array<i32>} : memref<12x20x8xbf16, #tpu.memory_space<vmem>>, vector<12x2x8xbf16>,
    %c0_10 = arith.constant 0 : index
    %c0_11 = arith.constant 0 : index
    %c0_12 = arith.constant 0 : index
    %c0_13 = arith.constant 0 : index
    %7 = vector.load %arg2[%c0_10, %c0_11, %c0_12, %c0_13] : memref<1x2x16x8xbf16, #tpu.memory_space<vmem>>, vector<1x2x16x8xbf16>
    %8 = vector.shape_cast %7 : vector<1x2x16x8xbf16> to vector<2x16x8xbf16>
    %9 = arith.extf %8 : vector<2x16x8xbf16> to vector<2x16x8xf32>
    %10 = vector.broadcast %2 : vector<1x1x8xf32> to vector<2x16x8xf32>
    %11 = arith.mulf %9, %10 : vector<2x16x8xf32>
    %12 = vector.broadcast %3 : vector<1x1x8xf32> to vector<2x16x8xf32>
    %13 = arith.addf %11, %12 : vector<2x16x8xf32>
    %cst_14 = arith.constant 0.000000e+00 : f32
    %14 = vector.broadcast %cst_14 : f32 to vector<2x16x8xf32>
    %15 = arith.maximumf %13, %14 : vector<2x16x8xf32>
    %16 = arith.truncf %15 : vector<2x16x8xf32> to vector<2x16x8xbf16>
    %cst_15 = arith.constant 0.000000e+00 : bf16
    %17 = vector.broadcast %cst_15 : bf16 to vector<2x16x8xbf16>
    %18 = arith.select %0, %17, %16 : vector<2x16x8xbf16>
    %c0_16 = arith.constant 0 : index
    %c2 = arith.constant 2 : index
    %c0_17 = arith.constant 0 : index
    %19 = vector.load %arg10[%c0_16, %c2, %c0_17] : memref<12x20x8xbf16, #tpu.memory_space<vmem>>, vector<2x16x8xbf16>
    tpu.vector_store %arg10[%c0_16, %c2, %c0_17], %18 {strides = array<i32>} : memref<12x20x8xbf16, #tpu.memory_space<vmem>>, vector<2x16x8xbf16>,
    %c0_18 = arith.constant 0 : index
    %c0_19 = arith.constant 0 : index
    %c0_20 = arith.constant 0 : index
    %c0_21 = arith.constant 0 : index
    %20 = vector.load %arg4[%c0_18, %c0_19, %c0_20, %c0_21] : memref<1x2x16x8xbf16, #tpu.memory_space<vmem>>, vector<1x2x16x8xbf16>
    %21 = vector.shape_cast %20 : vector<1x2x16x8xbf16> to vector<2x16x8xbf16>
    %22 = arith.extf %21 : vector<2x16x8xbf16> to vector<2x16x8xf32>
    %23 = vector.broadcast %2 : vector<1x1x8xf32> to vector<2x16x8xf32>
    %24 = arith.mulf %22, %23 : vector<2x16x8xf32>
    %25 = vector.broadcast %3 : vector<1x1x8xf32> to vector<2x16x8xf32>
    %26 = arith.addf %24, %25 : vector<2x16x8xf32>
    %cst_22 = arith.constant 0.000000e+00 : f32
    %27 = vector.broadcast %cst_22 : f32 to vector<2x16x8xf32>
    %28 = arith.maximumf %26, %27 : vector<2x16x8xf32>
    %29 = arith.truncf %28 : vector<2x16x8xf32> to vector<2x16x8xbf16>
    %cst_23 = arith.constant 0.000000e+00 : bf16
    %30 = vector.broadcast %cst_23 : bf16 to vector<2x16x8xbf16>
    %31 = arith.select %1, %30, %29 : vector<2x16x8xbf16>
    %c10 = arith.constant 10 : index
    %c2_24 = arith.constant 2 : index
    %c0_25 = arith.constant 0 : index
    %32 = vector.load %arg10[%c10, %c2_24, %c0_25] : memref<12x20x8xbf16, #tpu.memory_space<vmem>>, vector<2x16x8xbf16>
    tpu.vector_store %arg10[%c10, %c2_24, %c0_25], %31 {strides = array<i32>} : memref<12x20x8xbf16, #tpu.memory_space<vmem>>, vector<2x16x8xbf16>,
    %c0_26 = arith.constant 0 : index
    %c0_27 = arith.constant 0 : index
    %c0_28 = arith.constant 0 : index
    %c0_29 = arith.constant 0 : index
    %33 = vector.load %arg3[%c0_26, %c0_27, %c0_28, %c0_29] : memref<1x8x16x8xbf16, #tpu.memory_space<vmem>>, vector<1x8x16x8xbf16>
    %34 = vector.shape_cast %33 : vector<1x8x16x8xbf16> to vector<8x16x8xbf16>
    %35 = arith.extf %34 : vector<8x16x8xbf16> to vector<8x16x8xf32>
    %36 = vector.broadcast %2 : vector<1x1x8xf32> to vector<8x16x8xf32>
    %37 = arith.mulf %35, %36 : vector<8x16x8xf32>
    %38 = vector.broadcast %3 : vector<1x1x8xf32> to vector<8x16x8xf32>
    %39 = arith.addf %37, %38 : vector<8x16x8xf32>
    %cst_30 = arith.constant 0.000000e+00 : f32
    %40 = vector.broadcast %cst_30 : f32 to vector<8x16x8xf32>
    %41 = arith.maximumf %39, %40 : vector<8x16x8xf32>
    %42 = arith.truncf %41 : vector<8x16x8xf32> to vector<8x16x8xbf16>
    %c2_31 = arith.constant 2 : index
    %c2_32 = arith.constant 2 : index
    %c0_33 = arith.constant 0 : index
    %43 = vector.load %arg10[%c2_31, %c2_32, %c0_33] : memref<12x20x8xbf16, #tpu.memory_space<vmem>>, vector<8x16x8xbf16>
    tpu.vector_store %arg10[%c2_31, %c2_32, %c0_33], %42 {strides = array<i32>} : memref<12x20x8xbf16, #tpu.memory_space<vmem>>, vector<8x16x8xbf16>,
    %c0_34 = arith.constant 0 : index
    %c0_35 = arith.constant 0 : index
    %c0_36 = arith.constant 0 : index
    %44 = vector.load %arg10[%c0_34, %c0_35, %c0_36] : memref<12x20x8xbf16, #tpu.memory_space<vmem>>, vector<8x16x8xbf16>
    %45 = vector.shape_cast %44 : vector<8x16x8xbf16> to vector<128x8xbf16>
    %c0_37 = arith.constant 0 : index
    %c0_38 = arith.constant 0 : index
    %c0_39 = arith.constant 0 : index
    %46 = vector.load %arg7[%c0_37, %c0_38, %c0_39] : memref<9x8x8xbf16, #tpu.memory_space<vmem>>, vector<1x8x8xbf16>
    %47 = vector.shape_cast %46 : vector<1x8x8xbf16> to vector<8x8xbf16>
    %cst_40 = arith.constant dense<0.000000e+00> : vector<128x8xf32>
    %48 = tpu.matmul %45, %47, %cst_40 {dimension_numbers = #tpu.dot_dimension_numbers<[1], [0], [0], [1], [0, 0, 1, 1], [], []>} : vector<128x8xbf16>, vector<8x8xbf16>, vector<128x8xf32> -> vector<128x8xf32>
    %c0_41 = arith.constant 0 : index
    %c0_42 = arith.constant 0 : index
    %49 = vector.load %arg11[%c0_41, %c0_42] : memref<128x8xf32, #tpu.memory_space<vmem>>, vector<128x8xf32>
    tpu.vector_store %arg11[%c0_41, %c0_42], %48 {strides = array<i32>} : memref<128x8xf32, #tpu.memory_space<vmem>>, vector<128x8xf32>,
    %c0_43 = arith.constant 0 : index
    %c2_44 = arith.constant 2 : index
    %c0_45 = arith.constant 0 : index
    %50 = vector.load %arg10[%c0_43, %c2_44, %c0_45] : memref<12x20x8xbf16, #tpu.memory_space<vmem>>, vector<8x16x8xbf16>
    %51 = vector.shape_cast %50 : vector<8x16x8xbf16> to vector<128x8xbf16>
    %c1 = arith.constant 1 : index
    %c0_46 = arith.constant 0 : index
    %c0_47 = arith.constant 0 : index
    %52 = vector.load %arg7[%c1, %c0_46, %c0_47] : memref<9x8x8xbf16, #tpu.memory_space<vmem>>, vector<1x8x8xbf16>
    %53 = vector.shape_cast %52 : vector<1x8x8xbf16> to vector<8x8xbf16>
    %cst_48 = arith.constant dense<0.000000e+00> : vector<128x8xf32>
    %54 = tpu.matmul %51, %53, %cst_48 {dimension_numbers = #tpu.dot_dimension_numbers<[1], [0], [0], [1], [0, 0, 1, 1], [], []>} : vector<128x8xbf16>, vector<8x8xbf16>, vector<128x8xf32> -> vector<128x8xf32>
    %c0_49 = arith.constant 0 : index
    %c0_50 = arith.constant 0 : index
    %55 = vector.load %arg11[%c0_49, %c0_50] : memref<128x8xf32, #tpu.memory_space<vmem>>, vector<128x8xf32>
    %56 = arith.addf %55, %54 : vector<128x8xf32>
    %c0_51 = arith.constant 0 : index
    %c0_52 = arith.constant 0 : index
    %57 = vector.load %arg11[%c0_51, %c0_52] : memref<128x8xf32, #tpu.memory_space<vmem>>, vector<128x8xf32>
    tpu.vector_store %arg11[%c0_51, %c0_52], %56 {strides = array<i32>} : memref<128x8xf32, #tpu.memory_space<vmem>>, vector<128x8xf32>,
    %c0_53 = arith.constant 0 : index
    %c4 = arith.constant 4 : index
    %c0_54 = arith.constant 0 : index
    %58 = vector.load %arg10[%c0_53, %c4, %c0_54] : memref<12x20x8xbf16, #tpu.memory_space<vmem>>, vector<8x16x8xbf16>
    %59 = vector.shape_cast %58 : vector<8x16x8xbf16> to vector<128x8xbf16>
    %c2_55 = arith.constant 2 : index
    %c0_56 = arith.constant 0 : index
    %c0_57 = arith.constant 0 : index
    %60 = vector.load %arg7[%c2_55, %c0_56, %c0_57] : memref<9x8x8xbf16, #tpu.memory_space<vmem>>, vector<1x8x8xbf16>
    %61 = vector.shape_cast %60 : vector<1x8x8xbf16> to vector<8x8xbf16>
    %cst_58 = arith.constant dense<0.000000e+00> : vector<128x8xf32>
    %62 = tpu.matmul %59, %61, %cst_58 {dimension_numbers = #tpu.dot_dimension_numbers<[1], [0], [0], [1], [0, 0, 1, 1], [], []>} : vector<128x8xbf16>, vector<8x8xbf16>, vector<128x8xf32> -> vector<128x8xf32>
    %c0_59 = arith.constant 0 : index
    %c0_60 = arith.constant 0 : index
    %63 = vector.load %arg11[%c0_59, %c0_60] : memref<128x8xf32, #tpu.memory_space<vmem>>, vector<128x8xf32>
    %64 = arith.addf %63, %62 : vector<128x8xf32>
    %c0_61 = arith.constant 0 : index
    %c0_62 = arith.constant 0 : index
    %65 = vector.load %arg11[%c0_61, %c0_62] : memref<128x8xf32, #tpu.memory_space<vmem>>, vector<128x8xf32>
    tpu.vector_store %arg11[%c0_61, %c0_62], %64 {strides = array<i32>} : memref<128x8xf32, #tpu.memory_space<vmem>>, vector<128x8xf32>,
    %c2_63 = arith.constant 2 : index
    %c0_64 = arith.constant 0 : index
    %c0_65 = arith.constant 0 : index
    %66 = vector.load %arg10[%c2_63, %c0_64, %c0_65] : memref<12x20x8xbf16, #tpu.memory_space<vmem>>, vector<8x16x8xbf16>
    %67 = vector.shape_cast %66 : vector<8x16x8xbf16> to vector<128x8xbf16>
    %c3 = arith.constant 3 : index
    %c0_66 = arith.constant 0 : index
    %c0_67 = arith.constant 0 : index
    %68 = vector.load %arg7[%c3, %c0_66, %c0_67] : memref<9x8x8xbf16, #tpu.memory_space<vmem>>, vector<1x8x8xbf16>
    %69 = vector.shape_cast %68 : vector<1x8x8xbf16> to vector<8x8xbf16>
    %cst_68 = arith.constant dense<0.000000e+00> : vector<128x8xf32>
    %70 = tpu.matmul %67, %69, %cst_68 {dimension_numbers = #tpu.dot_dimension_numbers<[1], [0], [0], [1], [0, 0, 1, 1], [], []>} : vector<128x8xbf16>, vector<8x8xbf16>, vector<128x8xf32> -> vector<128x8xf32>
    %c0_69 = arith.constant 0 : index
    %c0_70 = arith.constant 0 : index
    %71 = vector.load %arg11[%c0_69, %c0_70] : memref<128x8xf32, #tpu.memory_space<vmem>>, vector<128x8xf32>
    %72 = arith.addf %71, %70 : vector<128x8xf32>
    %c0_71 = arith.constant 0 : index
    %c0_72 = arith.constant 0 : index
    %73 = vector.load %arg11[%c0_71, %c0_72] : memref<128x8xf32, #tpu.memory_space<vmem>>, vector<128x8xf32>
    tpu.vector_store %arg11[%c0_71, %c0_72], %72 {strides = array<i32>} : memref<128x8xf32, #tpu.memory_space<vmem>>, vector<128x8xf32>,
    %c2_73 = arith.constant 2 : index
    %c2_74 = arith.constant 2 : index
    %c0_75 = arith.constant 0 : index
    %74 = vector.load %arg10[%c2_73, %c2_74, %c0_75] : memref<12x20x8xbf16, #tpu.memory_space<vmem>>, vector<8x16x8xbf16>
    %75 = vector.shape_cast %74 : vector<8x16x8xbf16> to vector<128x8xbf16>
    %c4_76 = arith.constant 4 : index
    %c0_77 = arith.constant 0 : index
    %c0_78 = arith.constant 0 : index
    %76 = vector.load %arg7[%c4_76, %c0_77, %c0_78] : memref<9x8x8xbf16, #tpu.memory_space<vmem>>, vector<1x8x8xbf16>
    %77 = vector.shape_cast %76 : vector<1x8x8xbf16> to vector<8x8xbf16>
    %cst_79 = arith.constant dense<0.000000e+00> : vector<128x8xf32>
    %78 = tpu.matmul %75, %77, %cst_79 {dimension_numbers = #tpu.dot_dimension_numbers<[1], [0], [0], [1], [0, 0, 1, 1], [], []>} : vector<128x8xbf16>, vector<8x8xbf16>, vector<128x8xf32> -> vector<128x8xf32>
    %c0_80 = arith.constant 0 : index
    %c0_81 = arith.constant 0 : index
    %79 = vector.load %arg11[%c0_80, %c0_81] : memref<128x8xf32, #tpu.memory_space<vmem>>, vector<128x8xf32>
    %80 = arith.addf %79, %78 : vector<128x8xf32>
    %c0_82 = arith.constant 0 : index
    %c0_83 = arith.constant 0 : index
    %81 = vector.load %arg11[%c0_82, %c0_83] : memref<128x8xf32, #tpu.memory_space<vmem>>, vector<128x8xf32>
    tpu.vector_store %arg11[%c0_82, %c0_83], %80 {strides = array<i32>} : memref<128x8xf32, #tpu.memory_space<vmem>>, vector<128x8xf32>,
    %c2_84 = arith.constant 2 : index
    %c4_85 = arith.constant 4 : index
    %c0_86 = arith.constant 0 : index
    %82 = vector.load %arg10[%c2_84, %c4_85, %c0_86] : memref<12x20x8xbf16, #tpu.memory_space<vmem>>, vector<8x16x8xbf16>
    %83 = vector.shape_cast %82 : vector<8x16x8xbf16> to vector<128x8xbf16>
    %c5 = arith.constant 5 : index
    %c0_87 = arith.constant 0 : index
    %c0_88 = arith.constant 0 : index
    %84 = vector.load %arg7[%c5, %c0_87, %c0_88] : memref<9x8x8xbf16, #tpu.memory_space<vmem>>, vector<1x8x8xbf16>
    %85 = vector.shape_cast %84 : vector<1x8x8xbf16> to vector<8x8xbf16>
    %cst_89 = arith.constant dense<0.000000e+00> : vector<128x8xf32>
    %86 = tpu.matmul %83, %85, %cst_89 {dimension_numbers = #tpu.dot_dimension_numbers<[1], [0], [0], [1], [0, 0, 1, 1], [], []>} : vector<128x8xbf16>, vector<8x8xbf16>, vector<128x8xf32> -> vector<128x8xf32>
    %c0_90 = arith.constant 0 : index
    %c0_91 = arith.constant 0 : index
    %87 = vector.load %arg11[%c0_90, %c0_91] : memref<128x8xf32, #tpu.memory_space<vmem>>, vector<128x8xf32>
    %88 = arith.addf %87, %86 : vector<128x8xf32>
    %c0_92 = arith.constant 0 : index
    %c0_93 = arith.constant 0 : index
    %89 = vector.load %arg11[%c0_92, %c0_93] : memref<128x8xf32, #tpu.memory_space<vmem>>, vector<128x8xf32>
    tpu.vector_store %arg11[%c0_92, %c0_93], %88 {strides = array<i32>} : memref<128x8xf32, #tpu.memory_space<vmem>>, vector<128x8xf32>,
    %c4_94 = arith.constant 4 : index
    %c0_95 = arith.constant 0 : index
    %c0_96 = arith.constant 0 : index
    %90 = vector.load %arg10[%c4_94, %c0_95, %c0_96] : memref<12x20x8xbf16, #tpu.memory_space<vmem>>, vector<8x16x8xbf16>
    %91 = vector.shape_cast %90 : vector<8x16x8xbf16> to vector<128x8xbf16>
    %c6 = arith.constant 6 : index
    %c0_97 = arith.constant 0 : index
    %c0_98 = arith.constant 0 : index
    %92 = vector.load %arg7[%c6, %c0_97, %c0_98] : memref<9x8x8xbf16, #tpu.memory_space<vmem>>, vector<1x8x8xbf16>
    %93 = vector.shape_cast %92 : vector<1x8x8xbf16> to vector<8x8xbf16>
    %cst_99 = arith.constant dense<0.000000e+00> : vector<128x8xf32>
    %94 = tpu.matmul %91, %93, %cst_99 {dimension_numbers = #tpu.dot_dimension_numbers<[1], [0], [0], [1], [0, 0, 1, 1], [], []>} : vector<128x8xbf16>, vector<8x8xbf16>, vector<128x8xf32> -> vector<128x8xf32>
    %c0_100 = arith.constant 0 : index
    %c0_101 = arith.constant 0 : index
    %95 = vector.load %arg11[%c0_100, %c0_101] : memref<128x8xf32, #tpu.memory_space<vmem>>, vector<128x8xf32>
    %96 = arith.addf %95, %94 : vector<128x8xf32>
    %c0_102 = arith.constant 0 : index
    %c0_103 = arith.constant 0 : index
    %97 = vector.load %arg11[%c0_102, %c0_103] : memref<128x8xf32, #tpu.memory_space<vmem>>, vector<128x8xf32>
    tpu.vector_store %arg11[%c0_102, %c0_103], %96 {strides = array<i32>} : memref<128x8xf32, #tpu.memory_space<vmem>>, vector<128x8xf32>,
    %c4_104 = arith.constant 4 : index
    %c2_105 = arith.constant 2 : index
    %c0_106 = arith.constant 0 : index
    %98 = vector.load %arg10[%c4_104, %c2_105, %c0_106] : memref<12x20x8xbf16, #tpu.memory_space<vmem>>, vector<8x16x8xbf16>
    %99 = vector.shape_cast %98 : vector<8x16x8xbf16> to vector<128x8xbf16>
    %c7 = arith.constant 7 : index
    %c0_107 = arith.constant 0 : index
    %c0_108 = arith.constant 0 : index
    %100 = vector.load %arg7[%c7, %c0_107, %c0_108] : memref<9x8x8xbf16, #tpu.memory_space<vmem>>, vector<1x8x8xbf16>
    %101 = vector.shape_cast %100 : vector<1x8x8xbf16> to vector<8x8xbf16>
    %cst_109 = arith.constant dense<0.000000e+00> : vector<128x8xf32>
    %102 = tpu.matmul %99, %101, %cst_109 {dimension_numbers = #tpu.dot_dimension_numbers<[1], [0], [0], [1], [0, 0, 1, 1], [], []>} : vector<128x8xbf16>, vector<8x8xbf16>, vector<128x8xf32> -> vector<128x8xf32>
    %c0_110 = arith.constant 0 : index
    %c0_111 = arith.constant 0 : index
    %103 = vector.load %arg11[%c0_110, %c0_111] : memref<128x8xf32, #tpu.memory_space<vmem>>, vector<128x8xf32>
    %104 = arith.addf %103, %102 : vector<128x8xf32>
    %c0_112 = arith.constant 0 : index
    %c0_113 = arith.constant 0 : index
    %105 = vector.load %arg11[%c0_112, %c0_113] : memref<128x8xf32, #tpu.memory_space<vmem>>, vector<128x8xf32>
    tpu.vector_store %arg11[%c0_112, %c0_113], %104 {strides = array<i32>} : memref<128x8xf32, #tpu.memory_space<vmem>>, vector<128x8xf32>,
    %c4_114 = arith.constant 4 : index
    %c4_115 = arith.constant 4 : index
    %c0_116 = arith.constant 0 : index
    %106 = vector.load %arg10[%c4_114, %c4_115, %c0_116] : memref<12x20x8xbf16, #tpu.memory_space<vmem>>, vector<8x16x8xbf16>
    %107 = vector.shape_cast %106 : vector<8x16x8xbf16> to vector<128x8xbf16>
    %c8 = arith.constant 8 : index
    %c0_117 = arith.constant 0 : index
    %c0_118 = arith.constant 0 : index
    %108 = vector.load %arg7[%c8, %c0_117, %c0_118] : memref<9x8x8xbf16, #tpu.memory_space<vmem>>, vector<1x8x8xbf16>
    %109 = vector.shape_cast %108 : vector<1x8x8xbf16> to vector<8x8xbf16>
    %cst_119 = arith.constant dense<0.000000e+00> : vector<128x8xf32>
    %110 = tpu.matmul %107, %109, %cst_119 {dimension_numbers = #tpu.dot_dimension_numbers<[1], [0], [0], [1], [0, 0, 1, 1], [], []>} : vector<128x8xbf16>, vector<8x8xbf16>, vector<128x8xf32> -> vector<128x8xf32>
    %c0_120 = arith.constant 0 : index
    %c0_121 = arith.constant 0 : index
    %111 = vector.load %arg11[%c0_120, %c0_121] : memref<128x8xf32, #tpu.memory_space<vmem>>, vector<128x8xf32>
    %112 = arith.addf %111, %110 : vector<128x8xf32>
    %c0_122 = arith.constant 0 : index
    %c0_123 = arith.constant 0 : index
    %113 = vector.load %arg11[%c0_122, %c0_123] : memref<128x8xf32, #tpu.memory_space<vmem>>, vector<128x8xf32>
    tpu.vector_store %arg11[%c0_122, %c0_123], %112 {strides = array<i32>} : memref<128x8xf32, #tpu.memory_space<vmem>>, vector<128x8xf32>,
    %c0_124 = arith.constant 0 : index
    %c0_125 = arith.constant 0 : index
    %114 = vector.load %arg11[%c0_124, %c0_125] : memref<128x8xf32, #tpu.memory_space<vmem>>, vector<128x8xf32>
    %115 = arith.truncf %114 : vector<128x8xf32> to vector<128x8xbf16>
    %c0_126 = arith.constant 0 : index
    %c0_127 = arith.constant 0 : index
    %c0_128 = arith.constant 0 : index
    %116 = vector.load %arg8[%c0_126, %c0_127, %c0_128] : memref<1x128x8xbf16, #tpu.memory_space<vmem>>, vector<1x128x8xbf16>
    %117 = vector.shape_cast %116 : vector<1x128x8xbf16> to vector<128x8xbf16>
    %118 = vector.shape_cast %115 : vector<128x8xbf16> to vector<1x128x8xbf16>
    tpu.vector_store %arg8[%c0_126, %c0_127, %c0_128], %118 {strides = array<i32>} : memref<1x128x8xbf16, #tpu.memory_space<vmem>>, vector<1x128x8xbf16>,
    %cst_129 = arith.constant dense<0.000000e+00> : vector<8xf32>
    %119 = vector.multi_reduction <add>, %114, %cst_129 [0] : vector<128x8xf32> to vector<8xf32>
    %120 = vector.shape_cast %119 : vector<8xf32> to vector<1x8xf32>
    %121 = arith.mulf %114, %114 : vector<128x8xf32>
    %cst_130 = arith.constant dense<0.000000e+00> : vector<8xf32>
    %122 = vector.multi_reduction <add>, %121, %cst_130 [0] : vector<128x8xf32> to vector<8xf32>
    %123 = vector.shape_cast %122 : vector<8xf32> to vector<1x8xf32>
    %124 = tpu.concatenate %120, %123 in 1 : vector<1x8xf32>, vector<1x8xf32> -> vector<1x16xf32>
    %c0_131 = arith.constant 0 : index
    %c0_132 = arith.constant 0 : index
    %c0_133 = arith.constant 0 : index
    %c0_134 = arith.constant 0 : index
    %125 = vector.load %arg9[%c0_131, %c0_132, %c0_133, %c0_134] : memref<1x1x1x16xf32, #tpu.memory_space<vmem>>, vector<1x1x1x16xf32>
    %126 = vector.shape_cast %125 : vector<1x1x1x16xf32> to vector<1x16xf32>
    %127 = vector.shape_cast %124 : vector<1x16xf32> to vector<1x1x1x16xf32>
    tpu.vector_store %arg9[%c0_131, %c0_132, %c0_133, %c0_134], %127 {strides = array<i32>} : memref<1x1x1x16xf32, #tpu.memory_space<vmem>>, vector<1x1x1x16xf32>,
    return
  }
  func.func @transform_0(%arg0: i32, %arg1: i32) -> (i32, i32, i32, i32) {
    %c4_i32 = arith.constant 4 : i32
    %0 = arith.muli %arg1, %c4_i32 : i32
    %c1_i32 = arith.constant 1 : i32
    %1 = arith.subi %0, %c1_i32 : i32
    %c0_i32 = arith.constant 0 : i32
    %2 = arith.maxsi %1, %c0_i32 : i32
    %c0_i32_0 = arith.constant 0 : i32
    %c0_i32_1 = arith.constant 0 : i32
    %c0_i32_2 = arith.constant 0 : i32
    return %arg0, %2, %c0_i32_0, %c0_i32_1 : i32, i32, i32, i32
  }
  func.func @transform_1(%arg0: i32, %arg1: i32) -> (i32, i32, i32, i32) {
    %c0_i32 = arith.constant 0 : i32
    %c0_i32_0 = arith.constant 0 : i32
    %c0_i32_1 = arith.constant 0 : i32
    return %arg0, %arg1, %c0_i32, %c0_i32_0 : i32, i32, i32, i32
  }
  func.func @transform_2(%arg0: i32, %arg1: i32) -> (i32, i32, i32, i32) {
    %c1_i32 = arith.constant 1 : i32
    %0 = arith.addi %arg1, %c1_i32 : i32
    %c4_i32 = arith.constant 4 : i32
    %1 = arith.muli %0, %c4_i32 : i32
    %c7_i32 = arith.constant 7 : i32
    %2 = arith.minsi %1, %c7_i32 : i32
    %c0_i32 = arith.constant 0 : i32
    %c0_i32_0 = arith.constant 0 : i32
    %c0_i32_1 = arith.constant 0 : i32
    return %arg0, %2, %c0_i32, %c0_i32_0 : i32, i32, i32, i32
  }
  func.func @transform_3(%arg0: i32, %arg1: i32) -> (i32, i32, i32) {
    %c0_i32 = arith.constant 0 : i32
    %c0_i32_0 = arith.constant 0 : i32
    %c0_i32_1 = arith.constant 0 : i32
    %c0_i32_2 = arith.constant 0 : i32
    return %c0_i32, %c0_i32_0, %c0_i32_1 : i32, i32, i32
  }
  func.func @transform_4(%arg0: i32, %arg1: i32) -> (i32, i32, i32) {
    %c0_i32 = arith.constant 0 : i32
    %c0_i32_0 = arith.constant 0 : i32
    %c0_i32_1 = arith.constant 0 : i32
    %c0_i32_2 = arith.constant 0 : i32
    return %c0_i32, %c0_i32_0, %c0_i32_1 : i32, i32, i32
  }
  func.func @transform_5(%arg0: i32, %arg1: i32) -> (i32, i32, i32) {
    %c0_i32 = arith.constant 0 : i32
    %c0_i32_0 = arith.constant 0 : i32
    %c0_i32_1 = arith.constant 0 : i32
    %c0_i32_2 = arith.constant 0 : i32
    return %c0_i32, %c0_i32_0, %c0_i32_1 : i32, i32, i32
  }
  func.func @transform_6(%arg0: i32, %arg1: i32) -> (i32, i32, i32) {
    %c0_i32 = arith.constant 0 : i32
    %c0_i32_0 = arith.constant 0 : i32
    return %arg0, %arg1, %c0_i32 : i32, i32, i32
  }
  func.func @transform_7(%arg0: i32, %arg1: i32) -> (i32, i32, i32, i32) {
    %c0_i32 = arith.constant 0 : i32
    %c0_i32_0 = arith.constant 0 : i32
    %c0_i32_1 = arith.constant 0 : i32
    return %arg0, %arg1, %c0_i32, %c0_i32_0 : i32, i32, i32, i32
  }
}

module attributes {stable_mosaic.version = 11 : i64} {
  func.func @final_kernel(%arg0: i32, %arg1: i32, %arg2: memref<1x32x256xbf16, #tpu.memory_space<vmem>>, %arg3: memref<1x32x256xf32, #tpu.memory_space<vmem>>, %arg4: memref<32x1xf32, #tpu.memory_space<vmem>>, %arg5: memref<32x1xf32, #tpu.memory_space<vmem>>, %arg6: memref<1x32x256xf32, #tpu.memory_space<vmem>>) attributes {dimension_semantics = [#tpu.dimension_semantics<parallel>, #tpu.dimension_semantics<parallel>], iteration_bounds = array<i64: 2, 1>, scalar_prefetch = 0 : i64, scratch_operands = 0 : i64, tpu.core_type = #tpu.core_type<tc>, window_params = [{transform_indices = @transform_0, window_bounds = array<i64: 1, 32, 256>}, {transform_indices = @transform_1, window_bounds = array<i64: 1, 32, 256>}, {pipeline_mode = #tpu.pipeline_mode<synchronous>, transform_indices = @transform_2, window_bounds = array<i64: 32, 1>}, {pipeline_mode = #tpu.pipeline_mode<synchronous>, transform_indices = @transform_3, window_bounds = array<i64: 32, 1>}, {transform_indices = @transform_4, window_bounds = array<i64: 1, 32, 256>}]} {
    %c0 = arith.constant 0 : index
    %c0_0 = arith.constant 0 : index
    %c0_1 = arith.constant 0 : index
    %0 = vector.load %arg2[%c0, %c0_0, %c0_1] : memref<1x32x256xbf16, #tpu.memory_space<vmem>>, vector<1x32x256xbf16>
    %1 = vector.shape_cast %0 : vector<1x32x256xbf16> to vector<32x256xbf16>
    %2 = arith.extf %1 : vector<32x256xbf16> to vector<32x256xf32>
    %c0_2 = arith.constant 0 : index
    %c0_3 = arith.constant 0 : index
    %3 = vector.load %arg4[%c0_2, %c0_3] : memref<32x1xf32, #tpu.memory_space<vmem>>, vector<32x1xf32>
    %4 = vector.broadcast %3 : vector<32x1xf32> to vector<32x256xf32>
    %5 = arith.mulf %2, %4 : vector<32x256xf32>
    %c0_4 = arith.constant 0 : index
    %c0_5 = arith.constant 0 : index
    %6 = vector.load %arg5[%c0_4, %c0_5] : memref<32x1xf32, #tpu.memory_space<vmem>>, vector<32x1xf32>
    %7 = vector.broadcast %6 : vector<32x1xf32> to vector<32x256xf32>
    %8 = arith.addf %5, %7 : vector<32x256xf32>
    %c0_6 = arith.constant 0 : index
    %c0_7 = arith.constant 0 : index
    %c0_8 = arith.constant 0 : index
    %9 = vector.load %arg3[%c0_6, %c0_7, %c0_8] : memref<1x32x256xf32, #tpu.memory_space<vmem>>, vector<1x32x256xf32>
    %10 = vector.shape_cast %9 : vector<1x32x256xf32> to vector<32x256xf32>
    %11 = arith.addf %8, %10 : vector<32x256xf32>
    %cst = arith.constant 0.000000e+00 : f32
    %12 = vector.broadcast %cst : f32 to vector<32x256xf32>
    %13 = arith.maximumf %11, %12 : vector<32x256xf32>
    %c0_9 = arith.constant 0 : index
    %c0_10 = arith.constant 0 : index
    %c0_11 = arith.constant 0 : index
    %14 = vector.load %arg6[%c0_9, %c0_10, %c0_11] : memref<1x32x256xf32, #tpu.memory_space<vmem>>, vector<1x32x256xf32>
    %15 = vector.shape_cast %14 : vector<1x32x256xf32> to vector<32x256xf32>
    %16 = vector.shape_cast %13 : vector<32x256xf32> to vector<1x32x256xf32>
    tpu.vector_store %arg6[%c0_9, %c0_10, %c0_11], %16 {strides = array<i32>} : memref<1x32x256xf32, #tpu.memory_space<vmem>>, vector<1x32x256xf32>,
    return
  }
  func.func @transform_0(%arg0: i32, %arg1: i32) -> (i32, i32, i32) {
    %c0_i32 = arith.constant 0 : i32
    %c0_i32_0 = arith.constant 0 : i32
    return %arg0, %c0_i32, %arg1 : i32, i32, i32
  }
  func.func @transform_1(%arg0: i32, %arg1: i32) -> (i32, i32, i32) {
    %c0_i32 = arith.constant 0 : i32
    %c0_i32_0 = arith.constant 0 : i32
    return %arg0, %c0_i32, %arg1 : i32, i32, i32
  }
  func.func @transform_2(%arg0: i32, %arg1: i32) -> (i32, i32) {
    %c0_i32 = arith.constant 0 : i32
    %c0_i32_0 = arith.constant 0 : i32
    %c0_i32_1 = arith.constant 0 : i32
    return %c0_i32, %c0_i32_0 : i32, i32
  }
  func.func @transform_3(%arg0: i32, %arg1: i32) -> (i32, i32) {
    %c0_i32 = arith.constant 0 : i32
    %c0_i32_0 = arith.constant 0 : i32
    %c0_i32_1 = arith.constant 0 : i32
    return %c0_i32, %c0_i32_0 : i32, i32
  }
  func.func @transform_4(%arg0: i32, %arg1: i32) -> (i32, i32, i32) {
    %c0_i32 = arith.constant 0 : i32
    %c0_i32_0 = arith.constant 0 : i32
    return %arg0, %c0_i32, %arg1 : i32, i32, i32
  }
}

</mosaic_0001>

<bundles_post_ra>
// kernel: bottleneck_forward.4
= control target key start
LH: loop header
LB: loop body
LE: loop exit
PB: predicated region body
PF: predicated region fallthrough
CT: control target
= control target key end

     0   :  { %9 = vsyncpa [#allocation3], 0  ;;  %s1974_s0 = inlined_call_operand.hbm [shape: f32[2,32,256], index: 0, kind: input, shape index: {}]   ;;  %s1975_s1 = inlined_call_operand.hbm [shape: bf16[32,8], index: 1, kind: input, shape index: {}]   ;;  %s1976_s2 = inlined_call_operand.hbm [shape: bf16[2,256,8], index: 2, kind: output, shape index: {0}]   ;;  %s1977_s3 = inlined_call_operand.hbm [shape: f32[2,1,1,16], index: 3, kind: output, shape index: {1}]  }
   0x1   :  { %11 = vsyncpa [#allocation3 + $0x1], 0 }
   0x2   :  { %12 = vsyncpa [#allocation6], 0 }
   0x3   :  { %13 = vsyncpa [#allocation4], 0 }
   0x4   :  { %15 = vsyncpa [#allocation4 + $0x1], 0 }
   0x5   :  { %16 = vsyncpa [#allocation9], 0 }
   0x6   :  { %18 = vsyncpa [#allocation9 + $0x1], 0  ;;  %s1463_s12 = smov 0   ;;  %s1465_s13 = smov 0  }
   0x7   :  { %s1467_s14 = smov 0   ;;  %s1469_s15 = smov 0  }
   0x8   :  { %s1471_s16 = smov 0   ;;  %s1473_s17 = smov 0  }
   0x9 LB: > { %s1006_s18 = sadd.s32 4294967295, %s1430_s17   ;;  %s1007_s19 = sadd.s32 4294967294, %s1430_s17   ;;  %s1430_s17 = sphi %s1473_s17, %s24_s17   ;;  %s1426_s16 = sphi %s1471_s16, %s2001_s16   ;;  %s1422_s15 = sphi %s1469_s15, %s2000_s15   ;;  %s1418_s14 = sphi %s1467_s14, %s1999_s14   ;;  %s1414_s13 = sphi %s1465_s13, %s1998_s13   ;;  %s1410_s12 = sphi %s1463_s12, %s1997_s12  }
   0xa   : > { %p58_p0 = scmp.ne.s32.totalorder %s1414_s13, %s1410_s12  ;;  %p1497_p1 = scmp.eq.s32.totalorder %s1006_s18, 0 }
   0xb   : > { %p1501_p2 = scmp.eq.s32.totalorder %s1006_s18, 1  ;;  %p111_p3 = scmp.eq.s32.totalorder %s1007_s19, 1 }
   0xc   : > { %s1982_s20 = scalar_select %p1497_p1, 1, 0 }
   0xd   : > { %s1983_s21 = scalar_select %p1501_p2, 1, 0 }
   0xe   : > { %p1507_p4 = por %p1497_p1, %p58_p0  ;;  %p1008_p5 = scmp.ge.s32.totalorder %s1430_s17, 1 }
   0xf   : > { %p1512_p6 = por %p111_p3, %p58_p0  ;;  %p146_p7 = scmp.lt.s32.totalorder %s1430_s17, 3 }
  0x10   : > { %s1984_s22 = scalar_select %p1507_p4, 1, 0 }
  0x11   : > { %s1985_s23 = scalar_select %p1512_p6, 1, 0 }
  0x12   : > { %p1517_p8 = pnand %p1008_p5, %p146_p7  ;;  %s1432_s25 = smov [#allocation5]  }
  0x13   : > { %s158_s26 = sshll.u32 %s1432_s25, 4  ;;  %s36_s28 = sadd.s32 1, %s1426_s16  ;;  %s159_s26 = int_to_ptr.vmem [resolvable:$true] %s158_s26 }
  0x14   : > { %s1986_s24 = scalar_select %p1517_p8, 1, 0 }
  0x15   : > { %p1176_p9 = pneg %p1517_p8  ;;  %s1254_s4 = scalar_lea.hbm %s1975_s1, 256 }
  0x16   : > { %p1255_p12 = scmp.ne.s32.totalorder %s1975_s1, %s1254_s4  ;;  %p1261_p5 = scmp.lt.u32.totalorder %s1254_s4, %s1975_s1 }
  0x17   : > { %p1526_p11 = pnand %p1176_p9, %p1497_p1 }
  0x19   : > { %p1256_p13 = pneg %p1526_p11 }
  0x1b   : > { %p1257_p0 = pnand %p1256_p13, %p1255_p12 }
  0x1d   : > { %p1258_p3 = pneg %p1257_p0 }
  0x1f   : > { %p1263_p7 = pnand %p1261_p5, %p1258_p3 }
  0x21   : > { %1266 = shalt.err (!%p1263_p7)
}
  0x22   : > { %s1267_s9 = scalar_lea.vmem %s159_s26, 256  ;;  %p1275_p1 = scmp.lt.s32.totalorder %s159_s26, %s159_s26 }
  0x23   : > { %p1268_p9 = scmp.ne.s32.totalorder %s159_s26, %s1267_s9  ;;  %p1276_p4 = scmp.lt.s32.totalorder %s1267_s9, %s1267_s9 }
  0x25   : > { %p1270_p10 = pnand %p1268_p9, %p1256_p13  ;;  %p1277_p8 = por %p1276_p4, %p1275_p1 }
  0x27   : > { %p1271_p6 = pneg %p1270_p10 }
  0x29   : > { %p1278_p2 = pnand %p1277_p8, %p1271_p6 }
  0x2b   : > { %1281 = shalt.err (!%p1278_p2)
}
  0x2c   : > { %s1433_s10 = smov 64   ;;  %s1434_s11 = smov 4  }
  0x2d   : > { %1179 = dma.hbm_to_vmem [thread:$0]  (!%p1526_p11), %s1975_s1, 256, %s159_s26, [#allocation6], %s1433_s10, %s1433_s10, %s1434_s11  }
  0x2e   : > { %p38_p1 = scmp.ge.s32.totalorder %s36_s28, 2  ;;  %s45_s25 = sadd.s32 1, %s1418_s14 }
  0x2f   : > { %p52_p2 = scmp.ne.s32.totalorder %s1418_s14, %s1414_s13  ;;  %p53_p4 = scmp.eq.s32.totalorder %s1430_s17, 0 }
  0x30   : > { %s2003_s28 = smov (%p38_p1, %s36_s28), 0  ;;  %p1989_p8 = scmp.ne.s32.totalorder %s1983_s21, 0 }
  0x31   : > { %p1553_p6 = por %p53_p4, %p52_p2  ;;  %s40_s27 = ssub.s32 %s1426_s16, %s2003_s28 }
  0x32   : > { %p1559_p10 = por %p1989_p8, %p52_p2  ;;  %p1192_p12 = scmp.lt.s32.totalorder %s1430_s17, 2 }
  0x33   : > { %p43_p11 = scmp.eq.s32.totalorder %s40_s27, 0  ;;  %s172_s26 = sand.u32 1, %s1418_s14  }
  0x34   : > { %s1011_s4 = sshll.u32 %s172_s26, 6  ;;  %s1074_s6 = sshll.u32 %s1426_s16, 10 }
  0x35   : > { %s1568_s5 = scalar_select %p43_p11, %s1418_s14, %s45_s25  }
  0x36   : > { %s1574_s9 = scalar_lea.hbm %s1974_s0, %s1074_s6  ;;  %s176_s21 = scalar_lea.vmem [#allocation2], %s1011_s4 }
  0x37   : > { %s185_s10 = sshll.u32 %s176_s21, 4  ;;  %p1580_p13 = pnand %p1192_p12, %p1553_p6  ;;  %s1576_s10 = int_to_ptr.vmem [resolvable:$true] %s185_s10 }
  0x38   : > { %s1584_s18 = scalar_lea.sflag [#allocation3], %s172_s26  ;;  %s1282_s19 = scalar_lea.hbm %s1574_s9, 1024 }
  0x39   : > { %p1283_p0 = scmp.ne.s32.totalorder %s1574_s9, %s1282_s19  ;;  %p1284_p3 = pneg %p1580_p13 }
  0x3a   : > { %s1287_s29 = scalar_lea.hbm %s1974_s0, 2048  ;;  %p1288_p9 = scmp.lt.u32.totalorder %s1574_s9, %s1974_s0 }
  0x3b   : > { %p1285_p5 = pnand %p1284_p3, %p1283_p0  ;;  %p1289_p1 = scmp.lt.u32.totalorder %s1287_s29, %s1282_s19 }
  0x3c   : > { %p1291_p4 = scmp.lt.u32.totalorder %s1282_s19, %s1574_s9 }
  0x3d   : > { %p1286_p7 = pneg %p1285_p5  ;;  %p1290_p2 = por %p1289_p1, %p1288_p9 }
  0x3f   : > { %p1292_p6 = por %p1291_p4, %p1290_p2 }
  0x41   : > { %p1293_p8 = pnand %p1292_p6, %p1286_p7 }
  0x43   : > { %1296 = shalt.err (!%p1293_p8)
}
  0x44   : > { %s1297_s26 = scalar_lea.vmem %s1576_s10, 1024  ;;  %s1435_s7 = smov [#allocation2]  }
  0x45   : > { %p1298_p12 = scmp.ne.s32.totalorder %s1576_s10, %s1297_s26  ;;  %s1302_s8 = sshll.u32 %s1435_s7, 4  ;;  %s1303_s8 = int_to_ptr.vmem [resolvable:$false] %s1302_s8 }
  0x46   : > { %s1304_s21 = scalar_lea.vmem %s1303_s8, 2048  ;;  %p1305_p5 = scmp.lt.s32.totalorder %s1576_s10, %s1303_s8 }
  0x47   : > { %p1300_p11 = pnand %p1298_p12, %p1284_p3  ;;  %p1306_p9 = scmp.lt.s32.totalorder %s1304_s21, %s1297_s26 }
  0x49   : > { %p1301_p0 = pneg %p1300_p11  ;;  %p1307_p1 = por %p1306_p9, %p1305_p5 }
  0x4b   : > { %p1308_p2 = pnand %p1307_p1, %p1301_p0 }
  0x4d   : > { %1311 = shalt.err (!%p1308_p2)
}
  0x4e   : > { %s1436_s19 = smov 256   ;;  %s1437_s25 = smov 16  }
  0x4f   : > { %1183 = dma.hbm_to_vmem [thread:$0]  (!%p1580_p13), %s1574_s9, 1024, %s1576_s10, %s1584_s18, %s1436_s19, %s1436_s19, %s1437_s25  }
  0x50   : > { %p1992_p3 = scmp.ne.s32.totalorder %s1986_s24, 0 }
  0x51   : > { %s1615_s27 = sand.u32 (!%p1992_p3), 1, %s1414_s13   ;;  %p1993_p7 = scmp.ne.s32.totalorder (!%p1992_p3), %s1984_s22, 0 }
  0x52   : > { %197 = sbr.rel (%p1992_p3) target bundleno = 636 (0x27c), region = 28  ;;  %s1015_s29 = sshll.u32 (!%p1992_p3), %s1615_s27, 6 }
  0x53   : > { %s200_s4 = scalar_lea.sflag (!%p1992_p3), [#allocation3], %s1615_s27  ;;  %s203_s6 = scalar_lea.vmem (!%p1992_p3), [#allocation2], %s1015_s29 }
  0x59   : > { %1393 = dma.done.wait (%p1993_p7), %s200_s4, 1024  }
  0x5a   : > { %1395 = vsyncadd (%p1993_p7), %s200_s4, 4294966272  ;;  %p1994_p4 = scmp.ne.s32.totalorder %s1982_s20, 0 }
  0x5c   : > { %1397 = dma.done.wait (%p1994_p4), [#allocation6], 256  }
  0x5d   : > { %1399 = vsyncadd (%p1994_p4), [#allocation6], 4294967040  ;;  %v237_v0 = vld [vmem:[%s203_s6] sm:$0xff]  ;;  %v239_v1 = vld [vmem:[%s203_s6 + $0x10] sm:$0xff]  ;;  %vm297_vm0 = vcmask 261120   ;;  %s1017_s20 = sshll.u32 %s1615_s27, 7 }
  0x5e   : > { %v241_v2 = vld [vmem:[%s203_s6 + $0x20] sm:$0xff]  ;;  %v245_v3 = vpack.c.bf16 %v239_v1, %v237_v0  ;;  %v243_v4 = vld [vmem:[%s203_s6 + $0x30] sm:$0xff]  ;;  %v238_v5 = vld [vmem:[%s203_s6 + $0x8] sm:$0xff]  ;;  %vm635_vm1 = vcmask 60416   ;;  %vm668_vm2 = vcmask 64512   ;;  %s1650_s22 = scalar_lea.vmem [#allocation7], %s1017_s20 }
  0x5f   : > { %v240_v6 = vld [vmem:[%s203_s6 + $0x18] sm:$0xff]  ;;  %v242_v8 = vld [vmem:[%s203_s6 + $0x28] sm:$0xff]  ;;  %v247_v10 = vpack.c.bf16 %v243_v4, %v241_v2  ;;  %v1252_v11 = vld [vmem:[#allocation5] sm:$0xff]   ;;  %s1107_s24 = sshll.u32 %s1422_s15, 11  ;;  %s866_s18 = sshll.u32 %s1650_s22, 4  ;;  %s1893_s18 = int_to_ptr.vmem [resolvable:$true] %s866_s18 }
  0x60   : > { %v246_v7 = vpack.c.bf16 %v240_v6, %v238_v5  ;;  %v244_v9 = vld [vmem:[%s203_s6 + $0x38] sm:$0xff]  ;;  %253 = vxpose.xlu0.c.b16.start [1/2] (short) %v245_v3, 128  ;;  %v1253_v13 = vld [vmem:[#allocation5 + $0x8] sm:$0xff]   ;;  %1126 = vmatprep.subr.bf16.mxu0 %v1252_v11  ;;  %s1890_s11 = scalar_lea.hbm %s1976_s2, %s1107_s24  ;;  %s847_s26 = scalar_lea.sflag [#allocation4], %s1615_s27 }
  0x61   : > { %v248_v12 = vpack.c.bf16 %v244_v9, %v242_v8  ;;  %1162 = vmatprep.subr.bf16.mxu1 %v1252_v11  ;;  %1127 = vmatpush3.bf16.msra.mxu0 %v1252_v11  ;;  %s1312_s7 = scalar_lea.vmem %s1893_s18, 2048  ;;  %s1438_s8 = smov [#allocation7]  }
  0x62   : > { %269 = vxpose.xlu1.c.b16.start [1/2] (short) %v246_v7, 128  ;;  %1164 = vmatpush3.bf16.msra.mxu1 %v1252_v11  ;;  %p1313_p13 = scmp.ne.s32.totalorder %s1893_s18, %s1312_s7  ;;  %s1316_s21 = sshll.u32 %s1438_s8, 4  ;;  %s1317_s21 = int_to_ptr.vmem [resolvable:$false] %s1316_s21 }
  0x63   : > { %1128 = vmatprep.subr.bf16.mxu0 %v1253_v13  ;;  %1163 = vmatprep.subr.bf16.mxu1 %v1253_v13  ;;  %s1318_s19 = scalar_lea.vmem %s1317_s21, 4096  ;;  %p1319_p12 = scmp.lt.s32.totalorder %s1893_s18, %s1317_s21 }
  0x64   : > { %254 = vxpose.xlu0.c.b16.end [2/2] (short) %v247_v10, 128  ;;  %p1314_p6 = pnand %p1313_p13, %p1559_p10  ;;  %p1320_p11 = scmp.lt.s32.totalorder %s1318_s19, %s1312_s7 }
  0x65   : > { %1129 = vmatpush3.bf16.msra.mxu0 %v1253_v13 }
  0x66   : > { %270 = vxpose.xlu1.c.b16.end [2/2] (short) %v248_v12, 128  ;;  %1165 = vmatpush3.bf16.msra.mxu1 %v1253_v13  ;;  %p1315_p8 = pneg %p1314_p6  ;;  %p1321_p0 = por %p1320_p11, %p1319_p12 }
  0x68   : > { %p1322_p5 = pnand %p1321_p0, %p1315_p8 }
  0xc6   : > { %v261_v14 = vpop.trf.xlu0 }
  0xc7   : > { %1130 = vmatprep.mubr.msk.bf16.mxu0 %vm297_vm0, %v261_v14 }
  0xc8   : > { %v277_v15 = vpop.trf.xlu1 }
  0xc9   : > { %1146 = vmatprep.mubr.msk.bf16.mxu1 %vm297_vm0, %v277_v15 }
  0xca   : > { %v262_v16 = vpop.trf.xlu0 }
  0xcb   : > { %1131 = vmatmul.mubr.msk.bf16.vlgmr.msra.gmra.mrb[0].mxu0 %vm297_vm0, %v262_v16 }
  0xcc   : > { %v278_v17 = vpop.trf.xlu1 }
  0xcd   : > { %1147 = vmatmul.mubr.msk.bf16.vlgmr.msra.gmra.mrb[0].mxu1 %vm297_vm0, %v278_v17 }
  0xce   : > { %v263_v18 = vpop.trf.xlu0 }
  0xcf   : > { %1134 = vmatprep.mubr.msk.bf16.mxu0 %vm297_vm0, %v263_v18 }
  0xd0   : > { %v279_v19 = vpop.trf.xlu1 }
  0xd1   : > { %1150 = vmatprep.mubr.msk.bf16.mxu1 %vm297_vm0, %v279_v19 }
  0xd2   : > { %v264_v20 = vpop.trf.xlu0 }
  0xd3   : > { %1135 = vmatmul.mubr.msk.bf16.gmra.mrb[4].mxu0 %vm297_vm0, %v264_v20 }
  0xd4   : > { %v280_v21 = vpop.trf.xlu1 }
  0xd5   : > { %1151 = vmatmul.mubr.msk.bf16.gmra.mrb[4].mxu1 %vm297_vm0, %v280_v21 }
  0xd6   : > { %v265_v22 = vpop.trf.xlu0 }
  0xd7   : > { %1138 = vmatprep.mubr.msk.bf16.mxu0 %vm297_vm0, %v265_v22 }
  0xd8   : > { %v281_v23 = vpop.trf.xlu1 }
  0xd9   : > { %1154 = vmatprep.mubr.msk.bf16.mxu1 %vm297_vm0, %v281_v23 }
  0xda   : > { %v266_v24 = vpop.trf.xlu0 }
  0xdb   : > { %1139 = vmatmul.mubr.msk.bf16.gmra.mrb[8].mxu0 %vm297_vm0, %v266_v24 }
  0xdc   : > { %v282_v25 = vpop.trf.xlu1 }
  0xdd   : > { %1155 = vmatmul.mubr.msk.bf16.gmra.mrb[8].mxu1 %vm297_vm0, %v282_v25 }
  0xde   : > { %v267_v26 = vpop.trf.xlu0 }
  0xdf   : > { %1142 = vmatprep.mubr.msk.bf16.mxu0 %vm297_vm0, %v267_v26 }
  0xe0   : > { %v283_v27 = vpop.trf.xlu1 }
  0xe1   : > { %1158 = vmatprep.mubr.msk.bf16.mxu1 %vm297_vm0, %v283_v27 }
  0xe2   : > { %v268_v28 = vpop.trf.xlu0 }
  0xe3   : > { %1143 = vmatmul.mubr.msk.bf16.gmra.mrb[12].mxu0 %vm297_vm0, %v268_v28 }
  0xe4   : > { %v284_v29 = vpop.trf.xlu1 }
  0xe5   : > { %1159 = vmatmul.mubr.msk.bf16.gmra.mrb[12].mxu1 %vm297_vm0, %v284_v29 }
 0x19e   : > { %v1132_v30 = vpop.f32.mrb[0].mxu0 }
 0x19f   : > { %v1077_v31 = vpack.c.bf16 %v1132_v30, %v1132_v30  ;;  %v380_v32 = vpop.f32.mrb[1].mxu0  ;;  %v740_v39 = vmul.f32 %v1132_v30, %v1132_v30  ;;  %v672_v50 = vsel %vm668_vm2, %v1132_v30, 0.0 }
 0x1a0   : > { %v1644_v33 = vpop.f32.mrb[0].mxu1  ;;  %v1075_v34 = vpack.c.bf16 %v380_v32, %v380_v32  ;;  %v738_v35 = vmul.f32 %v380_v32, %v380_v32  ;;  %v1133_v36 = vpop.f32.mrb[2].mxu0  ;;  %v669_v43 = vsel %vm668_vm2, %v380_v32, 0.0 }
 0x1a1   : > { %v1093_v37 = vpack.c.bf16 %v1644_v33, %v1644_v33  ;;  %v1648_v38 = vpop.f32.mrb[1].mxu1  ;;  %638 = vst.msk [vmem:[%s1650_s22 + $0x8] sm:$0xf] %vm635_vm1, %v1077_v31  ;;  %v1078_v40 = vpack.c.bf16 %v1133_v36, %v1133_v36  ;;  %v383_v41 = vpop.f32.mrb[3].mxu0  ;;  %v741_v48 = vmul.f32 %v1133_v36, %v1133_v36  ;;  %v773_v57 = vsel %vm668_vm2, %v740_v39, 0.0 }
 0x1a2   : > { %v1654_v42 = vpop.f32.mrb[2].mxu1  ;;  %636 = vst.msk [vmem:[%s1650_s22] sm:$0xf] %vm635_vm1, %v1075_v34  ;;  %v1076_v44 = vpack.c.bf16 %v383_v41, %v383_v41  ;;  %v670_v45 = vsel %vm668_vm2, %v383_v41, 0.0  ;;  %v739_v46 = vmul.f32 %v383_v41, %v383_v41  ;;  %v770_v51 = vsel %vm668_vm2, %v738_v35, 0.0 }
 0x1a3   : > { %654 = vst.msk [vmem:[%s1650_s22 + $0x48] sm:$0xf] %vm635_vm1, %v1093_v37  ;;  %v1662_v47 = vpop.f32.mrb[3].mxu1  ;;  %639 = vst.msk [vmem:[%s1650_s22 + $0xc] sm:$0xf] %vm635_vm1, %v1078_v40  ;;  %v671_v49 = vadd.f32 %v670_v45, %v669_v43  ;;  %v1091_v53 = vpack.c.bf16 %v1648_v38, %v1648_v38  ;;  %v1094_v56 = vpack.c.bf16 %v1654_v42, %v1654_v42  ;;  %v674_v60 = vsel %vm668_vm2, %v1133_v36, 0.0 }
 0x1a4   : > { %637 = vst.msk [vmem:[%s1650_s22 + $0x4] sm:$0xf] %vm635_vm1, %v1076_v44  ;;  %v771_v52 = vsel %vm668_vm2, %v739_v46, 0.0  ;;  %v1092_v59 = vpack.c.bf16 %v1662_v47, %v1662_v47  ;;  %v775_v61 = vsel %vm668_vm2, %v741_v48, 0.0 }
 0x1a5   : > { %v673_v54 = vadd.f32 %v672_v50, %v671_v49  ;;  %v772_v55 = vadd.f32 %v771_v52, %v770_v51  ;;  %652 = vst.msk [vmem:[%s1650_s22 + $0x40] sm:$0xf] %vm635_vm1, %v1091_v53  ;;  %655 = vst.msk [vmem:[%s1650_s22 + $0x4c] sm:$0xf] %vm635_vm1, %v1094_v56 }
 0x1a6   : > { %v1136_v58 = vpop.f32.mrb[4].mxu0  ;;  %653 = vst.msk [vmem:[%s1650_s22 + $0x44] sm:$0xf] %vm635_vm1, %v1092_v59 }
 0x1a7   : > { %v774_v62 = vadd.f32 %v773_v57, %v772_v55  ;;  %v1081_v63 = vpack.c.bf16 %v1136_v58, %v1136_v58  ;;  %v396_v0 = vpop.f32.mrb[5].mxu0  ;;  %v675_v3 = vadd.f32 %v674_v60, %v673_v54  ;;  %v744_v16 = vmul.f32 %v1136_v58, %v1136_v58 }
 0x1a8   : > { %v1684_v1 = vpop.f32.mrb[4].mxu1  ;;  %v1079_v2 = vpack.c.bf16 %v396_v0, %v396_v0  ;;  %v676_v4 = vsel %vm668_vm2, %v396_v0, 0.0  ;;  %v742_v5 = vmul.f32 %v396_v0, %v396_v0  ;;  %v1137_v6 = vpop.f32.mrb[6].mxu0  ;;  %v680_v21 = vsel %vm668_vm2, %v1136_v58, 0.0 }
 0x1a9   : > { %v1689_v7 = vpop.f32.mrb[5].mxu1  ;;  %642 = vst.msk [vmem:[%s1650_s22 + $0x18] sm:$0xf] %vm635_vm1, %v1081_v63  ;;  %v776_v8 = vadd.f32 %v775_v61, %v774_v62  ;;  %v1082_v9 = vpack.c.bf16 %v1137_v6, %v1137_v6  ;;  %v399_v10 = vpop.f32.mrb[7].mxu0  ;;  %v677_v12 = vadd.f32 %v676_v4, %v675_v3  ;;  %v745_v22 = vmul.f32 %v1137_v6, %v1137_v6 }
 0x1aa   : > { %v1693_v11 = vpop.f32.mrb[6].mxu1  ;;  %640 = vst.msk [vmem:[%s1650_s22 + $0x10] sm:$0xf] %vm635_vm1, %v1079_v2  ;;  %v777_v13 = vsel %vm668_vm2, %v742_v5, 0.0  ;;  %v1080_v14 = vpack.c.bf16 %v399_v10, %v399_v10  ;;  %v678_v18 = vsel %vm668_vm2, %v399_v10, 0.0  ;;  %v743_v19 = vmul.f32 %v399_v10, %v399_v10 }
 0x1ab   : > { %v1698_v15 = vpop.f32.mrb[7].mxu1  ;;  %v778_v17 = vadd.f32 %v777_v13, %v776_v8  ;;  %643 = vst.msk [vmem:[%s1650_s22 + $0x1c] sm:$0xf] %vm635_vm1, %v1082_v9  ;;  %v679_v20 = vadd.f32 %v678_v18, %v677_v12  ;;  %v1097_v24 = vpack.c.bf16 %v1684_v1, %v1684_v1  ;;  %v1095_v28 = vpack.c.bf16 %v1689_v7, %v1689_v7 }
 0x1ac   : > { %641 = vst.msk [vmem:[%s1650_s22 + $0x14] sm:$0xf] %vm635_vm1, %v1080_v14  ;;  %v779_v23 = vsel %vm668_vm2, %v743_v19, 0.0  ;;  %v781_v29 = vsel %vm668_vm2, %v744_v16, 0.0  ;;  %v682_v30 = vsel %vm668_vm2, %v1137_v6, 0.0  ;;  %v783_v43 = vsel %vm668_vm2, %v745_v22, 0.0 }
 0x1ad   : > { %v681_v25 = vadd.f32 %v680_v21, %v679_v20  ;;  %v780_v26 = vadd.f32 %v779_v23, %v778_v17  ;;  %658 = vst.msk [vmem:[%s1650_s22 + $0x58] sm:$0xf] %vm635_vm1, %v1097_v24  ;;  %656 = vst.msk [vmem:[%s1650_s22 + $0x50] sm:$0xf] %vm635_vm1, %v1095_v28  ;;  %v1098_v62 = vpack.c.bf16 %v1693_v11, %v1693_v11 }
 0x1ae   : > { %v1140_v27 = vpop.f32.mrb[8].mxu0  ;;  %v1096_v3 = vpack.c.bf16 %v1698_v15, %v1698_v15 }
 0x1af   : > { %v1085_v31 = vpack.c.bf16 %v1140_v27, %v1140_v27  ;;  %v412_v32 = vpop.f32.mrb[9].mxu0  ;;  %v782_v35 = vadd.f32 %v781_v29, %v780_v26  ;;  %v683_v37 = vadd.f32 %v682_v30, %v681_v25  ;;  %v748_v53 = vmul.f32 %v1140_v27, %v1140_v27  ;;  %659 = vst.msk [vmem:[%s1650_s22 + $0x5c] sm:$0xf] %vm635_vm1, %v1098_v62 }
 0x1b0   : > { %v1715_v34 = vpop.f32.mrb[8].mxu1  ;;  %v1083_v36 = vpack.c.bf16 %v412_v32, %v412_v32  ;;  %v684_v39 = vsel %vm668_vm2, %v412_v32, 0.0  ;;  %v1141_v40 = vpop.f32.mrb[10].mxu0  ;;  %v746_v44 = vmul.f32 %v412_v32, %v412_v32  ;;  %v688_v59 = vsel %vm668_vm2, %v1140_v27, 0.0  ;;  %657 = vst.msk [vmem:[%s1650_s22 + $0x54] sm:$0xf] %vm635_vm1, %v1096_v3 }
 0x1b1   : > { %v1720_v41 = vpop.f32.mrb[9].mxu1  ;;  %646 = vst.msk [vmem:[%s1650_s22 + $0x28] sm:$0xf] %vm635_vm1, %v1085_v31  ;;  %v1086_v45 = vpack.c.bf16 %v1141_v40, %v1141_v40  ;;  %v415_v46 = vpop.f32.mrb[11].mxu0  ;;  %v685_v49 = vadd.f32 %v684_v39, %v683_v37  ;;  %v784_v50 = vadd.f32 %v783_v43, %v782_v35  ;;  %v749_v60 = vmul.f32 %v1141_v40, %v1141_v40 }
 0x1b2   : > { %v1725_v48 = vpop.f32.mrb[10].mxu1  ;;  %644 = vst.msk [vmem:[%s1650_s22 + $0x20] sm:$0xf] %vm635_vm1, %v1083_v36  ;;  %v1084_v51 = vpack.c.bf16 %v415_v46, %v415_v46  ;;  %v785_v54 = vsel %vm668_vm2, %v746_v44, 0.0  ;;  %v686_v55 = vsel %vm668_vm2, %v415_v46, 0.0  ;;  %v747_v56 = vmul.f32 %v415_v46, %v415_v46 }
 0x1b3   : > { %v1729_v52 = vpop.f32.mrb[11].mxu1  ;;  %647 = vst.msk [vmem:[%s1650_s22 + $0x2c] sm:$0xf] %vm635_vm1, %v1086_v45  ;;  %v786_v57 = vadd.f32 %v785_v54, %v784_v50  ;;  %v687_v58 = vadd.f32 %v686_v55, %v685_v49  ;;  %v789_v4 = vsel %vm668_vm2, %v748_v53, 0.0  ;;  %v690_v5 = vsel %vm668_vm2, %v1141_v40, 0.0 }
 0x1b4   : > { %645 = vst.msk [vmem:[%s1650_s22 + $0x24] sm:$0xf] %vm635_vm1, %v1084_v51  ;;  %v787_v61 = vsel %vm668_vm2, %v747_v56, 0.0  ;;  %v791_v18 = vsel %vm668_vm2, %v749_v60, 0.0  ;;  %v754_v35 = vmul.f32 %v1648_v38, %v1648_v38  ;;  %v1101_v40 = vpack.c.bf16 %v1715_v34, %v1715_v34 }
 0x1b5   : > { %v689_v63 = vadd.f32 %v688_v59, %v687_v58  ;;  %v788_v0 = vadd.f32 %v787_v61, %v786_v57  ;;  %v1099_v45 = vpack.c.bf16 %v1720_v41, %v1720_v41  ;;  %v700_v50 = vsel %vm668_vm2, %v1648_v38, 0.0 }
 0x1b6   : > { %v1144_v2 = vpop.f32.mrb[12].mxu0  ;;  %662 = vst.msk [vmem:[%s1650_s22 + $0x68] sm:$0xf] %vm635_vm1, %v1101_v40  ;;  %v1102_v51 = vpack.c.bf16 %v1725_v48, %v1725_v48  ;;  %v801_v56 = vsel %vm668_vm2, %v754_v35, 0.0  ;;  %v755_v57 = vmul.f32 %v1662_v47, %v1662_v47  ;;  %v1100_v38 = vpack.c.bf16 %v1729_v52, %v1729_v52 }
 0x1b7   : > { %v1089_v6 = vpack.c.bf16 %v1144_v2, %v1144_v2  ;;  %v428_v8 = vpop.f32.mrb[13].mxu0  ;;  %v790_v10 = vadd.f32 %v789_v4, %v788_v0  ;;  %v691_v13 = vadd.f32 %v690_v5, %v689_v63  ;;  %v752_v27 = vmul.f32 %v1144_v2, %v1144_v2  ;;  %660 = vst.msk [vmem:[%s1650_s22 + $0x60] sm:$0xf] %vm635_vm1, %v1099_v45 }
 0x1b8   : > { %v1747_v9 = vpop.f32.mrb[12].mxu1  ;;  %v1087_v12 = vpack.c.bf16 %v428_v8, %v428_v8  ;;  %v692_v14 = vsel %vm668_vm2, %v428_v8, 0.0  ;;  %v1145_v16 = vpop.f32.mrb[14].mxu0  ;;  %v750_v19 = vmul.f32 %v428_v8, %v428_v8  ;;  %v696_v36 = vsel %vm668_vm2, %v1144_v2, 0.0  ;;  %663 = vst.msk [vmem:[%s1650_s22 + $0x6c] sm:$0xf] %vm635_vm1, %v1102_v51 }
 0x1b9   : > { %v1752_v17 = vpop.f32.mrb[13].mxu1  ;;  %650 = vst.msk [vmem:[%s1650_s22 + $0x38] sm:$0xf] %vm635_vm1, %v1089_v6  ;;  %v1090_v20 = vpack.c.bf16 %v1145_v16, %v1145_v16  ;;  %v431_v21 = vpop.f32.mrb[15].mxu0  ;;  %v693_v23 = vadd.f32 %v692_v14, %v691_v13  ;;  %v792_v24 = vadd.f32 %v791_v18, %v790_v10  ;;  %v753_v37 = vmul.f32 %v1145_v16, %v1145_v16 }
 0x1ba   : > { %v1757_v22 = vpop.f32.mrb[14].mxu1  ;;  %648 = vst.msk [vmem:[%s1650_s22 + $0x30] sm:$0xf] %vm635_vm1, %v1087_v12  ;;  %v1088_v25 = vpack.c.bf16 %v431_v21, %v431_v21  ;;  %v793_v28 = vsel %vm668_vm2, %v750_v19, 0.0  ;;  %v694_v29 = vsel %vm668_vm2, %v431_v21, 0.0  ;;  %v751_v30 = vmul.f32 %v431_v21, %v431_v21 }
 0x1bb   : > { %v1761_v26 = vpop.f32.mrb[15].mxu1  ;;  %651 = vst.msk [vmem:[%s1650_s22 + $0x3c] sm:$0xf] %vm635_vm1, %v1090_v20  ;;  %v794_v31 = vadd.f32 %v793_v28, %v792_v24  ;;  %v695_v32 = vadd.f32 %v694_v29, %v693_v23  ;;  %v797_v46 = vsel %vm668_vm2, %v752_v27, 0.0  ;;  %v698_v49 = vsel %vm668_vm2, %v1145_v16, 0.0 }
 0x1bc   : > { %649 = vst.msk [vmem:[%s1650_s22 + $0x34] sm:$0xf] %vm635_vm1, %v1088_v25  ;;  %v795_v39 = vsel %vm668_vm2, %v751_v30, 0.0  ;;  %v799_v55 = vsel %vm668_vm2, %v753_v37, 0.0  ;;  %v1105_v60 = vpack.c.bf16 %v1747_v9, %v1747_v9  ;;  %v756_v61 = vmul.f32 %v1644_v33, %v1644_v33  ;;  %661 = vst.msk [vmem:[%s1650_s22 + $0x64] sm:$0xf] %vm635_vm1, %v1100_v38 }
 0x1bd   : > { %v697_v43 = vadd.f32 %v696_v36, %v695_v32  ;;  %v796_v44 = vadd.f32 %v795_v39, %v794_v31  ;;  %v702_v62 = vsel %vm668_vm2, %v1662_v47, 0.0  ;;  %v1103_v63 = vpack.c.bf16 %v1752_v17, %v1752_v17 }
 0x1be   : > { %v704_v0 = vsel %vm668_vm2, %v1644_v33, 0.0  ;;  %666 = vst.msk [vmem:[%s1650_s22 + $0x78] sm:$0xf] %vm635_vm1, %v1105_v60  ;;  %v757_v4 = vmul.f32 %v1654_v42, %v1654_v42  ;;  %v803_v5 = vsel %vm668_vm2, %v755_v57, 0.0  ;;  %v758_v47 = vmul.f32 %v1689_v7, %v1689_v7 }
 0x1bf   : > { %v798_v53 = vadd.f32 %v797_v46, %v796_v44  ;;  %v699_v54 = vadd.f32 %v698_v49, %v697_v43  ;;  %664 = vst.msk [vmem:[%s1650_s22 + $0x70] sm:$0xf] %vm635_vm1, %v1103_v63  ;;  %v1106_v6 = vpack.c.bf16 %v1757_v22, %v1757_v22  ;;  %v1104_v10 = vpack.c.bf16 %v1761_v26, %v1761_v26 }
 0x1c0   : > { %v805_v12 = vsel %vm668_vm2, %v756_v61, 0.0  ;;  %v706_v13 = vsel %vm668_vm2, %v1654_v42, 0.0  ;;  %v708_v14 = vsel %vm668_vm2, %v1689_v7, 0.0  ;;  %v807_v19 = vsel %vm668_vm2, %v757_v4, 0.0 }
 0x1c1   : > { %v701_v58 = vadd.f32 %v700_v50, %v699_v54  ;;  %v800_v59 = vadd.f32 %v799_v55, %v798_v53  ;;  %667 = vst.msk [vmem:[%s1650_s22 + $0x7c] sm:$0xf] %vm635_vm1, %v1106_v6  ;;  %665 = vst.msk [vmem:[%s1650_s22 + $0x74] sm:$0xf] %vm635_vm1, %v1104_v10  ;;  %v809_v20 = vsel %vm668_vm2, %v758_v47, 0.0  ;;  %v759_v21 = vmul.f32 %v1698_v15, %v1698_v15 }
 0x1c2   : > { %v760_v42 = vmul.f32 %v1684_v1, %v1684_v1  ;;  %v710_v7 = vsel %vm668_vm2, %v1698_v15, 0.0  ;;  %v712_v28 = vsel %vm668_vm2, %v1684_v1, 0.0  ;;  %v761_v29 = vmul.f32 %v1693_v11, %v1693_v11 }
 0x1c3   : > { %v802_v2 = vadd.f32 %v801_v56, %v800_v59  ;;  %v703_v3 = vadd.f32 %v702_v62, %v701_v58  ;;  %v811_v30 = vsel %vm668_vm2, %v759_v21, 0.0  ;;  %v762_v31 = vmul.f32 %v1720_v41, %v1720_v41 }
 0x1c4   : > { %v813_v36 = vsel %vm668_vm2, %v760_v42, 0.0  ;;  %v714_v15 = vsel %vm668_vm2, %v1693_v11, 0.0  ;;  %v716_v37 = vsel %vm668_vm2, %v1720_v41, 0.0  ;;  %v815_v40 = vsel %vm668_vm2, %v761_v29, 0.0 }
 0x1c5   : > { %v705_v8 = vadd.f32 %v704_v0, %v703_v3  ;;  %v804_v33 = vadd.f32 %v803_v5, %v802_v2  ;;  %v817_v43 = vsel %vm668_vm2, %v762_v31, 0.0  ;;  %v763_v44 = vmul.f32 %v1729_v52, %v1729_v52 }
 0x1c6   : > { %v764_v49 = vmul.f32 %v1715_v34, %v1715_v34  ;;  %v718_v11 = vsel %vm668_vm2, %v1729_v52, 0.0  ;;  %v720_v41 = vsel %vm668_vm2, %v1715_v34, 0.0  ;;  %v765_v53 = vmul.f32 %v1725_v48, %v1725_v48 }
 0x1c7   : > { %v806_v16 = vadd.f32 %v805_v12, %v804_v33  ;;  %v707_v18 = vadd.f32 %v706_v13, %v705_v8  ;;  %v819_v54 = vsel %vm668_vm2, %v763_v44, 0.0  ;;  %v766_v55 = vmul.f32 %v1752_v17, %v1752_v17 }
 0x1c8   : > { %v821_v38 = vsel %vm668_vm2, %v764_v49, 0.0  ;;  %v722_v52 = vsel %vm668_vm2, %v1725_v48, 0.0  ;;  %v724_v58 = vsel %vm668_vm2, %v1752_v17, 0.0  ;;  %v823_v60 = vsel %vm668_vm2, %v765_v53, 0.0 }
 0x1c9   : > { %v709_v23 = vadd.f32 %v708_v14, %v707_v18  ;;  %v808_v24 = vadd.f32 %v807_v19, %v806_v16  ;;  %v825_v61 = vsel %vm668_vm2, %v766_v55, 0.0  ;;  %v767_v62 = vmul.f32 %v1761_v26, %v1761_v26 }
 0x1ca   : > { %v768_v2 = vmul.f32 %v1747_v9, %v1747_v9  ;;  %v726_v48 = vsel %vm668_vm2, %v1761_v26, 0.0  ;;  %v728_v4 = vsel %vm668_vm2, %v1747_v9, 0.0  ;;  %v769_v5 = vmul.f32 %v1757_v22, %v1757_v22 }
 0x1cb   : > { %v810_v25 = vadd.f32 %v809_v20, %v808_v24  ;;  %v711_v27 = vadd.f32 %v710_v7, %v709_v23  ;;  %v827_v47 = vsel %vm668_vm2, %v767_v62, 0.0  ;;  %v730_v26 = vsel %vm668_vm2, %v1757_v22, 0.0 }
 0x1cc   : > { %v829_v33 = vsel %vm668_vm2, %v768_v2, 0.0  ;;  %v831_v13 = vsel %vm668_vm2, %v769_v5, 0.0 }
 0x1cd   : > { %v713_v32 = vadd.f32 %v712_v28, %v711_v27  ;;  %v812_v35 = vadd.f32 %v811_v30, %v810_v25 }
 0x1cf   : > { %v814_v39 = vadd.f32 %v813_v36, %v812_v35  ;;  %v715_v1 = vadd.f32 %v714_v15, %v713_v32 }
 0x1d1   : > { %v717_v45 = vadd.f32 %v716_v37, %v715_v1  ;;  %v816_v46 = vadd.f32 %v815_v40, %v814_v39 }
 0x1d3   : > { %v818_v50 = vadd.f32 %v817_v43, %v816_v46  ;;  %v719_v51 = vadd.f32 %v718_v11, %v717_v45 }
 0x1d5   : > { %v721_v56 = vadd.f32 %v720_v41, %v719_v51  ;;  %v820_v57 = vadd.f32 %v819_v54, %v818_v50 }
 0x1d7   : > { %v822_v59 = vadd.f32 %v821_v38, %v820_v57  ;;  %v723_v34 = vadd.f32 %v722_v52, %v721_v56 }
 0x1d9   : > { %v725_v63 = vadd.f32 %v724_v58, %v723_v34  ;;  %v824_v0 = vadd.f32 %v823_v60, %v822_v59 }
 0x1db   : > { %v826_v3 = vadd.f32 %v825_v61, %v824_v0  ;;  %v727_v17 = vadd.f32 %v726_v48, %v725_v63 }
 0x1dd   : > { %v729_v6 = vadd.f32 %v728_v4, %v727_v17  ;;  %v828_v8 = vadd.f32 %v827_v47, %v826_v3 }
 0x1df   : > { %v731_v10 = vadd.f32 %v730_v26, %v729_v6  ;;  %v830_v12 = vadd.f32 %v829_v33, %v828_v8 }
 0x1e1   : > { %v832_v14 = vadd.f32 %v831_v13, %v830_v12 }
 0x1e3   : > { %v833_v9 = vrot.slane %v832_v14, 4 }
 0x1e5   : > { %v834_v16 = vadd.f32 %v833_v9, %v832_v14 }
 0x1e6   : > { %1325 = shalt.err (!%p1322_p5)
}
 0x1e7   : > { %s1326_s25 = scalar_lea.hbm %s1890_s11, 2048  ;;  %s1330_s6 = scalar_lea.hbm %s1976_s2, 4096 }
 0x1e8   : > { %p1327_p9 = scmp.ne.s32.totalorder %s1890_s11, %s1326_s25  ;;  %p1331_p3 = scmp.lt.u32.totalorder %s1890_s11, %s1976_s2 }
 0x1e9   : > { %p1332_p7 = scmp.lt.u32.totalorder %s1330_s6, %s1326_s25  ;;  %p1334_p13 = scmp.lt.u32.totalorder %s1326_s25, %s1890_s11 }
 0x1ea   : > { %p1328_p1 = pnand %p1327_p9, %p1559_p10 }
 0x1eb   : > { %p1333_p4 = por %p1332_p7, %p1331_p3 }
 0x1ec   : > { %p1329_p2 = pneg %p1328_p1 }
 0x1ed   : > { %p1335_p6 = por %p1334_p13, %p1333_p4 }
 0x1ef   : > { %p1336_p8 = pnand %p1335_p6, %p1329_p2 }
 0x1f1   : > { %1339 = shalt.err (!%p1336_p8)
}
 0x1f2   : > { %s1439_s24 = smov 64   ;;  %s1440_s9 = smov 4   ;;  %v835_v22 = vrot.slane %v834_v16, 2  ;;  %v732_v21 = vrot.slane %v731_v10, 4  ;;  %vm844_vm3 = vcmask 122880  }
 0x1f3   : > { %1172 = dma.vmem_to_hbm [thread:$0]  (%p1559_p10), %s1893_s18, 2048, %s1890_s11, %s847_s26, %s1439_s24, %s1439_s24, %s1440_s9  }
 0x1f4   : > { %v836_v18 = vadd.f32 %v835_v22, %v834_v16  ;;  %s1441_s10 = smov 8   ;;  %v733_v23 = vadd.f32 %v732_v21, %v731_v10  ;;  %s1071_s7 = sshll.u32 %s1422_s15, 4 }
 0x1f5   : > { %s233_s8 = scalar_lea.vmem [#allocation8], %s1615_s27  ;;  %s1924_s26 = scalar_lea.hbm %s1977_s3, %s1071_s7 }
 0x1f6   : > { %v837_v19 = vrot.slane %v836_v18, 1  ;;  %v734_v24 = vrot.slane %v733_v23, 2  ;;  %s883_s21 = sshll.u32 %s233_s8, 4  ;;  %s852_s19 = scalar_lea.sflag [#allocation9], %s1615_s27  ;;  %s1926_s21 = int_to_ptr.vmem [resolvable:$true] %s883_s21 }
 0x1f7   : > { %s1340_s15 = scalar_lea.vmem %s1926_s21, 16  ;;  %s1442_s25 = smov [#allocation8]  }
 0x1f8   : > { %v838_v20 = vadd.f32 %v837_v19, %v836_v18  ;;  %v735_v42 = vadd.f32 %v734_v24, %v733_v23  ;;  %p1341_p12 = scmp.ne.s32.totalorder %s1926_s21, %s1340_s15  ;;  %s1344_s29 = sshll.u32 %s1442_s25, 4  ;;  %s1345_s29 = int_to_ptr.vmem [resolvable:$false] %s1344_s29 }
 0x1f9   : > { %s1346_s4 = scalar_lea.vmem %s1345_s29, 32  ;;  %p1347_p5 = scmp.lt.s32.totalorder %s1926_s21, %s1345_s29 }
 0x1fa   : > { %840 = vrot.lane.b32.xlu0 %v838_v20, %s1441_s10  ;;  %v736_v7 = vrot.slane %v735_v42, 1  ;;  %p1342_p11 = pnand %p1341_p12, %p1559_p10  ;;  %p1348_p9 = scmp.lt.s32.totalorder %s1346_s4, %s1340_s15 }
 0x1fc   : > { %v737_v25 = vadd.f32 %v736_v7, %v735_v42  ;;  %p1343_p0 = pneg %p1342_p11  ;;  %p1349_p1 = por %p1348_p9, %p1347_p5 }
 0x1fe   : > { %p1350_p2 = pnand %p1349_p1, %p1343_p0 }
 0x26c   : > { %v841_v27 = vpop.permute.xlu0 %840 }
 0x26d   : > { %v843_v28 = vsel %vm668_vm2, %v737_v25, %v841_v27 }
 0x26e   : > { %845 = vst.msk [vmem:[%s233_s8] sm:$0x1] %vm844_vm3, %v843_v28 }
 0x26f   : > { %1353 = shalt.err (!%p1350_p2)
}
 0x270   : > { %s1354_s27 = scalar_lea.hbm %s1924_s26, 16  ;;  %s1358_s22 = scalar_lea.hbm %s1977_s3, 32 }
 0x271   : > { %p1355_p3 = scmp.ne.s32.totalorder %s1924_s26, %s1354_s27  ;;  %p1359_p13 = scmp.lt.u32.totalorder %s1924_s26, %s1977_s3 }
 0x272   : > { %p1360_p6 = scmp.lt.u32.totalorder %s1358_s22, %s1354_s27  ;;  %p1362_p12 = scmp.lt.u32.totalorder %s1354_s27, %s1924_s26 }
 0x273   : > { %p1356_p7 = pnand %p1355_p3, %p1559_p10 }
 0x274   : > { %p1361_p8 = por %p1360_p6, %p1359_p13 }
 0x275   : > { %p1357_p4 = pneg %p1356_p7 }
 0x276   : > { %p1363_p11 = por %p1362_p12, %p1361_p8 }
 0x278   : > { %p1364_p0 = pnand %p1363_p11, %p1357_p4 }
 0x27a   : > { %1367 = shalt.err (!%p1364_p0)
}
 0x27b   : > { %1173 = dma.vmem_to_hbm [thread:$0]  (%p1559_p10), %s1926_s21, 16, %s1924_s26, %s852_s19  }
 0x27c PF: > { %s895_s10 = sand.u32 1, %s1410_s12   ;;  %p1995_p5 = scmp.ne.s32.totalorder %s1985_s23, 0 }
 0x27d   : > { %p1996_p9 = scmp.ge.s32.totalorder %s1430_s17, 2  ;;  %s896_s7 = scalar_lea.sflag [#allocation4], %s895_s10 }
 0x27f   : > { %p1185_p1 = pnand %p1996_p9, %p1995_p5 }
 0x281   : > { %1401 = dma.done.wait (!%p1185_p1), %s896_s7, 2048  }
 0x282   : > { %1403 = vsyncadd (!%p1185_p1), %s896_s7, 4294965248  ;;  %s905_s8 = scalar_lea.sflag [#allocation9], %s895_s10 }
 0x283   : > { %1405 = dma.done.wait (!%p1185_p1), %s905_s8, 16  }
 0x284   : > { %1407 = vsyncadd (!%p1185_p1), %s905_s8, 4294967280  ;;  %s24_s17 = sadd.s32 1, %s1430_s17   ;;  %s1997_s12 = smov %s1414_s13 }
 0x285   : > { %p21_p2 = scmp.ge.s32.totalorder %s24_s17, 4   ;;  %s1998_s13 = smov %s1418_s14 }
 0x286   : > { %s1999_s14 = smov %s1568_s5  ;;  %s2000_s15 = smov %s1426_s16 }
 0x287   : > { %s2001_s16 = smov %s2003_s28  ;;  %23 = sbr.rel (!%p21_p2) target bundleno = 9 (0x9), region = 94 }
 0x28e   :  { %909 = vsyncpa [#allocation3], 1 }
 0x28f   :  { %911 = vsyncpa [#allocation3 + $0x1], 1 }
 0x290   :  { %912 = vsyncpa [#allocation6], 1 }
 0x291   :  { %913 = vsyncpa [#allocation4], 1 }
 0x292   :  { %915 = vsyncpa [#allocation4 + $0x1], 1 }
 0x293   :  { %916 = vsyncpa [#allocation9], 1 }
 0x294   :  { %918 = vsyncpa [#allocation9 + $0x1], 1 }

// kernel: bottleneck_forward.6
= control target key start
LH: loop header
LB: loop body
LE: loop exit
PB: predicated region body
PF: predicated region fallthrough
CT: control target
= control target key end

     0   :  { %11 = vsyncpa [#allocation3], 0  ;;  %s1904_s0 = inlined_call_operand.hbm [shape: bf16[2,256,8], index: 0, kind: input, shape index: {}]   ;;  %s1905_s1 = inlined_call_operand.hbm [shape: f32[1,8], index: 1, kind: input, shape index: {}]   ;;  %s1906_s2 = inlined_call_operand.hbm [shape: f32[1,8], index: 2, kind: input, shape index: {}]   ;;  %s1907_s3 = inlined_call_operand.hbm [shape: bf16[32,8], index: 3, kind: input, shape index: {}]   ;;  %s1908_s4 = inlined_call_operand.hbm [shape: bf16[2,32,256], index: 4, kind: output, shape index: {0}]   ;;  %s1909_s5 = inlined_call_operand.hbm [shape: f32[2,1,32,2], index: 5, kind: output, shape index: {1}]  }
   0x1   :  { %13 = vsyncpa [#allocation3 + $0x1], 0 }
   0x2   :  { %14 = vsyncpa [#allocation6], 0 }
   0x3   :  { %15 = vsyncpa [#allocation9], 0 }
   0x4   :  { %16 = vsyncpa [#allocation4], 0 }
   0x5   :  { %18 = vsyncpa [#allocation4 + $0x1], 0 }
   0x6   :  { %19 = vsyncpa [#allocation12], 0 }
   0x7   :  { %21 = vsyncpa [#allocation12 + $0x1], 0  ;;  %s1444_s18 = smov 0   ;;  %s1446_s19 = smov 0  }
   0x8   :  { %s1448_s20 = smov 0   ;;  %s1450_s21 = smov 0  }
   0x9   :  { %s1452_s22 = smov 0   ;;  %s1454_s23 = smov 0  }
   0xa LB: > { %s889_s24 = sadd.s32 4294967295, %s1402_s23   ;;  %s890_s25 = sadd.s32 4294967294, %s1402_s23   ;;  %s1402_s23 = sphi %s1454_s23, %s27_s23   ;;  %s1398_s22 = sphi %s1452_s22, %s1935_s22   ;;  %s1394_s21 = sphi %s1450_s21, %s1934_s21   ;;  %s1390_s20 = sphi %s1448_s20, %s1933_s20   ;;  %s1386_s19 = sphi %s1446_s19, %s1932_s19   ;;  %s1382_s18 = sphi %s1444_s18, %s1931_s18  }
   0xb   : > { %p61_p0 = scmp.ne.s32.totalorder %s1386_s19, %s1382_s18  ;;  %p1478_p1 = scmp.eq.s32.totalorder %s889_s24, 0 }
   0xc   : > { %p1482_p2 = scmp.eq.s32.totalorder %s889_s24, 1  ;;  %p156_p3 = scmp.eq.s32.totalorder %s890_s25, 1 }
   0xd   : > { %s1915_s26 = scalar_select %p1478_p1, 1, 0 }
   0xe   : > { %s1916_s27 = scalar_select %p1482_p2, 1, 0 }
   0xf   : > { %p1488_p4 = por %p1478_p1, %p61_p0  ;;  %p891_p5 = scmp.ge.s32.totalorder %s1402_s23, 1 }
  0x10   : > { %p1493_p6 = por %p156_p3, %p61_p0  ;;  %p191_p7 = scmp.lt.s32.totalorder %s1402_s23, 3 }
  0x11   : > { %s1917_s28 = scalar_select %p1488_p4, 1, 0 }
  0x12   : > { %s1918_s29 = scalar_select %p1493_p6, 1, 0 }
  0x13   : > { %p1498_p8 = pnand %p891_p5, %p191_p7  ;;  %s1404_s6 = smov [#allocation5]  }
  0x14   : > { %s204_s7 = sshll.u32 %s1404_s6, 4  ;;  %s1405_s8 = smov [#allocation7]   ;;  %s205_s7 = int_to_ptr.vmem [resolvable:$true] %s204_s7 }
  0x15   : > { %s1919_s30 = scalar_select %p1498_p8, 1, 0 }
  0x16   : > { %p1080_p10 = pneg %p1498_p8  ;;  %s215_s9 = sshll.u32 %s1405_s8, 4  ;;  %s1511_s9 = int_to_ptr.vmem [resolvable:$true] %s215_s9 }
  0x17   : > { %s1406_s11 = smov [#allocation8]   ;;  %s1166_s15 = scalar_lea.hbm %s1905_s1, 16 }
  0x18   : > { %p1507_p11 = pnand %p1080_p10, %p1478_p1  ;;  %s225_s12 = sshll.u32 %s1406_s11, 4  ;;  %s1513_s12 = int_to_ptr.vmem [resolvable:$true] %s225_s12 }
  0x19   : > { %p1167_p12 = scmp.ne.s32.totalorder %s1905_s1, %s1166_s15  ;;  %p1173_p5 = scmp.lt.u32.totalorder %s1166_s15, %s1905_s1 }
  0x1a   : > { %p1523_p13 = pneg %p1507_p11 }
  0x1c   : > { %p1169_p0 = pnand %p1523_p13, %p1167_p12 }
  0x1e   : > { %p1170_p3 = pneg %p1169_p0 }
  0x20   : > { %p1175_p7 = pnand %p1173_p5, %p1170_p3 }
  0x22   : > { %1178 = shalt.err (!%p1175_p7)
}
  0x23   : > { %s1179_s8 = scalar_lea.vmem %s205_s7, 16  ;;  %s1186_s11 = scalar_lea.vmem %s205_s7, 32 }
  0x24   : > { %p1180_p10 = scmp.ne.s32.totalorder %s205_s7, %s1179_s8  ;;  %p1187_p1 = scmp.lt.s32.totalorder %s205_s7, %s205_s7 }
  0x25   : > { %p1188_p4 = scmp.lt.s32.totalorder %s1186_s11, %s1179_s8 }
  0x26   : > { %p1182_p9 = pnand %p1180_p10, %p1523_p13 }
  0x27   : > { %p1189_p8 = por %p1188_p4, %p1187_p1 }
  0x28   : > { %p1183_p6 = pneg %p1182_p9 }
  0x2a   : > { %p1190_p2 = pnand %p1189_p8, %p1183_p6 }
  0x2c   : > { %1193 = shalt.err (!%p1190_p2)
}
  0x2d   : > { %1083 = dma.hbm_to_vmem [thread:$0]  (!%p1507_p11), %s1905_s1, 16, %s205_s7, [#allocation6]  }
  0x2e   : > { %s1194_s17 = scalar_lea.hbm %s1906_s2, 16 }
  0x2f   : > { %p1195_p9 = scmp.ne.s32.totalorder %s1906_s2, %s1194_s17  ;;  %p1201_p2 = scmp.lt.u32.totalorder %s1194_s17, %s1906_s2 }
  0x31   : > { %p1197_p12 = pnand %p1195_p9, %p1523_p13 }
  0x33   : > { %p1198_p1 = pneg %p1197_p12 }
  0x35   : > { %p1203_p4 = pnand %p1201_p2, %p1198_p1 }
  0x37   : > { %1206 = shalt.err (!%p1203_p4)
}
  0x38   : > { %s1207_s7 = scalar_lea.vmem %s1511_s9, 16  ;;  %s1214_s13 = scalar_lea.vmem %s1511_s9, 32 }
  0x39   : > { %p1208_p6 = scmp.ne.s32.totalorder %s1511_s9, %s1207_s7  ;;  %p1215_p3 = scmp.lt.s32.totalorder %s1511_s9, %s1511_s9 }
  0x3a   : > { %p1216_p5 = scmp.lt.s32.totalorder %s1214_s13, %s1207_s7 }
  0x3b   : > { %p1210_p8 = pnand %p1208_p6, %p1523_p13 }
  0x3c   : > { %p1217_p7 = por %p1216_p5, %p1215_p3 }
  0x3d   : > { %p1211_p0 = pneg %p1210_p8 }
  0x3f   : > { %p1218_p10 = pnand %p1217_p7, %p1211_p0 }
  0x41   : > { %1221 = shalt.err (!%p1218_p10)
}
  0x42   : > { %1086 = dma.hbm_to_vmem [thread:$0]  (!%p1507_p11), %s1906_s2, 16, %s1511_s9, [#allocation6]  }
  0x43   : > { %s1222_s25 = scalar_lea.hbm %s1907_s3, 256 }
  0x44   : > { %p1223_p9 = scmp.ne.s32.totalorder %s1907_s3, %s1222_s25  ;;  %p1229_p2 = scmp.lt.u32.totalorder %s1222_s25, %s1907_s3 }
  0x46   : > { %p1225_p12 = pnand %p1223_p9, %p1523_p13 }
  0x48   : > { %p1226_p1 = pneg %p1225_p12 }
  0x4a   : > { %p1231_p4 = pnand %p1229_p2, %p1226_p1 }
  0x4c   : > { %1234 = shalt.err (!%p1231_p4)
}
  0x4d   : > { %s1235_s9 = scalar_lea.vmem %s1513_s12, 256  ;;  %p1243_p3 = scmp.lt.s32.totalorder %s1513_s12, %s1513_s12 }
  0x4e   : > { %p1236_p6 = scmp.ne.s32.totalorder %s1513_s12, %s1235_s9  ;;  %p1244_p5 = scmp.lt.s32.totalorder %s1235_s9, %s1235_s9 }
  0x50   : > { %p1238_p8 = pnand %p1236_p6, %p1523_p13  ;;  %p1245_p7 = por %p1244_p5, %p1243_p3 }
  0x52   : > { %p1239_p0 = pneg %p1238_p8 }
  0x54   : > { %p1246_p10 = pnand %p1245_p7, %p1239_p0 }
  0x56   : > { %1249 = shalt.err (!%p1246_p10)
}
  0x57   : > { %s1914_s13 = smov 64   ;;  %s1408_s24 = smov 4  }
  0x58   : > { %1089 = dma.hbm_to_vmem [thread:$0]  (!%p1507_p11), %s1907_s3, 256, %s1513_s12, [#allocation9], %s1914_s13, %s1914_s13, %s1408_s24  }
  0x59   : > { %s48_s16 = sadd.s32 1, %s1390_s20  ;;  %s39_s17 = sadd.s32 1, %s1398_s22 }
  0x5a   : > { %p55_p13 = scmp.ne.s32.totalorder %s1390_s20, %s1386_s19  ;;  %p41_p9 = scmp.ge.s32.totalorder %s39_s17, 2 }
  0x5b   : > { %p56_p12 = scmp.eq.s32.totalorder %s1402_s23, 0  ;;  %p1922_p1 = scmp.ne.s32.totalorder %s1916_s27, 0 }
  0x5c   : > { %p1104_p4 = scmp.lt.s32.totalorder %s1402_s23, 2  ;;  %s1937_s17 = smov (%p41_p9, %s39_s17), 0 }
  0x5d   : > { %p1596_p2 = por %p1922_p1, %p55_p13  ;;  %p57_p6 = por %p56_p12, %p55_p13 }
  0x5e   : > { %s239_s10 = sand.u32 1, %s1390_s20   ;;  %s43_s6 = ssub.s32 %s1398_s22, %s1937_s17 }
  0x5f   : > { %p46_p8 = scmp.eq.s32.totalorder %s43_s6, 0  ;;  %s896_s12 = sshll.u32 %s239_s10, 7 }
  0x60   : > { %s924_s8 = sshll.u32 %s1398_s22, 11  ;;  %s243_s14 = scalar_lea.vmem [#allocation2], %s896_s12 }
  0x61   : > { %s1608_s11 = scalar_select %p46_p8, %s1390_s20, %s48_s16  }
  0x62   : > { %s1613_s27 = scalar_lea.hbm %s1904_s0, %s924_s8  ;;  %s252_s15 = sshll.u32 %s243_s14, 4  ;;  %s1615_s15 = int_to_ptr.vmem [resolvable:$true] %s252_s15 }
  0x63   : > { %p1619_p11 = pnand %p1104_p4, %p57_p6  ;;  %s1623_s16 = scalar_lea.sflag [#allocation3], %s239_s10 }
  0x64   : > { %s1250_s7 = scalar_lea.hbm %s1613_s27, 2048  ;;  %s1255_s9 = scalar_lea.hbm %s1904_s0, 4096 }
  0x65   : > { %p1251_p0 = scmp.ne.s32.totalorder %s1613_s27, %s1250_s7  ;;  %p1252_p3 = pneg %p1619_p11 }
  0x66   : > { %p1256_p10 = scmp.lt.u32.totalorder %s1613_s27, %s1904_s0  ;;  %p1257_p13 = scmp.lt.u32.totalorder %s1255_s9, %s1250_s7 }
  0x67   : > { %p1253_p5 = pnand %p1252_p3, %p1251_p0  ;;  %p1259_p12 = scmp.lt.u32.totalorder %s1250_s7, %s1613_s27 }
  0x68   : > { %p1258_p9 = por %p1257_p13, %p1256_p10 }
  0x69   : > { %p1254_p7 = pneg %p1253_p5 }
  0x6a   : > { %p1260_p1 = por %p1259_p12, %p1258_p9 }
  0x6c   : > { %p1261_p4 = pnand %p1260_p1, %p1254_p7 }
  0x6e   : > { %1264 = shalt.err (!%p1261_p4)
}
  0x6f   : > { %s1265_s10 = scalar_lea.vmem %s1615_s15, 2048  ;;  %s1409_s12 = smov [#allocation2]  }
  0x70   : > { %p1266_p6 = scmp.ne.s32.totalorder %s1615_s15, %s1265_s10  ;;  %s1270_s8 = sshll.u32 %s1409_s12, 4  ;;  %s1271_s8 = int_to_ptr.vmem [resolvable:$false] %s1270_s8 }
  0x71   : > { %s1272_s13 = scalar_lea.vmem %s1271_s8, 4096  ;;  %p1273_p5 = scmp.lt.s32.totalorder %s1615_s15, %s1271_s8 }
  0x72   : > { %p1268_p8 = pnand %p1266_p6, %p1252_p3  ;;  %p1274_p10 = scmp.lt.s32.totalorder %s1272_s13, %s1265_s10 }
  0x74   : > { %p1269_p0 = pneg %p1268_p8  ;;  %p1275_p13 = por %p1274_p10, %p1273_p5 }
  0x76   : > { %p1276_p9 = pnand %p1275_p13, %p1269_p0 }
  0x78   : > { %1279 = shalt.err (!%p1276_p9)
}
  0x79   : > { %s1925_s7 = smov 64   ;;  %p1926_p3 = scmp.ne.s32.totalorder %s1919_s30, 0 }
  0x7a   : > { %1093 = dma.hbm_to_vmem [thread:$0]  (!%p1619_p11), %s1613_s27, 2048, %s1615_s15, %s1623_s16, %s1925_s7, %s1925_s7, %s1408_s24  }
  0x7b   : > { %264 = sbr.rel (%p1926_p3) target bundleno = 598 (0x256), region = 36  ;;  %s1657_s9 = sand.u32 (!%p1926_p3), 1, %s1386_s19  }
  0x7c   : > { %s900_s14 = sshll.u32 (!%p1926_p3), %s1657_s9, 7  ;;  %s267_s10 = scalar_lea.sflag (!%p1926_p3), [#allocation3], %s1657_s9 }
  0x7d   : > { %s1661_s12 = scalar_lea.vmem (!%p1926_p3), [#allocation2], %s900_s14  ;;  %p1927_p7 = scmp.ne.s32.totalorder (!%p1926_p3), %s1917_s28, 0 }
  0x82   : > { %1361 = dma.done.wait (%p1927_p7), %s267_s10, 2048  }
  0x83   : > { %1363 = vsyncadd (%p1927_p7), %s267_s10, 4294965248  ;;  %p1928_p11 = scmp.ne.s32.totalorder %s1915_s26, 0 }
  0x85   : > { %1365 = dma.done.wait (%p1928_p11), [#allocation6], 32  }
  0x86   : > { %1367 = vsyncadd (%p1928_p11), [#allocation6], 4294967264 }
  0x87   : > { %1369 = dma.done.wait (%p1928_p11), [#allocation9], 256  }
  0x88   : > { %1371 = vsyncadd (%p1928_p11), [#allocation9], 4294967040  ;;  %v1002_v0 = vld [vmem:[%s1661_s12 + $0x40] sm:$0xff]   ;;  %vm521_vm0 = vcmask 64512   ;;  %v1003_v5 = vld [vmem:[%s1661_s12 + $0x48] sm:$0xff]   ;;  %s904_s26 = sshll.u32 %s1657_s9, 5 }
  0x89   : > { %v1676_v1 = vld [vmem:[#allocation5] ss:$0 sm:$0xff]  ;;  %v965_v2 = vunpack.c.l.bf16 %v1002_v0  ;;  %v966_v3 = vunpack.c.h.bf16 %v1002_v0  ;;  %v995_v6 = vld [vmem:[%s1661_s12 + $0x8] sm:$0xff]   ;;  %v1681_v7 = vld [vmem:[#allocation7] ss:$0 sm:$0xff]  ;;  %v969_v10 = vunpack.c.l.bf16 %v1003_v5  ;;  %v970_v11 = vunpack.c.h.bf16 %v1003_v5  ;;  %s306_s28 = scalar_lea.vmem [#allocation10], %s904_s26 }
  0x8a   : > { %v932_v4 = vld [vmem:[%s1661_s12] sm:$0xff]   ;;  %v937_v14 = vunpack.c.l.bf16 %v995_v6  ;;  %v938_v15 = vunpack.c.h.bf16 %v995_v6  ;;  %v1004_v24 = vld [vmem:[%s1661_s12 + $0x50] sm:$0xff]   ;;  %v1005_v39 = vld [vmem:[%s1661_s12 + $0x58] sm:$0xff]   ;;  %s720_s30 = sshll.u32 %s306_s28, 4  ;;  %s929_s24 = sshll.u32 %s1394_s21, 9  ;;  %s1798_s30 = int_to_ptr.vmem [resolvable:$true] %s720_s30 }
  0x8b   : > { %v933_v8 = vunpack.c.l.bf16 %v932_v4  ;;  %v934_v9 = vunpack.c.h.bf16 %v932_v4  ;;  %v404_v12 = vmul.f32 %v965_v2, %v1676_v1  ;;  %v405_v13 = vmul.f32 %v966_v3, %v1676_v1  ;;  %v996_v25 = vld [vmem:[%s1661_s12 + $0x10] sm:$0xff]   ;;  %v1699_v30 = vld [vmem:[#allocation8] sm:$0xff]   ;;  %v997_v53 = vld [vmem:[%s1661_s12 + $0x18] sm:$0xff]   ;;  %s1806_s6 = scalar_lea.hbm %s1908_s4, %s929_s24  ;;  %s700_s16 = scalar_lea.sflag [#allocation4], %s1657_s9 }
  0x8c   : > { %v406_v18 = vmul.f32 %v969_v10, %v1676_v1  ;;  %v407_v19 = vmul.f32 %v970_v11, %v1676_v1  ;;  %v390_v22 = vmul.f32 %v937_v14, %v1676_v1  ;;  %v391_v23 = vmul.f32 %v938_v15, %v1676_v1  ;;  %1026 = vmatprep.mubr.msk.bf16.mxu0 %vm521_vm0, %v1699_v30  ;;  %v1706_v40 = vld [vmem:[#allocation8 + $0x8] sm:$0xff]   ;;  %v1006_v2 = vld [vmem:[%s1661_s12 + $0x60] sm:$0xff]   ;;  %s1280_s8 = scalar_lea.vmem %s1798_s30, 512  ;;  %s1410_s13 = smov [#allocation10]  }
  0x8d   : > { %v388_v16 = vmul.f32 %v933_v8, %v1676_v1  ;;  %v389_v17 = vmul.f32 %v934_v9, %v1676_v1  ;;  %v443_v20 = vadd.f32 %v1681_v7, %v404_v12  ;;  %v444_v21 = vadd.f32 %v1681_v7, %v405_v13  ;;  %1028 = vmatprep.mubr.msk.bf16.mxu1 %vm521_vm0, %v1706_v40  ;;  %p1281_p12 = scmp.ne.s32.totalorder %s1798_s30, %s1280_s8  ;;  %s1284_s7 = sshll.u32 %s1410_s13, 4  ;;  %s1285_s7 = int_to_ptr.vmem [resolvable:$false] %s1284_s7 }
  0x8e   : > { %v445_v28 = vadd.f32 %v1681_v7, %v406_v18  ;;  %v446_v29 = vadd.f32 %v1681_v7, %v407_v19  ;;  %v429_v33 = vadd.f32 %v1681_v7, %v390_v22  ;;  %v430_v34 = vadd.f32 %v1681_v7, %v391_v23  ;;  %v998_v18 = vld [vmem:[%s1661_s12 + $0x20] sm:$0xff]   ;;  %s1286_s14 = scalar_lea.vmem %s1285_s7, 1024  ;;  %p1287_p6 = scmp.lt.s32.totalorder %s1798_s30, %s1285_s7 }
  0x8f   : > { %v427_v26 = vadd.f32 %v1681_v7, %v388_v16  ;;  %v428_v27 = vadd.f32 %v1681_v7, %v389_v17  ;;  %v475_v31 = vmax.f32 %v443_v20, 0.0  ;;  %v476_v32 = vmax.f32 %v444_v21, 0.0  ;;  %p1282_p1 = pnand %p1281_p12, %p1596_p2  ;;  %p1288_p8 = scmp.lt.s32.totalorder %s1286_s14, %s1280_s8 }
  0x90   : > { %v477_v37 = vmax.f32 %v445_v28, 0.0  ;;  %v478_v38 = vmax.f32 %v446_v29, 0.0  ;;  %v461_v42 = vmax.f32 %v429_v33, 0.0  ;;  %v462_v43 = vmax.f32 %v430_v34, 0.0  ;;  %v1007_v28 = vld [vmem:[%s1661_s12 + $0x68] sm:$0xff]  }
  0x91   : > { %v459_v35 = vmax.f32 %v427_v26, 0.0  ;;  %v460_v36 = vmax.f32 %v428_v27, 0.0  ;;  %v503_v41 = vpack.c.bf16 %v476_v32, %v475_v31  ;;  %v973_v44 = vunpack.c.l.bf16 %v1004_v24  ;;  %p1283_p4 = pneg %p1282_p1  ;;  %p1289_p0 = por %p1288_p8, %p1287_p6 }
  0x92   : > { %v504_v46 = vpack.c.bf16 %v478_v38, %v477_v37  ;;  %v974_v47 = vunpack.c.h.bf16 %v1004_v24  ;;  %v941_v48 = vunpack.c.l.bf16 %v996_v25  ;;  %v496_v49 = vpack.c.bf16 %v462_v43, %v461_v42 }
  0x93   : > { %v495_v45 = vpack.c.bf16 %v460_v36, %v459_v35  ;;  %1046 = vmatprep.subr.msk.bf16.mxu0 %vm521_vm0, %v503_v41  ;;  %1047 = vmatprep.subr.msk.bf16.mxu1 %vm521_vm0, %v503_v41  ;;  %v408_v50 = vmul.f32 %v973_v44, %v1676_v1  ;;  %v942_v51 = vunpack.c.h.bf16 %v996_v25  ;;  %v977_v52 = vunpack.c.l.bf16 %v1005_v39  ;;  %v999_v36 = vld [vmem:[%s1661_s12 + $0x28] sm:$0xff]   ;;  %p1290_p5 = pnand %p1289_p0, %p1283_p4 }
  0x94   : > { %v409_v55 = vmul.f32 %v974_v47, %v1676_v1  ;;  %v392_v56 = vmul.f32 %v941_v48, %v1676_v1  ;;  %v978_v57 = vunpack.c.h.bf16 %v1005_v39  ;;  %v945_v0 = vunpack.c.l.bf16 %v997_v53 }
  0x95   : > { %v529_v54 = vsel %vm521_vm0, %v495_v45, 0  ;;  %v447_v58 = vadd.f32 %v1681_v7, %v408_v50  ;;  %v393_v59 = vmul.f32 %v942_v51, %v1676_v1  ;;  %v410_v60 = vmul.f32 %v977_v52, %v1676_v1  ;;  %v1008_v51 = vld [vmem:[%s1661_s12 + $0x70] sm:$0xff]  }
  0x96   : > { %1011 = vmatpush3.bf16.xpose.msra.mxu0 %v529_v54  ;;  %1038 = vmatpush3.bf16.xpose.msra.mxu1 %v529_v54  ;;  %v448_v61 = vadd.f32 %v1681_v7, %v409_v55  ;;  %v431_v62 = vadd.f32 %v1681_v7, %v392_v56  ;;  %v411_v63 = vmul.f32 %v978_v57, %v1676_v1  ;;  %v946_v5 = vunpack.c.h.bf16 %v997_v53 }
  0x97   : > { %1048 = vmatprep.subr.msk.bf16.mxu0 %vm521_vm0, %v504_v46  ;;  %1049 = vmatprep.subr.msk.bf16.mxu1 %vm521_vm0, %v504_v46  ;;  %v479_v3 = vmax.f32 %v447_v58, 0.0  ;;  %v432_v4 = vadd.f32 %v1681_v7, %v393_v59  ;;  %v449_v9 = vadd.f32 %v1681_v7, %v410_v60  ;;  %v394_v10 = vmul.f32 %v945_v0, %v1676_v1  ;;  %v1000_v58 = vld [vmem:[%s1661_s12 + $0x30] sm:$0xff]  }
  0x98   : > { %v480_v6 = vmax.f32 %v448_v61, 0.0  ;;  %v463_v8 = vmax.f32 %v431_v62, 0.0  ;;  %v450_v12 = vadd.f32 %v1681_v7, %v411_v63  ;;  %v395_v13 = vmul.f32 %v946_v5, %v1676_v1 }
  0x99   : > { %v464_v11 = vmax.f32 %v432_v4, 0.0  ;;  %v981_v14 = vunpack.c.l.bf16 %v1006_v2  ;;  %v532_v15 = vsel %vm521_vm0, %v496_v49, 0  ;;  %v982_v17 = vunpack.c.h.bf16 %v1006_v2 }
  0x9a   : > { %v505_v16 = vpack.c.bf16 %v480_v6, %v479_v3  ;;  %v481_v19 = vmax.f32 %v449_v9, 0.0  ;;  %v433_v20 = vadd.f32 %v1681_v7, %v394_v10  ;;  %v434_v21 = vadd.f32 %v1681_v7, %v395_v13  ;;  %v1009_v10 = vld [vmem:[%s1661_s12 + $0x78] sm:$0xff]  }
  0x9b   : > { %v497_v22 = vpack.c.bf16 %v464_v11, %v463_v8  ;;  %v482_v23 = vmax.f32 %v450_v12, 0.0  ;;  %v412_v24 = vmul.f32 %v981_v14, %v1676_v1  ;;  %v949_v25 = vunpack.c.l.bf16 %v998_v18 }
  0x9c   : > { %v413_v26 = vmul.f32 %v982_v17, %v1676_v1  ;;  %v950_v27 = vunpack.c.h.bf16 %v998_v18  ;;  %v465_v29 = vmax.f32 %v433_v20, 0.0  ;;  %v466_v31 = vmax.f32 %v434_v21, 0.0  ;;  %v1001_v21 = vld [vmem:[%s1661_s12 + $0x38] sm:$0xff]  }
  0x9d   : > { %v535_v32 = vsel %vm521_vm0, %v497_v22, 0  ;;  %v506_v33 = vpack.c.bf16 %v482_v23, %v481_v19  ;;  %v451_v34 = vadd.f32 %v1681_v7, %v412_v24  ;;  %v396_v35 = vmul.f32 %v949_v25, %v1676_v1 }
  0x9e   : > { %1013 = vmatpush3.bf16.xpose.msra.mxu0 %v532_v15  ;;  %1039 = vmatpush3.bf16.xpose.msra.mxu1 %v532_v15  ;;  %v452_v37 = vadd.f32 %v1681_v7, %v413_v26  ;;  %v397_v38 = vmul.f32 %v950_v27, %v1676_v1  ;;  %v985_v39 = vunpack.c.l.bf16 %v1007_v28  ;;  %v986_v41 = vunpack.c.h.bf16 %v1007_v28 }
  0x9f   : > { %1050 = vmatprep.subr.msk.bf16.mxu0 %vm521_vm0, %v505_v16  ;;  %1051 = vmatprep.subr.msk.bf16.mxu1 %vm521_vm0, %v505_v16  ;;  %v498_v42 = vpack.c.bf16 %v466_v31, %v465_v29  ;;  %v953_v43 = vunpack.c.l.bf16 %v999_v36  ;;  %v483_v44 = vmax.f32 %v451_v34, 0.0  ;;  %v435_v45 = vadd.f32 %v1681_v7, %v396_v35 }
  0xa0   : > { %v954_v46 = vunpack.c.h.bf16 %v999_v36  ;;  %v484_v47 = vmax.f32 %v452_v37, 0.0  ;;  %v436_v48 = vadd.f32 %v1681_v7, %v397_v38  ;;  %v414_v49 = vmul.f32 %v985_v39, %v1676_v1 }
  0xa1   : > { %v415_v50 = vmul.f32 %v986_v41, %v1676_v1  ;;  %v538_v52 = vsel %vm521_vm0, %v498_v42, 0  ;;  %v398_v53 = vmul.f32 %v953_v43, %v1676_v1  ;;  %v467_v54 = vmax.f32 %v435_v45, 0.0 }
  0xa2   : > { %v399_v55 = vmul.f32 %v954_v46, %v1676_v1  ;;  %v989_v56 = vunpack.c.l.bf16 %v1008_v51  ;;  %v990_v57 = vunpack.c.h.bf16 %v1008_v51  ;;  %v507_v59 = vpack.c.bf16 %v484_v47, %v483_v44 }
  0xa3   : > { %v468_v60 = vmax.f32 %v436_v48, 0.0  ;;  %v453_v61 = vadd.f32 %v1681_v7, %v414_v49  ;;  %v454_v62 = vadd.f32 %v1681_v7, %v415_v50  ;;  %v437_v63 = vadd.f32 %v1681_v7, %v398_v53 }
  0xa4   : > { %v957_v0 = vunpack.c.l.bf16 %v1000_v58  ;;  %v438_v2 = vadd.f32 %v1681_v7, %v399_v55  ;;  %v416_v3 = vmul.f32 %v989_v56, %v1676_v1  ;;  %v417_v4 = vmul.f32 %v990_v57, %v1676_v1 }
  0xa5   : > { %v499_v5 = vpack.c.bf16 %v468_v60, %v467_v54  ;;  %v485_v6 = vmax.f32 %v453_v61, 0.0  ;;  %v486_v8 = vmax.f32 %v454_v62, 0.0  ;;  %v958_v9 = vunpack.c.h.bf16 %v1000_v58 }
  0xa6   : > { %1015 = vmatpush3.bf16.xpose.msra.mxu0 %v535_v32  ;;  %1040 = vmatpush3.bf16.xpose.msra.mxu1 %v535_v32  ;;  %v469_v11 = vmax.f32 %v437_v63, 0.0  ;;  %v400_v12 = vmul.f32 %v957_v0, %v1676_v1  ;;  %v470_v13 = vmax.f32 %v438_v2, 0.0  ;;  %v455_v14 = vadd.f32 %v1681_v7, %v416_v3 }
  0xa7   : > { %1052 = vmatprep.subr.msk.bf16.mxu0 %vm521_vm0, %v506_v33  ;;  %1053 = vmatprep.subr.msk.bf16.mxu1 %vm521_vm0, %v506_v33  ;;  %v456_v15 = vadd.f32 %v1681_v7, %v417_v4  ;;  %v993_v16 = vunpack.c.l.bf16 %v1009_v10  ;;  %v541_v17 = vsel %vm521_vm0, %v499_v5, 0  ;;  %v508_v18 = vpack.c.bf16 %v486_v8, %v485_v6 }
  0xa8   : > { %v401_v19 = vmul.f32 %v958_v9, %v1676_v1  ;;  %v994_v20 = vunpack.c.h.bf16 %v1009_v10  ;;  %v439_v22 = vadd.f32 %v1681_v7, %v400_v12  ;;  %v500_v23 = vpack.c.bf16 %v470_v13, %v469_v11 }
  0xa9   : > { %v487_v24 = vmax.f32 %v455_v14, 0.0  ;;  %v488_v25 = vmax.f32 %v456_v15, 0.0  ;;  %v418_v26 = vmul.f32 %v993_v16, %v1676_v1  ;;  %v961_v29 = vunpack.c.l.bf16 %v1001_v21 }
  0xaa   : > { %v440_v27 = vadd.f32 %v1681_v7, %v401_v19  ;;  %v419_v28 = vmul.f32 %v994_v20, %v1676_v1  ;;  %v962_v31 = vunpack.c.h.bf16 %v1001_v21  ;;  %v544_v32 = vsel %vm521_vm0, %v500_v23, 0 }
  0xab   : > { %v509_v33 = vpack.c.bf16 %v488_v25, %v487_v24  ;;  %v471_v34 = vmax.f32 %v439_v22, 0.0  ;;  %v457_v35 = vadd.f32 %v1681_v7, %v418_v26  ;;  %v402_v38 = vmul.f32 %v961_v29, %v1676_v1 }
  0xac   : > { %v472_v36 = vmax.f32 %v440_v27, 0.0  ;;  %v458_v37 = vadd.f32 %v1681_v7, %v419_v28  ;;  %v403_v39 = vmul.f32 %v962_v31, %v1676_v1 }
  0xad   : > { %v489_v41 = vmax.f32 %v457_v35, 0.0  ;;  %v441_v44 = vadd.f32 %v1681_v7, %v402_v38 }
  0xae   : > { %1017 = vmatpush3.bf16.xpose.msra.mxu0 %v538_v52  ;;  %1041 = vmatpush3.bf16.xpose.msra.mxu1 %v538_v52  ;;  %v501_v42 = vpack.c.bf16 %v472_v36, %v471_v34  ;;  %v490_v43 = vmax.f32 %v458_v37, 0.0  ;;  %v442_v45 = vadd.f32 %v1681_v7, %v403_v39 }
  0xaf   : > { %1054 = vmatprep.subr.msk.bf16.mxu0 %vm521_vm0, %v507_v59  ;;  %1055 = vmatprep.subr.msk.bf16.mxu1 %vm521_vm0, %v507_v59  ;;  %v473_v48 = vmax.f32 %v441_v44, 0.0 }
  0xb0   : > { %v547_v46 = vsel %vm521_vm0, %v501_v42, 0  ;;  %v510_v47 = vpack.c.bf16 %v490_v43, %v489_v41  ;;  %v474_v49 = vmax.f32 %v442_v45, 0.0 }
  0xb2   : > { %v502_v1 = vpack.c.bf16 %v474_v49, %v473_v48 }
  0xb4   : > { %v550_v50 = vsel %vm521_vm0, %v502_v1, 0 }
  0xb6   : > { %1019 = vmatpush3.bf16.xpose.msra.mxu0 %v541_v17  ;;  %1042 = vmatpush3.bf16.xpose.msra.mxu1 %v541_v17 }
  0xb7   : > { %1056 = vmatprep.subr.msk.bf16.mxu0 %vm521_vm0, %v508_v18  ;;  %1057 = vmatprep.subr.msk.bf16.mxu1 %vm521_vm0, %v508_v18 }
  0xbe   : > { %1021 = vmatpush3.bf16.xpose.msra.mxu0 %v544_v32  ;;  %1043 = vmatpush3.bf16.xpose.msra.mxu1 %v544_v32 }
  0xbf   : > { %1058 = vmatprep.subr.msk.bf16.mxu0 %vm521_vm0, %v509_v33  ;;  %1059 = vmatprep.subr.msk.bf16.mxu1 %vm521_vm0, %v509_v33 }
  0xc6   : > { %1023 = vmatpush3.bf16.xpose.msra.mxu0 %v547_v46  ;;  %1044 = vmatpush3.bf16.xpose.msra.mxu1 %v547_v46 }
  0xc7   : > { %1060 = vmatprep.subr.msk.bf16.mxu0 %vm521_vm0, %v510_v47  ;;  %1061 = vmatprep.subr.msk.bf16.mxu1 %vm521_vm0, %v510_v47 }
  0xce   : > { %1025 = vmatpush3.bf16.xpose.msra.mxu0 %v550_v50  ;;  %1045 = vmatpush3.bf16.xpose.msra.mxu1 %v550_v50 }
  0xd5   : > { %1027 = vmatmul.mubr.msk.bf16.vlgmr.msra.gmra.mrb[0].mxu0 %vm521_vm0, %v1699_v30  ;;  %1029 = vmatmul.mubr.msk.bf16.vlgmr.msra.gmra.mrb[0].mxu1 %vm521_vm0, %v1706_v40 }
 0x1a8   : > { %v610_v7 = vpop.f32.mrb[0].mxu0  ;;  %v620_v51 = vpop.f32.mrb[0].mxu1 }
 0x1a9   : > { %v612_v52 = vpop.f32.mrb[1].mxu0  ;;  %v622_v53 = vpop.f32.mrb[1].mxu1  ;;  %v669_v54 = vmul.f32 %v610_v7, %v610_v7  ;;  %v673_v55 = vmul.f32 %v620_v51, %v620_v51 }
 0x1aa   : > { %v925_v56 = vpack.c.bf16 %v612_v52, %v610_v7  ;;  %v927_v57 = vpack.c.bf16 %v622_v53, %v620_v51  ;;  %v614_v58 = vpop.f32.mrb[2].mxu0  ;;  %v624_v59 = vpop.f32.mrb[2].mxu1  ;;  %v663_v60 = vadd.f32 %v622_v53, %v620_v51  ;;  %v657_v61 = vadd.f32 %v612_v52, %v610_v7 }
 0x1ab   : > { %v616_v62 = vpop.f32.mrb[3].mxu0  ;;  %v626_v63 = vpop.f32.mrb[3].mxu1  ;;  %v671_v30 = vmul.f32 %v614_v58, %v614_v58  ;;  %v670_v0 = vmul.f32 %v612_v52, %v612_v52  ;;  %v675_v2 = vmul.f32 %v624_v59, %v624_v59  ;;  %v674_v40 = vmul.f32 %v622_v53, %v622_v53 }
 0x1ac   : > { %653 = vst [vmem:[%s306_s28] sm:$0xff] %v925_v56  ;;  %655 = vst [vmem:[%s306_s28 + $0x10] sm:$0xff] %v927_v57  ;;  %v926_v3 = vpack.c.bf16 %v616_v62, %v614_v58  ;;  %v672_v4 = vmul.f32 %v616_v62, %v616_v62  ;;  %v928_v5 = vpack.c.bf16 %v626_v63, %v624_v59  ;;  %664 = vadd.xlane.f32.xlu1 %v663_v60 }
 0x1ad   : > { %v676_v6 = vmul.f32 %v626_v63, %v626_v63  ;;  %658 = vadd.xlane.f32.xlu0 %v657_v61  ;;  %v666_v8 = vadd.f32 %v626_v63, %v624_v59  ;;  %v660_v9 = vadd.f32 %v616_v62, %v614_v58  ;;  %v677_v10 = vadd.f32 %v670_v0, %v669_v54 }
 0x1ae   : > { %v683_v11 = vadd.f32 %v674_v40, %v673_v55  ;;  %654 = vst [vmem:[%s306_s28 + $0x8] sm:$0xff] %v926_v3  ;;  %656 = vst [vmem:[%s306_s28 + $0x18] sm:$0xff] %v928_v5  ;;  %v680_v12 = vadd.f32 %v672_v4, %v671_v30 }
 0x1af   : > { %v686_v13 = vadd.f32 %v676_v6, %v675_v2 }
 0x1b0   : > { %667 = vadd.xlane.f32.xlu1 %v666_v8 }
 0x1b1   : > { %661 = vadd.xlane.f32.xlu0 %v660_v9 }
 0x1b4   : > { %681 = vadd.xlane.f32.xlu1 %v680_v12 }
 0x1b5   : > { %678 = vadd.xlane.f32.xlu0 %v677_v10 }
 0x1b8   : > { %687 = vadd.xlane.f32.xlu1 %v686_v13 }
 0x1b9   : > { %684 = vadd.xlane.f32.xlu0 %v683_v11 }
 0x1ba   : > { %1293 = shalt.err (!%p1290_p5)
}
 0x1bb   : > { %s1294_s10 = scalar_lea.hbm %s1806_s6, 512  ;;  %s1298_s27 = scalar_lea.hbm %s1908_s4, 1024 }
 0x1bc   : > { %p1295_p10 = scmp.ne.s32.totalorder %s1806_s6, %s1294_s10  ;;  %p1299_p3 = scmp.lt.u32.totalorder %s1806_s6, %s1908_s4 }
 0x1bd   : > { %p1300_p7 = scmp.lt.u32.totalorder %s1298_s27, %s1294_s10  ;;  %p1302_p12 = scmp.lt.u32.totalorder %s1294_s10, %s1806_s6 }
 0x1be   : > { %p1296_p13 = pnand %p1295_p10, %p1596_p2 }
 0x1bf   : > { %p1301_p11 = por %p1300_p7, %p1299_p3 }
 0x1c0   : > { %p1297_p9 = pneg %p1296_p13 }
 0x1c1   : > { %p1303_p1 = por %p1302_p12, %p1301_p11 }
 0x1c3   : > { %p1304_p4 = pnand %p1303_p1, %p1297_p9 }
 0x1c5   : > { %1307 = shalt.err (!%p1304_p4)
}
 0x1c6   : > { %s1411_s8 = smov 128   ;;  %s1412_s7 = smov 8   ;;  %vm689_vm1 = vcmask 7168   ;;  %vm694_vm2 = vcmask 15360  }
 0x1c7   : > { %1076 = dma.vmem_to_hbm [thread:$0]  (%p1596_p2), %s1798_s30, 512, %s1806_s6, %s700_s16, %s1411_s8, %s1411_s8, %s1412_s7  }
 0x1c8   : > { %s313_s14 = scalar_lea.vmem [#allocation11], %s904_s26  ;;  %s1849_s6 = scalar_lea.hbm %s1909_s5, %s929_s24 }
 0x1c9   : > { %s738_s10 = sshll.u32 %s313_s14, 4  ;;  %s705_s16 = scalar_lea.sflag [#allocation12], %s1657_s9  ;;  %s1841_s10 = int_to_ptr.vmem [resolvable:$true] %s738_s10 }
 0x1ca   : > { %s1308_s12 = scalar_lea.vmem %s1841_s10, 512  ;;  %s1413_s28 = smov [#allocation11]  }
 0x1cb   : > { %p1309_p6 = scmp.ne.s32.totalorder %s1841_s10, %s1308_s12  ;;  %s1312_s27 = sshll.u32 %s1413_s28, 4  ;;  %s1313_s27 = int_to_ptr.vmem [resolvable:$false] %s1312_s27 }
 0x1cc   : > { %s1314_s21 = scalar_lea.vmem %s1313_s27, 1024  ;;  %p1315_p5 = scmp.lt.s32.totalorder %s1841_s10, %s1313_s27 }
 0x1cd   : > { %p1310_p8 = pnand %p1309_p6, %p1596_p2  ;;  %p1316_p10 = scmp.lt.s32.totalorder %s1314_s21, %s1308_s12 }
 0x1cf   : > { %p1311_p0 = pneg %p1310_p8  ;;  %p1317_p13 = por %p1316_p10, %p1315_p5 }
 0x1d1   : > { %p1318_p9 = pnand %p1317_p13, %p1311_p0 }
 0x239   : > { %v665_v14 = vpop.xlane.xlu1 %664 }
 0x23a   : > { %v659_v15 = vpop.xlane.xlu0 %658 }
 0x23d   : > { %v668_v16 = vpop.xlane.xlu1 %667 }
 0x23e   : > { %v662_v17 = vpop.xlane.xlu0 %661 }
 0x241   : > { %v682_v18 = vpop.xlane.xlu1 %681 }
 0x242   : > { %v691_v19 = vsel %vm689_vm1, %v662_v17, %v682_v18  ;;  %v679_v20 = vpop.xlane.xlu0 %678 }
 0x243   : > { %696 = vst.msk [vmem:[%s313_s14 + $0x8] sm:$0xff] %vm694_vm2, %v691_v19  ;;  %v690_v21 = vsel %vm689_vm1, %v659_v15, %v679_v20 }
 0x244   : > { %695 = vst.msk [vmem:[%s313_s14] sm:$0xff] %vm694_vm2, %v690_v21 }
 0x245   : > { %v688_v22 = vpop.xlane.xlu1 %687 }
 0x246   : > { %v693_v23 = vsel %vm689_vm1, %v668_v16, %v688_v22  ;;  %v685_v24 = vpop.xlane.xlu0 %684 }
 0x247   : > { %698 = vst.msk [vmem:[%s313_s14 + $0x18] sm:$0xff] %vm694_vm2, %v693_v23  ;;  %v692_v25 = vsel %vm689_vm1, %v665_v14, %v685_v24 }
 0x248   : > { %697 = vst.msk [vmem:[%s313_s14 + $0x10] sm:$0xff] %vm694_vm2, %v692_v25 }
 0x249   : > { %1321 = shalt.err (!%p1318_p9)
}
 0x24a   : > { %s1322_s24 = scalar_lea.hbm %s1849_s6, 512  ;;  %s1326_s14 = scalar_lea.hbm %s1909_s5, 1024 }
 0x24b   : > { %p1323_p3 = scmp.ne.s32.totalorder %s1849_s6, %s1322_s24  ;;  %p1327_p12 = scmp.lt.u32.totalorder %s1849_s6, %s1909_s5 }
 0x24c   : > { %p1328_p1 = scmp.lt.u32.totalorder %s1326_s14, %s1322_s24  ;;  %p1330_p6 = scmp.lt.u32.totalorder %s1322_s24, %s1849_s6 }
 0x24d   : > { %p1324_p7 = pnand %p1323_p3, %p1596_p2 }
 0x24e   : > { %p1329_p4 = por %p1328_p1, %p1327_p12 }
 0x24f   : > { %p1325_p11 = pneg %p1324_p7 }
 0x250   : > { %p1331_p8 = por %p1330_p6, %p1329_p4 }
 0x252   : > { %p1332_p0 = pnand %p1331_p8, %p1325_p11 }
 0x254   : > { %1335 = shalt.err (!%p1332_p0)
}
 0x255   : > { %1077 = dma.vmem_to_hbm [thread:$0]  (%p1596_p2), %s1841_s10, 512, %s1849_s6, %s705_s16, %s1411_s8, %s1411_s8, %s1412_s7  }
 0x256 PF: > { %s753_s12 = sand.u32 1, %s1382_s18   ;;  %p1929_p5 = scmp.ne.s32.totalorder %s1918_s29, 0 }
 0x257   : > { %p1930_p10 = scmp.ge.s32.totalorder %s1402_s23, 2  ;;  %s754_s28 = scalar_lea.sflag [#allocation4], %s753_s12 }
 0x259   : > { %p1095_p13 = pnand %p1930_p10, %p1929_p5 }
 0x25b   : > { %1373 = dma.done.wait (!%p1095_p13), %s754_s28, 512  }
 0x25c   : > { %1375 = vsyncadd (!%p1095_p13), %s754_s28, 4294966784  ;;  %s763_s25 = scalar_lea.sflag [#allocation12], %s753_s12 }
 0x25d   : > { %1377 = dma.done.wait (!%p1095_p13), %s763_s25, 512  }
 0x25e   : > { %1379 = vsyncadd (!%p1095_p13), %s763_s25, 4294966784  ;;  %s27_s23 = sadd.s32 1, %s1402_s23   ;;  %s1931_s18 = smov %s1386_s19 }
 0x25f   : > { %p24_p9 = scmp.ge.s32.totalorder %s27_s23, 4   ;;  %s1932_s19 = smov %s1390_s20 }
 0x260   : > { %s1933_s20 = smov %s1608_s11  ;;  %s1934_s21 = smov %s1398_s22 }
 0x261   : > { %s1935_s22 = smov %s1937_s17  ;;  %26 = sbr.rel (!%p24_p9) target bundleno = 10 (0xa), region = 110 }
 0x268   :  { %768 = vsyncpa [#allocation3], 1 }
 0x269   :  { %770 = vsyncpa [#allocation3 + $0x1], 1 }
 0x26a   :  { %771 = vsyncpa [#allocation6], 1 }
 0x26b   :  { %772 = vsyncpa [#allocation9], 1 }
 0x26c   :  { %773 = vsyncpa [#allocation4], 1 }
 0x26d   :  { %775 = vsyncpa [#allocation4 + $0x1], 1 }
 0x26e   :  { %776 = vsyncpa [#allocation12], 1 }
 0x26f   :  { %778 = vsyncpa [#allocation12 + $0x1], 1 }

// kernel: bottleneck_forward.7
= control target key start
LH: loop header
LB: loop body
LE: loop exit
PB: predicated region body
PF: predicated region fallthrough
CT: control target
= control target key end

     0   :  { %s1269_s0 = inlined_call_operand.hbm [shape: bf16[2,32,256], index: 0, kind: input, shape index: {}]   ;;  %s1270_s1 = inlined_call_operand.hbm [shape: f32[2,32,256], index: 1, kind: input, shape index: {}]   ;;  %s1271_s2 = inlined_call_operand.hbm [shape: f32[32,1], index: 2, kind: input, shape index: {}]   ;;  %s1272_s3 = inlined_call_operand.hbm [shape: f32[32,1], index: 3, kind: input, shape index: {}]   ;;  %s1273_s4 = inlined_call_operand.hbm [shape: f32[2,32,256], index: 4, kind: output, shape index: {}]  }
   0x1   :  { %1279 = sst [smem:[#allocation17_spill]] %s1269_s0 }
   0x2   :  { %1280 = sst [smem:[#allocation18_spill]] %s1271_s2 }
   0x3   :  { %1281 = sst [smem:[#allocation19_spill]] %s1272_s3 }
   0x4   :  { %9 = vsyncpa [#allocation3], 0 }
   0x5   :  { %11 = vsyncpa [#allocation3 + $0x1], 0 }
   0x6   :  { %12 = vsyncpa [#allocation6], 0 }
   0x7   :  { %14 = vsyncpa [#allocation6 + $0x1], 0 }
   0x8   :  { %15 = vsyncpa [#allocation9], 0 }
   0x9   :  { %16 = vsyncpa [#allocation4], 0 }
   0xa   :  { %18 = vsyncpa [#allocation4 + $0x1], 0  ;;  %s938_s15 = smov 0   ;;  %s940_s16 = smov 0  }
   0xb   :  { %s942_s17 = smov 0   ;;  %s944_s18 = smov 0  }
   0xc   :  { %s946_s19 = smov 0   ;;  %s948_s20 = smov 0  }
   0xd LB: > { %s969_s21 = sadd.s32 4294967295, %s899_s20   ;;  %s567_s22 = sadd.s32 4294967294, %s899_s20   ;;  %s899_s20 = sphi %s948_s20, %s24_s20   ;;  %s895_s19 = sphi %s946_s19, %s1308_s19   ;;  %s891_s18 = sphi %s944_s18, %s1307_s18   ;;  %s887_s17 = sphi %s942_s17, %s1306_s17   ;;  %s883_s16 = sphi %s940_s16, %s1305_s16   ;;  %s879_s15 = sphi %s938_s15, %s1304_s15  }
   0xe   : > { %p58_p0 = scmp.ne.s32.totalorder %s883_s16, %s879_s15  ;;  %p1274_p1 = scmp.eq.s32.totalorder %s969_s21, 0 }
   0xf   : > { %p160_p3 = scmp.eq.s32.totalorder %s567_s22, 1  ;;  %p568_p5 = scmp.ge.s32.totalorder %s899_s20, 1 }
  0x10   : > { %p978_p4 = por %p1274_p1, %p58_p0  ;;  %p167_p7 = scmp.lt.s32.totalorder %s899_s20, 3 }
  0x11   : > { %p983_p6 = por %p160_p3, %p58_p0  ;;  %s901_s26 = smov [#allocation7]  }
  0x12   : > { %s1282_s23 = scalar_select %p978_p4, 1, 0 }
  0x13   : > { %s1283_s24 = scalar_select %p983_p6, 1, 0 }
  0x14   : > { %p988_p8 = pnand %p568_p5, %p167_p7  ;;  %s179_s27 = sshll.u32 %s901_s26, 4  ;;  %s992_s27 = int_to_ptr.vmem [resolvable:$true] %s179_s27 }
  0x15   : > { %s902_s29 = smov [#allocation8]   ;;  %s1286_s2 = sld [smem:[#allocation18_spill]] }
  0x16   : > { %p606_p9 = pneg %p988_p8  ;;  %s192_s30 = sshll.u32 %s902_s29, 4  ;;  %s1003_s30 = int_to_ptr.vmem [resolvable:$true] %s192_s30 }
  0x18   : > { %p999_p11 = pnand %p606_p9, %p1274_p1 }
  0x1a   : > { %p691_p13 = pneg %p999_p11 }
  0x1b   : > { %s689_s7 = scalar_lea.hbm %s1286_s2, 512 }
  0x1c   : > { %p690_p12 = scmp.ne.s32.totalorder %s1286_s2, %s689_s7  ;;  %p696_p5 = scmp.lt.u32.totalorder %s689_s7, %s1286_s2 }
  0x1e   : > { %p692_p0 = pnand %p691_p13, %p690_p12 }
  0x20   : > { %p693_p3 = pneg %p692_p0 }
  0x22   : > { %p698_p7 = pnand %p696_p5, %p693_p3 }
  0x24   : > { %701 = shalt.err (!%p698_p7)
}
  0x25   : > { %s702_s12 = scalar_lea.vmem %s992_s27, 512  ;;  %p710_p2 = scmp.lt.s32.totalorder %s992_s27, %s992_s27 }
  0x26   : > { %p703_p9 = scmp.ne.s32.totalorder %s992_s27, %s702_s12  ;;  %p711_p12 = scmp.lt.s32.totalorder %s702_s12, %s702_s12 }
  0x28   : > { %p705_p10 = pnand %p703_p9, %p691_p13  ;;  %p712_p0 = por %p711_p12, %p710_p2 }
  0x2a   : > { %p706_p1 = pneg %p705_p10 }
  0x2c   : > { %p713_p6 = pnand %p712_p0, %p706_p1 }
  0x2e   : > { %716 = shalt.err (!%p713_p6)
}
  0x2f   : > { %s1275_s13 = smov 128   ;;  %s904_s14 = smov 8  }
  0x30   : > { %609 = dma.hbm_to_vmem [thread:$0]  (!%p999_p11), %s1286_s2, 512, %s992_s27, [#allocation6], %s1275_s13, %s1275_s13, %s904_s14  }
  0x31   : > { %s1287_s3 = sld [smem:[#allocation19_spill]] }
  0x37   : > { %s717_s6 = scalar_lea.hbm %s1287_s3, 512 }
  0x38   : > { %p718_p1 = scmp.ne.s32.totalorder %s1287_s3, %s717_s6  ;;  %p724_p10 = scmp.lt.u32.totalorder %s717_s6, %s1287_s3 }
  0x3a   : > { %p720_p2 = pnand %p718_p1, %p691_p13 }
  0x3c   : > { %p721_p6 = pneg %p720_p2 }
  0x3e   : > { %p726_p3 = pnand %p724_p10, %p721_p6 }
  0x40   : > { %729 = shalt.err (!%p726_p3)
}
  0x41   : > { %s730_s27 = scalar_lea.vmem %s1003_s30, 512  ;;  %p738_p12 = scmp.lt.s32.totalorder %s1003_s30, %s1003_s30 }
  0x42   : > { %p731_p5 = scmp.ne.s32.totalorder %s1003_s30, %s730_s27  ;;  %p739_p0 = scmp.lt.s32.totalorder %s730_s27, %s730_s27 }
  0x44   : > { %p733_p7 = pnand %p731_p5, %p691_p13  ;;  %p740_p1 = por %p739_p0, %p738_p12 }
  0x46   : > { %p734_p9 = pneg %p733_p7 }
  0x48   : > { %p741_p2 = pnand %p740_p1, %p734_p9 }
  0x4a   : > { %744 = shalt.err (!%p741_p2)
}
  0x4b   : > { %612 = dma.hbm_to_vmem [thread:$0]  (!%p999_p11), %s1287_s3, 512, %s1003_s30, [#allocation9], %s1275_s13, %s1275_s13, %s904_s14  }
  0x4c   : > { %s36_s28 = sadd.s32 1, %s895_s19  ;;  %s45_s22 = sadd.s32 1, %s887_s17 }
  0x4d   : > { %p38_p13 = scmp.ge.s32.totalorder %s36_s28, 2  ;;  %p52_p6 = scmp.ne.s32.totalorder %s887_s17, %s883_s16 }
  0x4e   : > { %p53_p10 = scmp.eq.s32.totalorder %s899_s20, 0  ;;  %p626_p3 = scmp.lt.s32.totalorder %s899_s20, 2 }
  0x4f   : > { %s1310_s28 = smov (%p38_p13, %s36_s28), 0  ;;  %p1289_p7 = scmp.eq.s32.totalorder %s969_s21, 1 }
  0x50   : > { %1288 = sst [smem:[#allocation16_spill]] %s1310_s28  ;;  %p54_p5 = por %p53_p10, %p52_p6 }
  0x51   : > { %p1073_p9 = por %p1289_p7, %p52_p6  ;;  %s40_s29 = ssub.s32 %s895_s19, %s1310_s28 }
  0x52   : > { %s1080_s5 = sand.u32 1, %s887_s17   ;;  %p43_p11 = scmp.eq.s32.totalorder %s40_s29, 0 }
  0x53   : > { %s1290_s26 = scalar_select %p1073_p9, 1, 0 }
  0x54   : > { %s572_s30 = sshll.u32 %s1080_s5, 5  ;;  %s589_s6 = sshll.u32 %s895_s19, 9 }
  0x55   : > { %s1085_s7 = scalar_select %p43_p11, %s887_s17, %s45_s22  }
  0x56   : > { %s1291_s0 = sld [smem:[#allocation17_spill]]  ;;  %s210_s27 = scalar_lea.vmem [#allocation2], %s572_s30 }
  0x57   : > { %s219_s11 = sshll.u32 %s210_s27, 4  ;;  %p1094_p12 = pnand %p626_p3, %p54_p5  ;;  %s1098_s11 = int_to_ptr.vmem [resolvable:$true] %s219_s11 }
  0x58   : > { %s207_s29 = scalar_lea.sflag [#allocation3], %s1080_s5 }
  0x59   : > { %p747_p1 = pneg %p1094_p12 }
  0x5c   : > { %s1090_s10 = scalar_lea.hbm %s1291_s0, %s589_s6  ;;  %s750_s9 = scalar_lea.hbm %s1291_s0, 1024 }
  0x5d   : > { %s745_s8 = scalar_lea.hbm %s1090_s10, 512  ;;  %p751_p6 = scmp.lt.u32.totalorder %s1090_s10, %s1291_s0 }
  0x5e   : > { %p746_p0 = scmp.ne.s32.totalorder %s1090_s10, %s745_s8  ;;  %p752_p10 = scmp.lt.u32.totalorder %s750_s9, %s745_s8 }
  0x5f   : > { %p754_p5 = scmp.lt.u32.totalorder %s745_s8, %s1090_s10 }
  0x60   : > { %p748_p2 = pnand %p747_p1, %p746_p0  ;;  %p753_p3 = por %p752_p10, %p751_p6 }
  0x62   : > { %p749_p13 = pneg %p748_p2  ;;  %p755_p7 = por %p754_p5, %p753_p3 }
  0x64   : > { %p756_p11 = pnand %p755_p7, %p749_p13 }
  0x66   : > { %759 = shalt.err (!%p756_p11)
}
  0x67   : > { %s760_s22 = scalar_lea.vmem %s1098_s11, 512  ;;  %s905_s30 = smov [#allocation2]  }
  0x68   : > { %p761_p0 = scmp.ne.s32.totalorder %s1098_s11, %s760_s22  ;;  %s765_s6 = sshll.u32 %s905_s30, 4  ;;  %s766_s6 = int_to_ptr.vmem [resolvable:$false] %s765_s6 }
  0x69   : > { %s767_s13 = scalar_lea.vmem %s766_s6, 1024  ;;  %p768_p4 = scmp.lt.s32.totalorder %s1098_s11, %s766_s6 }
  0x6a   : > { %p763_p2 = pnand %p761_p0, %p747_p1  ;;  %p769_p6 = scmp.lt.s32.totalorder %s767_s13, %s760_s22 }
  0x6c   : > { %p764_p9 = pneg %p763_p2  ;;  %p770_p10 = por %p769_p6, %p768_p4 }
  0x6e   : > { %p771_p3 = pnand %p770_p10, %p764_p9 }
  0x70   : > { %774 = shalt.err (!%p771_p3)
}
  0x71   : > { %s1293_s8 = smov 128   ;;  %s575_s9 = sshll.u32 %s1080_s5, 6 }
  0x72   : > { %616 = dma.hbm_to_vmem [thread:$0]  (!%p1094_p12), %s1090_s10, 512, %s1098_s11, %s207_s29, %s1293_s8, %s1293_s8, %s904_s14  }
  0x73   : > { %s590_s27 = sshll.u32 %s895_s19, 10  ;;  %s233_s13 = scalar_lea.vmem [#allocation5], %s575_s9 }
  0x74   : > { %s1137_s6 = scalar_lea.hbm %s1270_s1, %s590_s27  ;;  %s242_s0 = sshll.u32 %s233_s13, 4  ;;  %s1139_s0 = int_to_ptr.vmem [resolvable:$true] %s242_s0 }
  0x75   : > { %s1294_s2 = sand.u32 1, %s899_s20   ;;  %s775_s28 = scalar_lea.hbm %s1137_s6, 1024 }
  0x76   : > { %s1143_s3 = scalar_lea.sflag [#allocation6], %s1294_s2  ;;  %p776_p4 = scmp.ne.s32.totalorder %s1137_s6, %s775_s28 }
  0x77   : > { %s780_s10 = scalar_lea.hbm %s1270_s1, 2048  ;;  %p781_p5 = scmp.lt.u32.totalorder %s1137_s6, %s1270_s1 }
  0x78   : > { %p778_p9 = pnand %p776_p4, %p747_p1  ;;  %p782_p7 = scmp.lt.u32.totalorder %s780_s10, %s775_s28 }
  0x79   : > { %p784_p0 = scmp.lt.u32.totalorder %s775_s28, %s1137_s6 }
  0x7a   : > { %p779_p13 = pneg %p778_p9  ;;  %p783_p11 = por %p782_p7, %p781_p5 }
  0x7c   : > { %p785_p2 = por %p784_p0, %p783_p11 }
  0x7e   : > { %p786_p6 = pnand %p785_p2, %p779_p13 }
  0x80   : > { %789 = shalt.err (!%p786_p6)
}
  0x81   : > { %s790_s2 = scalar_lea.vmem %s1139_s0, 1024  ;;  %s906_s8 = smov [#allocation5]  }
  0x82   : > { %p791_p10 = scmp.ne.s32.totalorder %s1139_s0, %s790_s2  ;;  %s795_s9 = sshll.u32 %s906_s8, 4  ;;  %s796_s9 = int_to_ptr.vmem [resolvable:$false] %s795_s9 }
  0x83   : > { %s797_s27 = scalar_lea.vmem %s796_s9, 2048  ;;  %p798_p9 = scmp.lt.s32.totalorder %s1139_s0, %s796_s9 }
  0x84   : > { %p793_p3 = pnand %p791_p10, %p747_p1  ;;  %p799_p5 = scmp.lt.s32.totalorder %s797_s27, %s790_s2 }
  0x86   : > { %p794_p4 = pneg %p793_p3  ;;  %p800_p7 = por %p799_p5, %p798_p9 }
  0x88   : > { %p801_p11 = pnand %p800_p7, %p794_p4 }
  0x8a   : > { %804 = shalt.err (!%p801_p11)
}
  0x8b   : > { %s907_s28 = smov 256   ;;  %s908_s22 = smov 16  }
  0x8c   : > { %619 = dma.hbm_to_vmem [thread:$0]  (!%p1094_p12), %s1137_s6, 1024, %s1139_s0, %s1143_s3, %s907_s28, %s907_s28, %s908_s22  }
  0x8d   : > { %254 = sbr.rel (%p988_p8) target bundleno = 323 (0x143), region = 36  ;;  %s1172_s30 = sand.u32 (!%p988_p8), 1, %s883_s16  }
  0x8e   : > { %s579_s13 = sshll.u32 (!%p988_p8), %s1172_s30, 5  ;;  %s257_s14 = scalar_lea.sflag (!%p988_p8), [#allocation3], %s1172_s30 }
  0x8f   : > { %s1176_s5 = scalar_lea.vmem (!%p988_p8), [#allocation2], %s579_s13  ;;  %p1295_p1 = scmp.ne.s32.totalorder (!%p988_p8), %s1282_s23, 0 }
  0x94   : > { %858 = dma.done.wait (%p1295_p1), %s257_s14, 512  }
  0x95   : > { %860 = vsyncadd (%p1295_p1), %s257_s14, 4294966784  ;;  %s265_s0 = sand.u32 1, %s969_s21   ;;  %s580_s3 = sshll.u32 %s1172_s30, 6 }
  0x96   : > { %s266_s25 = scalar_lea.sflag [#allocation6], %s265_s0  ;;  %s1186_s12 = scalar_lea.vmem [#allocation5], %s580_s3 }
  0x97   : > { %862 = dma.done.wait (%p1295_p1), %s266_s25, 1024  }
  0x98   : > { %864 = vsyncadd (%p1295_p1), %s266_s25, 4294966272  ;;  %p1296_p8 = scmp.eq.s32.totalorder %s969_s21, 0 }
  0x9a   : > { %866 = dma.done.wait (%p1296_p8), [#allocation6], 512   ;;  %p1297_p12 = pmov %p1296_p8 }
  0x9b   : > { %p1298_p13 = pmov %p1296_p8 }
  0x9c   : > { %868 = vsyncadd (%p1297_p12), [#allocation6], 4294966784 }
  0x9d   : > { %870 = dma.done.wait (%p1298_p13), [#allocation9], 512   ;;  %p1299_p0 = pmov %p1296_p8 }
  0x9e   : > { %v909_v0 = vmov 0   ;;  %v324_v1 = vld [vmem:[#allocation7 + $0x10] sm:$0xff]  ;;  %v322_v2 = vld [vmem:[#allocation7] sm:$0xff]  ;;  %v325_v3 = vld [vmem:[#allocation7 + $0x18] sm:$0xff]  ;;  %s591_s21 = sshll.u32 %s891_s18, 10  ;;  %s306_s23 = scalar_lea.vmem [#allocation10], %s580_s3 }
  0x9f   : > { %872 = vsyncadd (%p1299_p0), [#allocation9], 4294966784  ;;  %688 = vset.pattern.permute.xlu1 %v909_v0  ;;  %687 = vset.pattern.permute.xlu0 %v909_v0  ;;  %v323_v4 = vld [vmem:[#allocation7 + $0x8] sm:$0xff]  ;;  %v354_v6 = vld [vmem:[#allocation8] sm:$0xff]  ;;  %s434_s6 = sshll.u32 %s306_s23, 4  ;;  %s1218_s29 = scalar_lea.hbm %s1273_s4, %s591_s21  ;;  %s1220_s6 = int_to_ptr.vmem [resolvable:$true] %s434_s6 }
  0xa0   : > { %338 = vperm.xlu1 %688, %v324_v1   ;;  %328 = vperm.xlu0 %687, %v322_v2   ;;  %v355_v5 = vld [vmem:[#allocation8 + $0x8] sm:$0xff]  ;;  %v357_v7 = vld [vmem:[#allocation8 + $0x18] sm:$0xff]  ;;  %v356_v8 = vld [vmem:[#allocation8 + $0x10] sm:$0xff]  ;;  %s419_s18 = scalar_lea.sflag [#allocation4], %s1172_s30  ;;  %s805_s2 = scalar_lea.vmem %s1220_s6, 1024 }
  0xa1   : > { %v310_v11 = vld [vmem:[%s1176_s5] sm:$0xff]  ;;  %v311_v12 = vld [vmem:[%s1176_s5 + $0x8] sm:$0xff]  ;;  %v312_v19 = vld [vmem:[%s1176_s5 + $0x10] sm:$0xff]  ;;  %p806_p2 = scmp.ne.s32.totalorder %s1220_s6, %s805_s2  ;;  %p1300_p6 = scmp.ne.s32.totalorder %s1290_s26, 0 }
  0xa2   : > { %v314_v13 = vunpack.c.l.bf16 %v310_v11  ;;  %v315_v14 = vunpack.c.h.bf16 %v310_v11  ;;  %v316_v15 = vunpack.c.l.bf16 %v311_v12  ;;  %v317_v16 = vunpack.c.h.bf16 %v311_v12  ;;  %v313_v20 = vld [vmem:[%s1176_s5 + $0x18] sm:$0xff]  ;;  %v388_v25 = vld [vmem:[%s1186_s12 + $0x10] sm:$0xff]  ;;  %v386_v32 = vld [vmem:[%s1186_s12] sm:$0xff]  ;;  %s910_s8 = smov [#allocation10]  }
  0xa3   : > { %v318_v26 = vunpack.c.l.bf16 %v312_v19  ;;  %v319_v27 = vunpack.c.h.bf16 %v312_v19  ;;  %v320_v28 = vunpack.c.l.bf16 %v313_v20  ;;  %v321_v29 = vunpack.c.h.bf16 %v313_v20  ;;  %v389_v30 = vld [vmem:[%s1186_s12 + $0x18] sm:$0xff]  ;;  %v387_v33 = vld [vmem:[%s1186_s12 + $0x8] sm:$0xff]  ;;  %v392_v47 = vld [vmem:[%s1186_s12 + $0x30] sm:$0xff]  ;;  %p807_p10 = pnand %p806_p2, %p1300_p6  ;;  %s809_s9 = sshll.u32 %s910_s8, 4  ;;  %s810_s9 = int_to_ptr.vmem [resolvable:$false] %s809_s9 }
  0xa4   : > { %343 = vperm.xlu1 %688, %v325_v3   ;;  %333 = vperm.xlu0 %687, %v323_v4   ;;  %v393_v48 = vld [vmem:[%s1186_s12 + $0x38] sm:$0xff]  ;;  %v390_v55 = vld [vmem:[%s1186_s12 + $0x20] sm:$0xff]  ;;  %v391_v56 = vld [vmem:[%s1186_s12 + $0x28] sm:$0xff]  ;;  %s811_s27 = scalar_lea.vmem %s810_s9, 2048  ;;  %p812_p4 = scmp.lt.s32.totalorder %s1220_s6, %s810_s9 }
  0xa5   : > { %p808_p3 = pneg %p807_p10  ;;  %p813_p9 = scmp.lt.s32.totalorder %s811_s27, %s805_s2 }
  0xa7   : > { %p814_p5 = por %p813_p9, %p812_p4 }
  0xa8   : > { %365 = vperm.xlu1 %688, %v355_v5   ;;  %360 = vperm.xlu0 %687, %v354_v6  }
  0xa9   : > { %p815_p7 = pnand %p814_p5, %p808_p3 }
  0xac   : > { %375 = vperm.xlu1 %688, %v357_v7   ;;  %370 = vperm.xlu0 %687, %v356_v8  }
 0x11f   : > { %v339_v9 = vpop.permute.xlu1 %338  ;;  %v329_v10 = vpop.permute.xlu0 %328 }
 0x120   : > { %v346_v21 = vmul.f32 %v329_v10, %v314_v13  ;;  %v347_v22 = vmul.f32 %v329_v10, %v315_v14  ;;  %v350_v43 = vmul.f32 %v339_v9, %v318_v26  ;;  %v351_v44 = vmul.f32 %v339_v9, %v319_v27 }
 0x123   : > { %v344_v17 = vpop.permute.xlu1 %343  ;;  %v334_v18 = vpop.permute.xlu0 %333 }
 0x124   : > { %v348_v23 = vmul.f32 %v334_v18, %v316_v15  ;;  %v349_v24 = vmul.f32 %v334_v18, %v317_v16  ;;  %v352_v45 = vmul.f32 %v344_v17, %v320_v28  ;;  %v353_v46 = vmul.f32 %v344_v17, %v321_v29 }
 0x127   : > { %v366_v31 = vpop.permute.xlu1 %365  ;;  %v361_v34 = vpop.permute.xlu0 %360 }
 0x128   : > { %v380_v35 = vadd.f32 %v366_v31, %v348_v23  ;;  %v381_v36 = vadd.f32 %v366_v31, %v349_v24  ;;  %v378_v37 = vadd.f32 %v361_v34, %v346_v21  ;;  %v379_v38 = vadd.f32 %v361_v34, %v347_v22 }
 0x12a   : > { %v396_v39 = vadd.f32 %v388_v25, %v380_v35  ;;  %v397_v40 = vadd.f32 %v389_v30, %v381_v36  ;;  %v394_v41 = vadd.f32 %v386_v32, %v378_v37  ;;  %v395_v42 = vadd.f32 %v387_v33, %v379_v38 }
 0x12b   : > { %v376_v49 = vpop.permute.xlu1 %375  ;;  %v371_v50 = vpop.permute.xlu0 %370 }
 0x12c   : > { %v404_v51 = vmax.f32 %v396_v39, 0.0  ;;  %v405_v52 = vmax.f32 %v397_v40, 0.0  ;;  %v402_v53 = vmax.f32 %v394_v41, 0.0  ;;  %v403_v54 = vmax.f32 %v395_v42, 0.0 }
 0x12d   : > { %v384_v57 = vadd.f32 %v376_v49, %v352_v45  ;;  %v385_v58 = vadd.f32 %v376_v49, %v353_v46  ;;  %v382_v59 = vadd.f32 %v371_v50, %v350_v43  ;;  %v383_v60 = vadd.f32 %v371_v50, %v351_v44 }
 0x12e   : > { %412 = vst [vmem:[%s306_s23 + $0x10] sm:$0xff] %v404_v51  ;;  %413 = vst [vmem:[%s306_s23 + $0x18] sm:$0xff] %v405_v52 }
 0x12f   : > { %410 = vst [vmem:[%s306_s23] sm:$0xff] %v402_v53  ;;  %411 = vst [vmem:[%s306_s23 + $0x8] sm:$0xff] %v403_v54  ;;  %v400_v61 = vadd.f32 %v392_v47, %v384_v57  ;;  %v401_v62 = vadd.f32 %v393_v48, %v385_v58  ;;  %v398_v63 = vadd.f32 %v390_v55, %v382_v59 }
 0x130   : > { %v399_v0 = vadd.f32 %v391_v56, %v383_v60 }
 0x131   : > { %v408_v1 = vmax.f32 %v400_v61, 0.0  ;;  %v409_v2 = vmax.f32 %v401_v62, 0.0  ;;  %v406_v3 = vmax.f32 %v398_v63, 0.0 }
 0x132   : > { %v407_v4 = vmax.f32 %v399_v0, 0.0 }
 0x133   : > { %416 = vst [vmem:[%s306_s23 + $0x30] sm:$0xff] %v408_v1  ;;  %417 = vst [vmem:[%s306_s23 + $0x38] sm:$0xff] %v409_v2 }
 0x134   : > { %414 = vst [vmem:[%s306_s23 + $0x20] sm:$0xff] %v406_v3  ;;  %415 = vst [vmem:[%s306_s23 + $0x28] sm:$0xff] %v407_v4 }
 0x135   : > { %818 = shalt.err (!%p815_p7)
}
 0x136   : > { %s819_s28 = scalar_lea.hbm %s1218_s29, 1024  ;;  %s823_s14 = scalar_lea.hbm %s1273_s4, 2048 }
 0x137   : > { %p820_p11 = scmp.ne.s32.totalorder %s1218_s29, %s819_s28  ;;  %p824_p12 = scmp.lt.u32.totalorder %s1218_s29, %s1273_s4 }
 0x138   : > { %p825_p13 = scmp.lt.u32.totalorder %s823_s14, %s819_s28  ;;  %p827_p2 = scmp.lt.u32.totalorder %s819_s28, %s1218_s29 }
 0x139   : > { %p821_p1 = pnand %p820_p11, %p1300_p6 }
 0x13a   : > { %p826_p0 = por %p825_p13, %p824_p12 }
 0x13b   : > { %p822_p8 = pneg %p821_p1 }
 0x13c   : > { %p828_p10 = por %p827_p2, %p826_p0 }
 0x13e   : > { %p829_p3 = pnand %p828_p10, %p822_p8 }
 0x140   : > { %832 = shalt.err (!%p829_p3)
}
 0x141   : > { %s911_s3 = smov 256   ;;  %s912_s25 = smov 16  }
 0x142   : > { %604 = dma.vmem_to_hbm [thread:$0]  (%p1300_p6), %s1220_s6, 1024, %s1218_s29, %s419_s18, %s911_s3, %s911_s3, %s912_s25  }
 0x143 PF: > { %s449_s12 = sand.u32 1, %s879_s15   ;;  %p1301_p4 = scmp.ne.s32.totalorder %s1283_s24, 0 }
 0x144   : > { %p1302_p9 = scmp.ge.s32.totalorder %s899_s20, 2  ;;  %s450_s21 = scalar_lea.sflag [#allocation4], %s449_s12 }
 0x146   : > { %p621_p5 = pnand %p1302_p9, %p1301_p4 }
 0x148   : > { %874 = dma.done.wait (!%p621_p5), %s450_s21, 1024  }
 0x149   : > { %876 = vsyncadd (!%p621_p5), %s450_s21, 4294966272  ;;  %s24_s20 = sadd.s32 1, %s899_s20   ;;  %s1303_s26 = sld [smem:[#allocation16_spill]] }
 0x14a   : > { %p21_p7 = scmp.ge.s32.totalorder %s24_s20, 4   ;;  %s1304_s15 = smov %s883_s16 }
 0x14b   : > { %s1305_s16 = smov %s887_s17  ;;  %s1306_s17 = smov %s1085_s7 }
 0x14c   : > { %s1307_s18 = smov %s895_s19  ;;  %23 = sbr.rel (!%p21_p7) target bundleno = 13 (0xd), region = 102 }
 0x14f   : > { %s1308_s19 = smov %s1303_s26 }
 0x153   :  { %455 = vsyncpa [#allocation3], 1 }
 0x154   :  { %457 = vsyncpa [#allocation3 + $0x1], 1 }
 0x155   :  { %458 = vsyncpa [#allocation6], 1 }
 0x156   :  { %460 = vsyncpa [#allocation6 + $0x1], 1 }
 0x157   :  { %461 = vsyncpa [#allocation9], 1 }
 0x158   :  { %462 = vsyncpa [#allocation4], 1 }
 0x159   :  { %464 = vsyncpa [#allocation4 + $0x1], 1 }

// kernel: bottleneck_forward.5
= control target key start
LH: loop header
LB: loop body
LE: loop exit
PB: predicated region body
PF: predicated region fallthrough
CT: control target
= control target key end

     0   :  { %s6371_s0 = inlined_call_operand.hbm [shape: bf16[2,16,16,8], index: 0, kind: input, shape index: {}, may-alias: {0,1,2}]   ;;  %s6372_s1 = inlined_call_operand.hbm [shape: bf16[2,16,16,8], index: 1, kind: input, shape index: {}, may-alias: {0,1,2}]   ;;  %s6373_s2 = inlined_call_operand.hbm [shape: bf16[2,16,16,8], index: 2, kind: input, shape index: {}, may-alias: {0,1,2}]   ;;  %s6374_s3 = inlined_call_operand.hbm [shape: f32[1,1,8], index: 3, kind: input, shape index: {}]   ;;  %s6375_s4 = inlined_call_operand.hbm [shape: f32[1,1,8], index: 4, kind: input, shape index: {}]   ;;  %s6376_s5 = inlined_call_operand.hbm [shape: bf16[9,8,8], index: 5, kind: input, shape index: {}]   ;;  %s6377_s6 = inlined_call_operand.hbm [shape: bf16[2,256,8], index: 6, kind: output, shape index: {0}]   ;;  %s6378_s7 = inlined_call_operand.hbm [shape: f32[2,2,1,16], index: 7, kind: output, shape index: {1}]  }
   0x1   :  { %6411 = sst [smem:[#allocation39_spill]] %s6371_s0 }
   0x2   :  { %6412 = sst [smem:[#allocation40_spill]] %s6372_s1 }
   0x3   :  { %6413 = sst [smem:[#allocation41_spill]] %s6373_s2 }
   0x4   :  { %6414 = sst [smem:[#allocation42_spill]] %s6374_s3 }
   0x5   :  { %6415 = sst [smem:[#allocation43_spill]] %s6375_s4 }
   0x6   :  { %6416 = sst [smem:[#allocation44_spill]] %s6376_s5 }
   0x7   :  { %6417 = sst [smem:[#allocation45_spill]] %s6377_s6 }
   0x8   :  { %6418 = sst [smem:[#allocation46_spill]] %s6378_s7 }
   0x9   :  { %13 = vsyncpa [#allocation5], 0 }
   0xa   :  { %15 = vsyncpa [#allocation5 + $0x1], 0 }
   0xb   :  { %16 = vsyncpa [#allocation8], 0 }
   0xc   :  { %18 = vsyncpa [#allocation8 + $0x1], 0 }
   0xd   :  { %19 = vsyncpa [#allocation11], 0 }
   0xe   :  { %20 = vsyncpa [#allocation14], 0 }
   0xf   :  { %21 = vsyncpa [#allocation6], 0 }
  0x10   :  { %23 = vsyncpa [#allocation6 + $0x1], 0 }
  0x11   :  { %24 = vsyncpa [#allocation17], 0 }
  0x12   :  { %26 = vsyncpa [#allocation17 + $0x1], 0  ;;  %s5041_s24 = smov 0   ;;  %s5043_s25 = smov 0  }
  0x13   :  { %s5045_s26 = smov 0   ;;  %s5047_s27 = smov 0  }
  0x14   :  { %s5049_s28 = smov 0   ;;  %s5051_s29 = smov 0  }
  0x15   :  { %s5053_s30 = smov 0   ;;  %s5055_s8 = smov 0  }
  0x16   :  { %s5057_s9 = smov 0   ;;  %s5059_s10 = smov 0  }
  0x17   :  { %s5061_s11 = smov 0   ;;  %s5063_s12 = smov 0  }
  0x18   :  { %s5065_s13 = smov 0   ;;  %s5067_s14 = smov 0  }
  0x19 LB: > { %6419 = sst [smem:[#allocation25_spill]] %s4933_s24  ;;  %s5112_s15 = sadd.s32 4294967295, %s4985_s14   ;;  %s4985_s14 = sphi %s5067_s14, %s32_s14   ;;  %s4981_s13 = sphi %s5065_s13, %s6519_s13   ;;  %s4977_s12 = sphi %s5063_s12, %s6518_s12   ;;  %s4973_s11 = sphi %s5061_s11, %s6517_s11   ;;  %s4969_s10 = sphi %s5059_s10, %s6516_s10   ;;  %s4965_s9 = sphi %s5057_s9, %s6515_s9   ;;  %s4961_s8 = sphi %s5055_s8, %s6514_s8   ;;  %s4957_s30 = sphi %s5053_s30, %s6513_s30   ;;  %s4953_s29 = sphi %s5051_s29, %s6512_s29   ;;  %s4949_s28 = sphi %s5049_s28, %s6511_s28   ;;  %s4945_s27 = sphi %s5047_s27, %s6505_s27   ;;  %s4941_s26 = sphi %s5045_s26, %s6510_s26   ;;  %s4937_s25 = sphi %s5043_s25, %s6504_s25   ;;  %s4933_s24 = sphi %s5041_s24, %s6503_s24  }
  0x1a   : > { %6420 = sst [smem:[#allocation26_spill]] %s4937_s25  ;;  %p3787_p0 = scmp.ge.s32.totalorder %s4985_s14, 1 }
  0x1b   : > { %6421 = sst [smem:[#allocation27_spill]] %s4941_s26  ;;  %p6382_p1 = scmp.eq.s32.totalorder %s5112_s15, 0 }
  0x1c   : > { %6422 = sst [smem:[#allocation28_spill]] %s4945_s27  ;;  %p268_p3 = scmp.lt.s32.totalorder %s4985_s14, 5 }
  0x1d   : > { %6423 = sst [smem:[#allocation29_spill]] %s4949_s28  ;;  %s4987_s17 = smov [#allocation10]  }
  0x1e   : > { %6424 = sst [smem:[#allocation30_spill]] %s4969_s10  ;;  %p5118_p4 = pnand %p3787_p0, %p268_p3 }
  0x1f   : > { %6425 = sst [smem:[#allocation31_spill]] %s4973_s11  ;;  %s281_s18 = sshll.u32 %s4987_s17, 4  ;;  %s282_s18 = int_to_ptr.vmem [resolvable:$true] %s281_s18 }
  0x20   : > { %s6426_s16 = scalar_select %p5118_p4, 1, 0 }
  0x21   : > { %p4435_p5 = pneg %p5118_p4  ;;  %s6429_s3 = sld [smem:[#allocation42_spill]] }
  0x22   : > { %6427 = sst [smem:[#allocation32_spill]] %s6426_s16 }
  0x23   : > { %p5126_p6 = pnand %p4435_p5, %p6382_p1 }
  0x25   : > { %s6428_s19 = scalar_select %p5126_p6, 1, 0 }
  0x26   : > { %p5138_p8 = pneg %p5126_p6 }
  0x27   : > { %s4617_s22 = scalar_lea.hbm %s6429_s3, 16 }
  0x28   : > { %p4618_p7 = scmp.ne.s32.totalorder %s6429_s3, %s4617_s22  ;;  %p4624_p11 = scmp.lt.u32.totalorder %s4617_s22, %s6429_s3 }
  0x2a   : > { %p4620_p9 = pnand %p5138_p8, %p4618_p7 }
  0x2c   : > { %p4621_p10 = pneg %p4620_p9 }
  0x2e   : > { %p4626_p12 = pnand %p4624_p11, %p4621_p10 }
  0x30   : > { %4629 = shalt.err (!%p4626_p12)
}
  0x31   : > { %s4630_s20 = scalar_lea.vmem %s282_s18, 16  ;;  %s4637_s7 = scalar_lea.vmem %s282_s18, 32 }
  0x32   : > { %p4631_p13 = scmp.ne.s32.totalorder %s282_s18, %s4630_s20  ;;  %p4638_p5 = scmp.lt.s32.totalorder %s282_s18, %s282_s18 }
  0x33   : > { %p4639_p1 = scmp.lt.s32.totalorder %s4637_s7, %s4630_s20 }
  0x34   : > { %p4633_p0 = pnand %p4631_p13, %p5138_p8 }
  0x35   : > { %p4640_p2 = por %p4639_p1, %p4638_p5 }
  0x36   : > { %p4634_p3 = pneg %p4633_p0 }
  0x38   : > { %p4641_p4 = pnand %p4640_p2, %p4634_p3 }
  0x3a   : > { %4644 = shalt.err (!%p4641_p4)
}
  0x3b   : > { %4438 = dma.hbm_to_vmem [thread:$0]  (!%p5126_p6), %s6429_s3, 16, %s282_s18, [#allocation11]  }
  0x3c   : > { %s3780_s6 = sadd.s32 4294967294, %s4985_s14   ;;  %s41_s11 = sadd.s32 1, %s4977_s12 }
  0x3d   : > { %p42_p1 = scmp.ge.s32.totalorder %s41_s11, 2  ;;  %s44_s22 = sadd.s32 1, %s4981_s13 }
  0x3e   : > { %p6396_p2 = scmp.eq.s32.totalorder %s4985_s14, 0  ;;  %p96_p4 = scmp.ne.s32.totalorder %s4953_s29, %s4949_s28 }
  0x3f   : > { %s6521_s11 = smov (%p42_p1, %s41_s11), 0  ;;  %s6523_s22 = smov (!%p42_p1, %s44_s22), %s4981_s13 }
  0x40   : > { %6431 = sst [smem:[#allocation33_spill]] %s6521_s11  ;;  %p102_p7 = scmp.ne.s32.totalorder %s4949_s28, %s4945_s27 }
  0x41   : > { %p233_p9 = scmp.eq.s32.totalorder %s3780_s6, 3  ;;  %p5172_p10 = por %p96_p4, %p6396_p2 }
  0x42   : > { %p6433_p11 = scmp.eq.s32.totalorder %s5112_s15, 3  ;;  %p6436_p13 = scmp.eq.s32.totalorder %s5112_s15, 0 }
  0x43   : > { %p5188_p3 = por %p233_p9, %p102_p7  ;;  %p6395_p5 = scmp.lt.s32.totalorder %s4985_s14, 4 }
  0x44   : > { %p5178_p12 = por %p6433_p11, %p96_p4  ;;  %p5184_p0 = por %p102_p7, %p6436_p13 }
  0x45   : > { %s6439_s20 = scalar_select %p5188_p3, 1, 0 }
  0x46   : > { %s6434_s21 = scalar_select %p5178_p12, 1, 0 }
  0x47   : > { %s6437_s23 = scalar_select %p5184_p0, 1, 0 }
  0x48   : > { %6435 = sst [smem:[#allocation34_spill]] %s6434_s21  ;;  %s5194_s6 = sshll.u32 %s4981_s13, 5 }
  0x49   : > { %6438 = sst [smem:[#allocation35_spill]] %s6437_s23  ;;  %s344_s7 = sand.u32 1, %s4985_s14  }
  0x4a   : > { %6440 = sst [smem:[#allocation36_spill]] %s6439_s20  ;;  %s346_s3 = sand.u32 1, %s4953_s29  }
  0x4b   : > { %s3799_s27 = sshll.u32 %s346_s3, 6  ;;  %s4065_s10 = sshll.u32 %s4977_s12, 4 }
  0x4c   : > { %s355_s28 = sadd.s32 %s4065_s10, %s5194_s6  ;;  %s348_s16 = scalar_lea.vmem [#allocation7], %s3799_s27 }
  0x4d   : > { %s358_s21 = sshll.u32 %s348_s16, 4  ;;  %s3803_s2 = sshll.u32 %s355_s28, 6  ;;  %s5200_s21 = int_to_ptr.vmem [resolvable:$true] %s358_s21 }
  0x4e   : > { %s6441_s1 = sld [smem:[#allocation40_spill]]  ;;  %p5211_p1 = pnand %p6395_p5, %p5172_p10 }
  0x4f   : > { %s4988_s27 = smov [#allocation12]   ;;  %s5217_s10 = scalar_lea.sflag [#allocation8], %s344_s7 }
  0x50   : > { %s5215_s28 = sshll.u32 %s4988_s27, 4  ;;  %p4647_p7 = pneg %p5211_p1  ;;  %s293_s28 = int_to_ptr.vmem [resolvable:$true] %s5215_s28 }
  0x54   : > { %s5205_s25 = scalar_lea.hbm %s6441_s1, %s3803_s2  ;;  %s4650_s18 = scalar_lea.hbm %s6441_s1, 4096 }
  0x55   : > { %s4645_s24 = scalar_lea.hbm %s5205_s25, 1024  ;;  %p4651_p10 = scmp.lt.u32.totalorder %s5205_s25, %s6441_s1 }
  0x56   : > { %p4646_p4 = scmp.ne.s32.totalorder %s5205_s25, %s4645_s24  ;;  %p4652_p13 = scmp.lt.u32.totalorder %s4650_s18, %s4645_s24 }
  0x57   : > { %p4654_p2 = scmp.lt.u32.totalorder %s4645_s24, %s5205_s25 }
  0x58   : > { %p4648_p9 = pnand %p4647_p7, %p4646_p4  ;;  %p4653_p5 = por %p4652_p13, %p4651_p10 }
  0x5a   : > { %p4649_p11 = pneg %p4648_p9  ;;  %p4655_p3 = por %p4654_p2, %p4653_p5 }
  0x5c   : > { %p4656_p12 = pnand %p4655_p3, %p4649_p11 }
  0x5e   : > { %4659 = shalt.err (!%p4656_p12)
}
  0x5f   : > { %s4660_s7 = scalar_lea.vmem %s5200_s21, 1024  ;;  %s4989_s27 = smov [#allocation7]  }
  0x60   : > { %p4661_p4 = scmp.ne.s32.totalorder %s5200_s21, %s4660_s7  ;;  %s4665_s2 = sshll.u32 %s4989_s27, 4  ;;  %s4666_s2 = int_to_ptr.vmem [resolvable:$false] %s4665_s2 }
  0x61   : > { %s4667_s20 = scalar_lea.vmem %s4666_s2, 2048  ;;  %p4668_p6 = scmp.lt.s32.totalorder %s5200_s21, %s4666_s2 }
  0x62   : > { %p4663_p9 = pnand %p4661_p4, %p4647_p7  ;;  %p4669_p10 = scmp.lt.s32.totalorder %s4667_s20, %s4660_s7 }
  0x64   : > { %p4664_p0 = pneg %p4663_p9  ;;  %p4670_p13 = por %p4669_p10, %p4668_p6 }
  0x66   : > { %p4671_p2 = pnand %p4670_p13, %p4664_p0 }
  0x68   : > { %4674 = shalt.err (!%p4671_p2)
}
  0x69   : > { %s6402_s24 = smov 64   ;;  %s6404_s16 = smov 4  }
  0x6a   : > { %4451 = dma.hbm_to_vmem [thread:$0]  (!%p5211_p1), %s5205_s25, 1024, %s5200_s21, %s5217_s10, %s6402_s24, %s6402_s24, %s6404_s16  }
  0x6b   : > { %s4992_s18 = smov [#allocation13]   ;;  %s6443_s4 = sld [smem:[#allocation43_spill]] }
  0x6c   : > { %s302_s23 = sshll.u32 %s4992_s18, 4  ;;  %s303_s23 = int_to_ptr.vmem [resolvable:$true] %s302_s23 }
  0x71   : > { %s4675_s2 = scalar_lea.hbm %s6443_s4, 16 }
  0x72   : > { %p4676_p6 = scmp.ne.s32.totalorder %s6443_s4, %s4675_s2  ;;  %p4682_p3 = scmp.lt.u32.totalorder %s4675_s2, %s6443_s4 }
  0x74   : > { %p4678_p12 = pnand %p4676_p6, %p5138_p8 }
  0x76   : > { %p4679_p0 = pneg %p4678_p12 }
  0x78   : > { %p4684_p5 = pnand %p4682_p3, %p4679_p0 }
  0x7a   : > { %4687 = shalt.err (!%p4684_p5)
}
  0x7b   : > { %s4688_s25 = scalar_lea.vmem %s293_s28, 16  ;;  %s4695_s21 = scalar_lea.vmem %s293_s28, 32 }
  0x7c   : > { %p4689_p1 = scmp.ne.s32.totalorder %s293_s28, %s4688_s25  ;;  %p4696_p4 = scmp.lt.s32.totalorder %s293_s28, %s293_s28 }
  0x7d   : > { %p4697_p9 = scmp.lt.s32.totalorder %s4695_s21, %s4688_s25 }
  0x7e   : > { %p4691_p7 = pnand %p4689_p1, %p5138_p8 }
  0x7f   : > { %p4698_p10 = por %p4697_p9, %p4696_p4 }
  0x80   : > { %p4692_p11 = pneg %p4691_p7 }
  0x82   : > { %p4699_p13 = pnand %p4698_p10, %p4692_p11 }
  0x84   : > { %4702 = shalt.err (!%p4699_p13)
}
  0x85   : > { %p6444_p2 = scmp.ne.s32.totalorder %s6428_s19, 0  ;;  %s6445_s5 = sld [smem:[#allocation44_spill]] }
  0x87   : > { %4441 = dma.hbm_to_vmem [thread:$0]  (!%p6444_p2), %s6443_s4, 16, %s293_s28, [#allocation11]  }
  0x8b   : > { %s4703_s27 = scalar_lea.hbm %s6445_s5, 576 }
  0x8c   : > { %p4704_p6 = scmp.ne.s32.totalorder %s6445_s5, %s4703_s27  ;;  %p4710_p3 = scmp.lt.u32.totalorder %s4703_s27, %s6445_s5 }
  0x8e   : > { %p4706_p12 = pnand %p4704_p6, %p5138_p8 }
  0x90   : > { %p4707_p0 = pneg %p4706_p12 }
  0x92   : > { %p4712_p5 = pnand %p4710_p3, %p4707_p0 }
  0x94   : > { %4715 = shalt.err (!%p4712_p5)
}
  0x95   : > { %s4716_s21 = scalar_lea.vmem %s303_s23, 576  ;;  %p4724_p4 = scmp.lt.s32.totalorder %s303_s23, %s303_s23 }
  0x96   : > { %p4717_p1 = scmp.ne.s32.totalorder %s303_s23, %s4716_s21  ;;  %p4725_p9 = scmp.lt.s32.totalorder %s4716_s21, %s4716_s21 }
  0x98   : > { %p4719_p7 = pnand %p4717_p1, %p5138_p8  ;;  %p4726_p10 = por %p4725_p9, %p4724_p4 }
  0x9a   : > { %p4720_p11 = pneg %p4719_p7 }
  0x9c   : > { %p4727_p13 = pnand %p4726_p10, %p4720_p11 }
  0x9e   : > { %4730 = shalt.err (!%p4727_p13)
}
  0x9f   : > { %4444 = dma.hbm_to_vmem [thread:$0]  (!%p6444_p2), %s6445_s5, 576, %s303_s23, [#allocation14], %s6402_s24, %s6402_s24, %s6404_s16  }
  0xa0   : > { %p46_p8 = scmp.ge.s32.totalorder %s6523_s22, 2  ;;  %s3781_s19 = sshll.u32 %s4977_s12, 2 }
  0xa1   : > { %s3783_s17 = sshll.u32 %s6521_s11, 2  ;;  %s3782_s18 = sadd.s32 4294967295, %s3781_s19 }
  0xa2   : > { %s6525_s22 = smov (%p46_p8, %s6523_s22), 0  ;;  %s3784_s26 = sadd.s32 4294967295, %s3783_s17 }
  0xa3   : > { %6446 = sst [smem:[#allocation37_spill]] %s6525_s22  ;;  %p50_p6 = scmp.gt.s32.totalorder %s3782_s18, 0 }
  0xa4   : > { %p54_p12 = scmp.gt.s32.totalorder %s3784_s26, 0  ;;  %s5296_s7 = ssub.s32 %s4981_s13, %s6525_s22 }
  0xa5   : > { %s61_s23 = sadd.s32 1, %s4965_s9  ;;  %s6527_s18 = smov (!%p50_p6, %s3782_s18), 0 }
  0xa6   : > { %s6529_s26 = smov (!%p54_p12, %s3784_s26), 0  ;;  %p68_p2 = scmp.ne.s32.totalorder %s4965_s9, %s4961_s8 }
  0xa7   : > { %p74_p0 = scmp.ne.s32.totalorder %s4961_s8, %s4957_s30  ;;  %s57_s27 = ssub.s32 %s6527_s18, %s6529_s26 }
  0xa8   : > { %s6447_s2 = ssub.s32 %s4977_s12, %s6521_s11  ;;  %s58_s3 = sor.u32 %s57_s27, %s5296_s7 }
  0xa9   : > { %s86_s20 = sor.u32 %s6447_s2, %s5296_s7  ;;  %p6448_p3 = scmp.eq.s32.totalorder %s4985_s14, 0 }
  0xaa   : > { %p59_p1 = scmp.eq.s32.totalorder %s58_s3, 0  ;;  %p6450_p7 = scmp.eq.s32.totalorder %s5112_s15, 0 }
  0xab   : > { %p5310_p5 = por %p6448_p3, %p68_p2  ;;  %p87_p4 = scmp.eq.s32.totalorder %s86_s20, 0 }
  0xac   : > { %p5316_p11 = por %p6450_p7, %p74_p0  ;;  %s5320_s30 = sadd.s32 4, %s3781_s19 }
  0xad   : > { %s5323_s28 = scalar_select %p59_p1, %s4965_s9, %s61_s23  }
  0xae   : > { %s6451_s21 = scalar_select %p5316_p11, 1, 0 }
  0xaf   : > { %s6453_s1 = sadd.s32 1, %s4953_s29  ;;  %s5331_s27 = sadd.s32 4, %s3783_s17 }
  0xb0   : > { %6452 = sst [smem:[#allocation38_spill]] %s6451_s21  ;;  %s316_s2 = sand.u32 1, %s4965_s9  }
  0xb1   : > { %s5328_s26 = scalar_select %p87_p4, %s4953_s29, %s6453_s1  }
  0xb2   : > { %s3792_s3 = sshll.u32 %s316_s2, 4  ;;  %s4064_s24 = sshll.u32 %s6527_s18, 2 }
  0xb3   : > { %s331_s16 = sadd.s32 %s4064_s24, %s5194_s6  ;;  %s320_s20 = scalar_lea.vmem [#allocation4], %s3792_s3 }
  0xb4   : > { %s334_s4 = sshll.u32 %s320_s20, 4  ;;  %s3798_s5 = sshll.u32 %s331_s16, 6  ;;  %s5336_s4 = int_to_ptr.vmem [resolvable:$true] %s334_s4 }
  0xb5   : > { %s6454_s0 = sld [smem:[#allocation39_spill]]  ;;  %p6455_p13 = scmp.lt.s32.totalorder %s4985_s14, 4 }
  0xb6   : > { %s5351_s24 = scalar_lea.sflag [#allocation5], %s316_s2 }
  0xb7   : > { %p5347_p8 = pnand %p6455_p13, %p5310_p5 }
  0xb9   : > { %p4733_p12 = pneg %p5347_p8 }
  0xbb   : > { %s5341_s22 = scalar_lea.hbm %s6454_s0, %s3798_s5  ;;  %s4736_s25 = scalar_lea.hbm %s6454_s0, 4096 }
  0xbc   : > { %s4731_s16 = scalar_lea.hbm %s5341_s22, 256  ;;  %p4737_p3 = scmp.lt.u32.totalorder %s5341_s22, %s6454_s0 }
  0xbd   : > { %p4732_p6 = scmp.ne.s32.totalorder %s5341_s22, %s4731_s16  ;;  %p4738_p5 = scmp.lt.u32.totalorder %s4736_s25, %s4731_s16 }
  0xbe   : > { %p4740_p7 = scmp.lt.u32.totalorder %s4731_s16, %s5341_s22 }
  0xbf   : > { %p4734_p2 = pnand %p4733_p12, %p4732_p6  ;;  %p4739_p1 = por %p4738_p5, %p4737_p3 }
  0xc1   : > { %p4735_p0 = pneg %p4734_p2  ;;  %p4741_p4 = por %p4740_p7, %p4739_p1 }
  0xc3   : > { %p4742_p13 = pnand %p4741_p4, %p4735_p0 }
  0xc5   : > { %4745 = shalt.err (!%p4742_p13)
}
  0xc6   : > { %s4746_s2 = scalar_lea.vmem %s5336_s4, 256  ;;  %s4993_s20 = smov [#allocation4]  }
  0xc7   : > { %p4747_p6 = scmp.ne.s32.totalorder %s5336_s4, %s4746_s2  ;;  %s4751_s19 = sshll.u32 %s4993_s20, 4  ;;  %s4752_s19 = int_to_ptr.vmem [resolvable:$false] %s4751_s19 }
  0xc8   : > { %s4753_s23 = scalar_lea.vmem %s4752_s19, 512  ;;  %p4754_p9 = scmp.lt.s32.totalorder %s5336_s4, %s4752_s19 }
  0xc9   : > { %p4749_p2 = pnand %p4747_p6, %p4733_p12  ;;  %p4755_p3 = scmp.lt.s32.totalorder %s4753_s23, %s4746_s2 }
  0xcb   : > { %p4750_p10 = pneg %p4749_p2  ;;  %p4756_p5 = por %p4755_p3, %p4754_p9 }
  0xcd   : > { %p4757_p1 = pnand %p4756_p5, %p4750_p10 }
  0xcf   : > { %4760 = shalt.err (!%p4757_p1)
}
  0xd0   : > { %s6457_s16 = smov 4   ;;  %s6458_s5 = smov 64  }
  0xd1   : > { %s6459_s18 = sld [smem:[#allocation27_spill]]  ;;  %s6460_s25 = sld [smem:[#allocation26_spill]] }
  0xd2   : > { %s6461_s1 = sld [smem:[#allocation25_spill]]  ;;  %p6462_p9 = scmp.lt.s32.totalorder %s5320_s30, 7 }
  0xd3   : > { %4448 = dma.hbm_to_vmem [thread:$0]  (!%p5347_p8), %s5341_s22, 256, %s5336_s4, %s5351_s24, %s6458_s5, %s6458_s5, %s6457_s16  }
  0xd4   : > { %s6531_s30 = smov (!%p6462_p9, %s5320_s30), 7  ;;  %p6463_p10 = scmp.lt.s32.totalorder %s5331_s27, 7 }
  0xd5   : > { %p6464_p7 = scmp.eq.s32.totalorder %s4985_s14, 0  ;;  %p6465_p6 = scmp.eq.s32.totalorder %s5112_s15, 0 }
  0xd6   : > { %s6533_s27 = smov (!%p6463_p10, %s5331_s27), 7  ;;  %s4068_s22 = sshll.u32 %s6531_s30, 2 }
  0xd7   : > { %s125_s17 = sadd.s32 1, %s6459_s18  ;;  %p132_p12 = scmp.ne.s32.totalorder %s6459_s18, %s6460_s25 }
  0xd8   : > { %p138_p0 = scmp.ne.s32.totalorder %s6460_s25, %s6461_s1  ;;  %s121_s3 = ssub.s32 %s6531_s30, %s6533_s27 }
  0xd9   : > { %s370_s2 = sand.u32 1, %s6459_s18   ;;  %s122_s20 = sor.u32 %s121_s3, %s5296_s7 }
  0xda   : > { %p134_p4 = por %p132_p12, %p6464_p7  ;;  %p123_p13 = scmp.eq.s32.totalorder %s122_s20, 0 }
  0xdb   : > { %p5399_p2 = por %p138_p0, %p6465_p6  ;;  %s3804_s4 = sshll.u32 %s370_s2, 4 }
  0xdc   : > { %s6535_s18 = smov (!%p123_p13, %s6459_s18), %s125_s17  ;;  %s383_s24 = sadd.s32 %s4068_s22, %s5194_s6 }
  0xdd   : > { %s6466_s19 = scalar_select %p5399_p2, 1, 0 }
  0xde   : > { %s3809_s23 = sshll.u32 %s383_s24, 6  ;;  %s372_s0 = scalar_lea.vmem [#allocation9], %s3804_s4 }
  0xdf   : > { %s386_s25 = sshll.u32 %s372_s0, 4  ;;  %s6467_s11 = sld [smem:[#allocation41_spill]]  ;;  %s5412_s25 = int_to_ptr.vmem [resolvable:$true] %s386_s25 }
  0xe0   : > { %p6469_p8 = scmp.lt.s32.totalorder %s4985_s14, 4 }
  0xe2   : > { %p5416_p3 = pnand %p6469_p8, %p134_p4 }
  0xe4   : > { %p4763_p1 = pneg %p5416_p3 }
  0xe5   : > { %s6468_s21 = smov %s6467_s11  ;;  %s5410_s7 = scalar_lea.hbm %s6467_s11, %s3809_s23 }
  0xe6   : > { %s4761_s6 = scalar_lea.hbm %s5410_s7, 256  ;;  %s4766_s17 = scalar_lea.hbm %s6468_s21, 4096 }
  0xe7   : > { %p4762_p5 = scmp.ne.s32.totalorder %s5410_s7, %s4761_s6  ;;  %p4767_p12 = scmp.lt.u32.totalorder %s5410_s7, %s6468_s21 }
  0xe8   : > { %p4768_p0 = scmp.lt.u32.totalorder %s4766_s17, %s4761_s6  ;;  %p4770_p4 = scmp.lt.u32.totalorder %s4761_s6, %s5410_s7 }
  0xe9   : > { %p4764_p9 = pnand %p4763_p1, %p4762_p5 }
  0xea   : > { %p4769_p7 = por %p4768_p0, %p4767_p12 }
  0xeb   : > { %p4765_p10 = pneg %p4764_p9 }
  0xec   : > { %p4771_p13 = por %p4770_p4, %p4769_p7 }
  0xee   : > { %p4772_p6 = pnand %p4771_p13, %p4765_p10 }
  0xf0   : > { %4775 = shalt.err (!%p4772_p6)
}
  0xf1   : > { %s4776_s20 = scalar_lea.vmem %s5412_s25, 256  ;;  %s4994_s4 = smov [#allocation9]  }
  0xf2   : > { %p4777_p8 = scmp.ne.s32.totalorder %s5412_s25, %s4776_s20  ;;  %s4781_s22 = sshll.u32 %s4994_s4, 4  ;;  %s4782_s22 = int_to_ptr.vmem [resolvable:$false] %s4781_s22 }
  0xf3   : > { %s4783_s24 = scalar_lea.vmem %s4782_s22, 512  ;;  %p4784_p2 = scmp.lt.s32.totalorder %s5412_s25, %s4782_s22 }
  0xf4   : > { %p4779_p5 = pnand %p4777_p8, %p4763_p1  ;;  %p4785_p12 = scmp.lt.s32.totalorder %s4783_s24, %s4776_s20 }
  0xf6   : > { %p4780_p9 = pneg %p4779_p5  ;;  %p4786_p0 = por %p4785_p12, %p4784_p2 }
  0xf8   : > { %p4787_p7 = pnand %p4786_p0, %p4780_p9 }
  0xfa   : > { %4790 = shalt.err (!%p4787_p7)
}
  0xfb   : > { %4454 = dma.hbm_to_vmem [thread:$0]  (!%p5416_p3), %s5410_s7, 256, %s5412_s25, %s5217_s10, %s6458_s5, %s6458_s5, %s6457_s16  }
  0xfc   : > { %s6471_s23 = sld [smem:[#allocation32_spill]] }
 0x102   : > { %p6472_p1 = scmp.ne.s32.totalorder %s6471_s23, 0 }
 0x103   : > { %s400_s27 = sand.u32 (!%p6472_p1), 1, %s4961_s8  }
 0x104   : > { %398 = sbr.rel (%p6472_p1) target bundleno = 868 (0x364), region = 44  ;;  %s5452_s6 = sshll.u32 (!%p6472_p1), %s400_s27, 4 }
 0x105   : > { %s401_s0 = scalar_lea.sflag (!%p6472_p1), [#allocation5], %s400_s27  ;;  %s404_s11 = scalar_lea.vmem (!%p6472_p1), [#allocation4], %s5452_s6 }
 0x10b   : > { %4904 = dma.done.wait (%p5316_p11), %s401_s0, 256  }
 0x10c   : > { %4906 = vsyncadd (%p5316_p11), %s401_s0, 4294967040  ;;  %s6474_s30 = sld [smem:[#allocation29_spill]]  ;;  %s6475_s17 = sld [smem:[#allocation35_spill]] }
 0x10d   : > { %s409_s10 = sand.u32 1, %s5112_s15  }
 0x10e   : > { %s410_s25 = scalar_lea.sflag [#allocation8], %s409_s10 }
 0x112   : > { %s5461_s16 = sand.u32 1, %s6474_s30   ;;  %p6476_p2 = scmp.ne.s32.totalorder %s6475_s17, 0 }
 0x113   : > { %s3812_s5 = sshll.u32 %s5461_s16, 6 }
 0x114   : > { %s5466_s7 = scalar_lea.vmem [#allocation7], %s3812_s5 }
 0x115   : > { %4908 = dma.done.wait (%p6476_p2), %s410_s25, 1024  }
 0x116   : > { %4910 = vsyncadd (%p6476_p2), %s410_s25, 4294966272  ;;  %s6477_s3 = sld [smem:[#allocation26_spill]]  ;;  %p6478_p11 = scmp.ne.s32.totalorder %s6466_s19, 0 }
 0x11c   : > { %s420_s2 = sand.u32 1, %s6477_s3  }
 0x11d   : > { %s5473_s20 = sshll.u32 %s420_s2, 4 }
 0x11e   : > { %s422_s4 = scalar_lea.vmem [#allocation9], %s5473_s20 }
 0x11f   : > { %4912 = dma.done.wait (%p6478_p11), %s410_s25, 256  }
 0x120   : > { %4914 = vsyncadd (%p6478_p11), %s410_s25, 4294967040  ;;  %p6479_p3 = scmp.eq.s32.totalorder %s5112_s15, 0 }
 0x122   : > { %4916 = dma.done.wait (%p6479_p3), [#allocation11], 32   ;;  %p6480_p10 = pmov %p6479_p3 }
 0x123   : > { %p6481_p4 = pmov %p6479_p3 }
 0x124   : > { %4918 = vsyncadd (%p6480_p10), [#allocation11], 4294967264 }
 0x125   : > { %4920 = dma.done.wait (%p6481_p4), [#allocation14], 576   ;;  %p6482_p13 = pmov %p6479_p3 }
 0x126   : > { %s6483_s22 = sld [smem:[#allocation30_spill]]  ;;  %vm496_vm0 = vcmask 57344   ;;  %v4995_v0 = vmov 0   ;;  %vm509_vm1 = vcmask 58369   ;;  %vm957_vm2 = vcmask 1043456   ;;  %v4152_v5 = vld [vmem:[%s5466_s7 + $0x10] sm:$0xff]  }
 0x127   : > { %4922 = vsyncadd (%p6482_p13), [#allocation14], 4294966720  ;;  %501 = vst.msk [vmem:[#allocation2 + $0x30] sm:$0x1] %vm496_vm0, %v4995_v0  ;;  %v891_v1 = vld [vmem:[#allocation13] sm:$0xf]  ;;  %v4127_v8 = vunpack.c.l.bf16 %v4152_v5  ;;  %v4128_v9 = vunpack.c.h.bf16 %v4152_v5 }
 0x128   : > { %497 = vst.msk [vmem:[#allocation2] sm:$0x1] %vm496_vm0, %v4995_v0  ;;  %498 = vst.msk [vmem:[#allocation2 + $0xc] sm:$0x1] %vm496_vm0, %v4995_v0  ;;  %v5503_v2 = vld [vmem:[#allocation10] ss:$0 sm:$0xff]  ;;  %4404 = vmatprep.subr.msk.bf16.mxu1 %vm957_vm2, %v891_v1  ;;  %4403 = vmatprep.subr.msk.bf16.mxu0 %vm957_vm2, %v891_v1 }
 0x129   : > { %499 = vst.msk [vmem:[#allocation2 + $0x18] sm:$0x1] %vm496_vm0, %v4995_v0  ;;  %500 = vst.msk [vmem:[#allocation2 + $0x24] sm:$0x1] %vm496_vm0, %v4995_v0  ;;  %v959_v4 = vsel %vm957_vm2, %v891_v1, 0  ;;  %v4153_v7 = vld [vmem:[%s5466_s7 + $0x18] sm:$0xff]   ;;  %v694_v20 = vmul.f32 %v4127_v8, %v5503_v2  ;;  %v695_v21 = vmul.f32 %v4128_v9, %v5503_v2 }
 0x12a   : > { %502 = vst.msk [vmem:[#allocation2 + $0x3c] sm:$0x1] %vm496_vm0, %v4995_v0  ;;  %503 = vst.msk [vmem:[#allocation2 + $0x48] sm:$0x1] %vm496_vm0, %v4995_v0  ;;  %v5509_v6 = vld [vmem:[#allocation13 + $0x4] sm:$0xf]  ;;  %4402 = vmatpush3.bf16.msra.mxu1 %v959_v4  ;;  %v4131_v10 = vunpack.c.l.bf16 %v4153_v7  ;;  %v4132_v11 = vunpack.c.h.bf16 %v4153_v7  ;;  %4240 = vmatpush3.bf16.msra.mxu0 %v959_v4 }
 0x12b   : > { %504 = vst.msk [vmem:[#allocation2 + $0x54] sm:$0x1] %vm496_vm0, %v4995_v0  ;;  %505 = vst.msk [vmem:[#allocation2 + $0x60] sm:$0x1] %vm496_vm0, %v4995_v0  ;;  %vm571_vm3 = vcmask 1040384   ;;  %vm572_vm4 = vcmask 1044484   ;;  %4405 = vmatprep.subr.msk.bf16.mxu1 %vm957_vm2, %v5509_v6 }
 0x12c   : > { %506 = vst.msk [vmem:[#allocation2 + $0x6c] sm:$0x1] %vm496_vm0, %v4995_v0  ;;  %507 = vst.msk [vmem:[#allocation2 + $0x78] sm:$0x1] %vm496_vm0, %v4995_v0  ;;  %p492_p6 = scmp.eq.s32.totalorder %s6483_s22, 0  ;;  %v4102_v12 = vld [vmem:[%s404_s11] sm:$0xff]   ;;  %v696_v22 = vmul.f32 %v4131_v10, %v5503_v2  ;;  %v697_v23 = vmul.f32 %v4132_v11, %v5503_v2 }
 0x12d   : > { %508 = vst.msk [vmem:[#allocation2 + $0x84] sm:$0x1] %vm496_vm0, %v4995_v0  ;;  %v4149_v13 = vld [vmem:[%s404_s11 + $0x8] sm:$0xff]   ;;  %v5517_v14 = vld [vmem:[#allocation12] ss:$0 sm:$0xff]  ;;  %vm590_vm5 = vcmask 60417   ;;  %v4103_v15 = vunpack.c.l.bf16 %v4102_v12  ;;  %v4104_v16 = vunpack.c.h.bf16 %v4102_v12  ;;  %vm5548_vm8 = vmor %vm571_vm3, %vm572_vm4 }
 0x12e   : > { %s5501_s15 = scalar_select %p492_p6, 1, 0  ;;  %510 = vst.msk [vmem:[#allocation2 + $0x8] sm:$0x2] %vm509_vm1, %v4995_v0  ;;  %511 = vst.msk [vmem:[#allocation2 + $0x14] sm:$0x2] %vm509_vm1, %v4995_v0  ;;  %v4107_v17 = vunpack.c.l.bf16 %v4149_v13  ;;  %v4108_v24 = vunpack.c.h.bf16 %v4149_v13  ;;  %v710_v28 = vadd.f32 %v5517_v14, %v694_v20  ;;  %v711_v29 = vadd.f32 %v5517_v14, %v695_v21 }
 0x12f   : > { %512 = vst.msk [vmem:[#allocation2 + $0x20] sm:$0x2] %vm509_vm1, %v4995_v0  ;;  %513 = vst.msk [vmem:[#allocation2 + $0x2c] sm:$0x2] %vm509_vm1, %v4995_v0  ;;  %v5525_v19 = vld [vmem:[#allocation13 + $0x8] sm:$0xf]  ;;  %v536_v25 = vmul.f32 %v4103_v15, %v5503_v2  ;;  %v537_v26 = vmul.f32 %v4104_v16, %v5503_v2  ;;  %v712_v30 = vadd.f32 %v5517_v14, %v696_v22 }
 0x130   : > { %514 = vst.msk [vmem:[#allocation2 + $0x38] sm:$0x2] %vm509_vm1, %v4995_v0  ;;  %515 = vst.msk [vmem:[#allocation2 + $0x44] sm:$0x2] %vm509_vm1, %v4995_v0  ;;  %v557_v3 = vstv %s5501_s15  ;;  %4406 = vmatprep.subr.msk.bf16.mxu0 %vm957_vm2, %v5525_v19  ;;  %v538_v27 = vmul.f32 %v4107_v17, %v5503_v2  ;;  %vm592_vm7 = vcmask 60416   ;;  %v713_v31 = vadd.f32 %v5517_v14, %v697_v23  ;;  %v4154_v40 = vld [vmem:[%s5466_s7 + $0x20] sm:$0xff]  }
 0x131   : > { %516 = vst.msk [vmem:[#allocation2 + $0x50] sm:$0x2] %vm509_vm1, %v4995_v0  ;;  %517 = vst.msk [vmem:[#allocation2 + $0x5c] sm:$0x2] %vm509_vm1, %v4995_v0  ;;  %vm5521_vm6 = vcmp.eq.s32.totalorder %v557_v3, 1  ;;  %v539_v32 = vmul.f32 %v4108_v24, %v5503_v2  ;;  %v546_v33 = vadd.f32 %v5517_v14, %v536_v25  ;;  %v547_v34 = vadd.f32 %v5517_v14, %v537_v26  ;;  %v4155_v8 = vld [vmem:[%s5466_s7 + $0x28] sm:$0xff]  }
 0x132   : > { %518 = vst.msk [vmem:[#allocation2 + $0x68] sm:$0x2] %vm509_vm1, %v4995_v0  ;;  %519 = vst.msk [vmem:[#allocation2 + $0x74] sm:$0x2] %vm509_vm1, %v4995_v0  ;;  %v548_v35 = vadd.f32 %v5517_v14, %v538_v27  ;;  %v726_v36 = vmax.f32 %v710_v28, 0.0  ;;  %v727_v37 = vmax.f32 %v711_v29, 0.0  ;;  %v4135_v51 = vunpack.c.l.bf16 %v4154_v40 }
 0x133   : > { %520 = vst.msk [vmem:[#allocation2 + $0x80] sm:$0x2] %vm509_vm1, %v4995_v0  ;;  %521 = vst.msk [vmem:[#allocation2 + $0x8c] sm:$0x2] %vm509_vm1, %v4995_v0  ;;  %v728_v38 = vmax.f32 %v712_v30, 0.0  ;;  %v729_v39 = vmax.f32 %v713_v31, 0.0  ;;  %v549_v41 = vadd.f32 %v5517_v14, %v539_v32  ;;  %v4136_v52 = vunpack.c.h.bf16 %v4154_v40 }
 0x134   : > { %v550_v42 = vmax.f32 %v546_v33, 0.0  ;;  %v551_v43 = vmax.f32 %v547_v34, 0.0  ;;  %v552_v44 = vmax.f32 %v548_v35, 0.0  ;;  %v4073_v45 = vpack.c.bf16 %v726_v36, %v726_v36  ;;  %v4118_v27 = vld [vmem:[%s5466_s7] sm:$0xff]   ;;  %v4151_v32 = vld [vmem:[%s5466_s7 + $0x8] sm:$0xff]   ;;  %p493_p8 = scmp.eq.s32.totalorder %s6483_s22, 1 }
 0x135   : > { %v4074_v46 = vpack.c.bf16 %v727_v37, %v727_v37  ;;  %v4075_v47 = vpack.c.bf16 %v728_v38, %v728_v38  ;;  %v4076_v48 = vpack.c.bf16 %v729_v39, %v729_v39  ;;  %v553_v49 = vmax.f32 %v549_v41, 0.0  ;;  %s6173_s24 = scalar_lea.vmem [#allocation15], %s3812_s5  ;;  %s6494_s23 = sld [smem:[#allocation31_spill]] }
 0x136   : > { %v554_v50 = vpack.c.bf16 %v551_v43, %v550_v42  ;;  %v796_v53 = vrot.slane %v4073_v45, 7  ;;  %v698_v60 = vmul.f32 %v4135_v51, %v5503_v2  ;;  %v699_v61 = vmul.f32 %v4136_v52, %v5503_v2  ;;  %s5789_s19 = scalar_select %p493_p8, 1, 0 }
 0x137   : > { %v798_v54 = vrot.slane %v4074_v46, 7  ;;  %v801_v55 = vrot.slane %v4075_v47, 7  ;;  %v803_v56 = vrot.slane %v4076_v48, 7  ;;  %v555_v58 = vpack.c.bf16 %v553_v49, %v552_v44  ;;  %s6495_s1 = sld [smem:[#allocation34_spill]]  ;;  %s4053_s27 = sshll.u32 %s6483_s22, 4 }
 0x138   : > { %v559_v59 = vsel %vm5521_vm6, 0, %v554_v50  ;;  %v797_v62 = vrot.slane %v796_v53, 4  ;;  %857 = vst.msk [vmem:[#allocation2 + $0x30] sm:$0xe] %vm590_vm5, %v796_v53  ;;  %vm932_vm9 = vcmask 64512   ;;  %v714_v7 = vadd.f32 %v5517_v14, %v698_v60  ;;  %s3566_s0 = sshll.u32 %s6173_s24, 4  ;;  %s6255_s0 = int_to_ptr.vmem [resolvable:$true] %s3566_s0 }
 0x139   : > { %v800_v63 = vrot.slane %v798_v54, 4  ;;  %v802_v0 = vrot.slane %v801_v55, 4  ;;  %v805_v1 = vrot.slane %v803_v56, 4  ;;  %860 = vst.msk [vmem:[#allocation2 + $0x3c] sm:$0xe] %vm590_vm5, %v801_v55  ;;  %v560_v3 = vsel %vm5521_vm6, 0, %v555_v58 }
 0x13a   : > { %v3820_v4 = vcombine.low %v559_v59, %v559_v59  ;;  %v3821_v5 = vcombine.high %v559_v59, %v559_v59  ;;  %v799_v9 = vsel %vm5548_vm8, %v797_v62, %v798_v54  ;;  %v3822_v11 = vcombine.low %v560_v3, %v560_v3  ;;  %v5601_v59 = vld [vmem:[#allocation13 + $0xc] sm:$0xf]  ;;  %s6496_s5 = sld [smem:[#allocation45_spill]]  ;;  %s4791_s3 = scalar_lea.vmem %s6255_s0, 1024 }
 0x13b   : > { %859 = vst.msk [vmem:[#allocation2 + $0x38] sm:$0x1] %vm496_vm0, %v800_v63  ;;  %v804_v10 = vsel %vm5548_vm8, %v802_v0, %v803_v56  ;;  %862 = vst.msk [vmem:[#allocation2 + $0x44] sm:$0x1] %vm496_vm0, %v805_v1  ;;  %v3823_v12 = vcombine.high %v560_v3, %v560_v3  ;;  %v715_v16 = vadd.f32 %v5517_v14, %v699_v61  ;;  %v730_v17 = vmax.f32 %v714_v7, 0.0  ;;  %s4054_s6 = sshll.u32 %s6494_s23, 5  ;;  %p4792_p5 = scmp.ne.s32.totalorder %s6255_s0, %s4791_s3 }
 0x13c   : > { %858 = vst.msk [vmem:[#allocation2 + $0x34] sm:$0xf] %vm592_vm7, %v799_v9  ;;  %861 = vst.msk [vmem:[#allocation2 + $0x40] sm:$0xf] %vm592_vm7, %v804_v10  ;;  %v574_v13 = vrot.slane %v3820_v4, 7  ;;  %v576_v15 = vrot.slane %v3821_v5, 7  ;;  %v4139_v21 = vunpack.c.l.bf16 %v4155_v8  ;;  %v4140_v22 = vunpack.c.h.bf16 %v4155_v8  ;;  %s3563_s11 = sadd.s32 %s4054_s6, %s4053_s27 }
 0x13d   : > { %v579_v18 = vrot.slane %v3822_v11, 7  ;;  %v581_v20 = vrot.slane %v3823_v12, 7  ;;  %v731_v25 = vmax.f32 %v715_v16, 0.0  ;;  %v4077_v26 = vpack.c.bf16 %v730_v17, %v730_v17  ;;  %s4055_s30 = sshll.u32 %s3563_s11, 6  ;;  %p6497_p9 = scmp.ne.s32.totalorder %s6495_s1, 0 }
 0x13e   : > { %v575_v23 = vrot.slane %v574_v13, 4  ;;  %v578_v24 = vrot.slane %v576_v15, 4  ;;  %591 = vst.msk [vmem:[#allocation2] sm:$0xe] %vm590_vm5, %v574_v13  ;;  %v700_v30 = vmul.f32 %v4139_v21, %v5503_v2  ;;  %v701_v31 = vmul.f32 %v4140_v22, %v5503_v2  ;;  %s4996_s2 = smov [#allocation15]  }
 0x13f   : > { %v580_v28 = vrot.slane %v579_v18, 4  ;;  %v583_v29 = vrot.slane %v581_v20, 4  ;;  %595 = vst.msk [vmem:[#allocation2 + $0xc] sm:$0xe] %vm590_vm5, %v579_v18  ;;  %v1232_v33 = vsel %vm957_vm2, %v5509_v6, 0  ;;  %v4078_v35 = vpack.c.bf16 %v731_v25, %v731_v25  ;;  %p4793_p12 = pnand %p4792_p5, %p6497_p9  ;;  %s4795_s20 = sshll.u32 %s4996_s2, 4  ;;  %s4796_s20 = int_to_ptr.vmem [resolvable:$false] %s4795_s20 }
 0x140   : > { %v577_v34 = vsel %vm5548_vm8, %v575_v23, %v576_v15  ;;  %594 = vst.msk [vmem:[#allocation2 + $0x8] sm:$0x1] %vm496_vm0, %v578_v24  ;;  %v806_v36 = vrot.slane %v4077_v26, 7  ;;  %vm1122_vm10 = vcmask 1042432   ;;  %v716_v38 = vadd.f32 %v5517_v14, %v700_v30  ;;  %s6260_s25 = scalar_lea.hbm %s6496_s5, %s4055_s30  ;;  %p4798_p7 = scmp.lt.s32.totalorder %s6255_s0, %s4796_s20 }
 0x141   : > { %593 = vst.msk [vmem:[#allocation2 + $0x4] sm:$0xf] %vm592_vm7, %v577_v34  ;;  %v582_v37 = vsel %vm5548_vm8, %v580_v28, %v581_v20  ;;  %v717_v39 = vadd.f32 %v5517_v14, %v701_v31  ;;  %v4119_v6 = vunpack.c.l.bf16 %v4118_v27  ;;  %v808_v41 = vrot.slane %v4078_v35, 7  ;;  %p4794_p0 = pneg %p4793_p12 }
 0x142   : > { %597 = vst.msk [vmem:[#allocation2 + $0x14] sm:$0x1] %vm496_vm0, %v583_v29  ;;  %v807_v40 = vrot.slane %v806_v36, 4  ;;  %v4120_v42 = vunpack.c.h.bf16 %v4118_v27  ;;  %v4123_v43 = vunpack.c.l.bf16 %v4151_v32  ;;  %v732_v45 = vmax.f32 %v716_v38, 0.0 }
 0x143   : > { %596 = vst.msk [vmem:[#allocation2 + $0x10] sm:$0xf] %vm592_vm7, %v582_v37  ;;  %v4591_v44 = vld [vmem:[#allocation2 + $0x30] sm:$0xff]   ;;  %v690_v46 = vmul.f32 %v4119_v6, %v5503_v2  ;;  %v4124_v47 = vunpack.c.h.bf16 %v4151_v32  ;;  %v4592_v48 = vld [vmem:[#allocation2 + $0x3c] sm:$0xff]   ;;  %v810_v50 = vrot.slane %v808_v41, 4  ;;  %v733_v51 = vmax.f32 %v717_v39, 0.0 }
 0x144   : > { %863 = vst.msk [vmem:[#allocation2 + $0x48] sm:$0xe] %vm590_vm5, %v806_v36  ;;  %v809_v49 = vsel %vm5548_vm8, %v807_v40, %v808_v41  ;;  %v691_v52 = vmul.f32 %v4120_v42, %v5503_v2  ;;  %4249 = vmatprep.mubr.msk.bf16.mxu1 %vm932_vm9, %v4591_v44  ;;  %v4079_v53 = vpack.c.bf16 %v732_v45, %v732_v45  ;;  %v1537_v61 = vsel %vm957_vm2, %v5525_v19, 0  ;;  %v5613_v19 = vld [vmem:[#allocation13 + $0x10] sm:$0xf] }
 0x145   : > { %864 = vst.msk [vmem:[#allocation2 + $0x4c] sm:$0xf] %vm592_vm7, %v809_v49  ;;  %v706_v54 = vadd.f32 %v5517_v14, %v690_v46  ;;  %v692_v55 = vmul.f32 %v4123_v43, %v5503_v2  ;;  %v693_v56 = vmul.f32 %v4124_v47, %v5503_v2  ;;  %v5599_v58 = vld [vmem:[#allocation2] sm:$0xe]  ;;  %4250 = vmatmul.mubr.msk.bf16.vlgmr.msra.gmra.mrb[0].mxu1 %vm932_vm9, %v4592_v48  ;;  %vm1123_vm11 = vcmask 1046532  }
 0x146   : > { %865 = vst.msk [vmem:[#allocation2 + $0x50] sm:$0x1] %vm496_vm0, %v810_v50  ;;  %v4080_v60 = vpack.c.bf16 %v733_v51, %v733_v51  ;;  %v707_v62 = vadd.f32 %v5517_v14, %v691_v52  ;;  %4258 = vmatpush3.bf16.msra.mxu1 %v1232_v33  ;;  %v811_v63 = vrot.slane %v4079_v53, 7  ;;  %v3860_v9 = vrot.slane %v5599_v58, 9  ;;  %v1077_v20 = vld [vmem:[#allocation2 + $0xc] sm:$0xe]  ;;  %vm5622_vm12 = vmor %vm1122_vm10, %vm1123_vm11 }
 0x147   : > { %v722_v0 = vmax.f32 %v706_v54, 0.0  ;;  %v708_v1 = vadd.f32 %v5517_v14, %v692_v55  ;;  %v709_v3 = vadd.f32 %v5517_v14, %v693_v56  ;;  %v1076_v4 = vld [vmem:[#allocation2 + $0x8] sm:$0x1]  ;;  %4407 = vmatprep.subr.msk.bf16.mxu1 %vm957_vm2, %v5601_v59  ;;  %v1379_v31 = vld [vmem:[#allocation2] sm:$0xc]  ;;  %vm1427_vm13 = vcmask 1041408  }
 0x148   : > { %v4593_v5 = vld [vmem:[#allocation2] sm:$0xff]   ;;  %v813_v7 = vrot.slane %v4080_v60, 7  ;;  %v723_v8 = vmax.f32 %v707_v62, 0.0  ;;  %v812_v11 = vrot.slane %v811_v63, 4  ;;  %866 = vst.msk [vmem:[#allocation2 + $0x54] sm:$0xe] %vm590_vm5, %v811_v63 }
 0x149   : > { %v4069_v12 = vpack.c.bf16 %v722_v0, %v722_v0  ;;  %4241 = vmatprep.mubr.msk.bf16.mxu0 %vm932_vm9, %v4593_v5  ;;  %v724_v16 = vmax.f32 %v708_v1, 0.0  ;;  %v725_v17 = vmax.f32 %v709_v3, 0.0  ;;  %v1075_v18 = vld [vmem:[#allocation2 + $0x4] sm:$0xf]  ;;  %v1130_v25 = vrot.slane %v1076_v4, 5 }
 0x14a   : > { %v4594_v10 = vld [vmem:[#allocation2 + $0xc] sm:$0xff]   ;;  %v815_v13 = vrot.slane %v813_v7, 4  ;;  %v4070_v15 = vpack.c.bf16 %v723_v8, %v723_v8  ;;  %v814_v21 = vsel %vm5548_vm8, %v812_v11, %v813_v7  ;;  %v1127_v24 = vrot.slane %v1075_v18, 5  ;;  %v1381_v32 = vld [vmem:[#allocation2 + $0x8] sm:$0x3] }
 0x14b   : > { %4242 = vmatmul.mubr.msk.bf16.vlgmr.msra.gmra.mrb[0].mxu0 %vm932_vm9, %v4594_v10  ;;  %v786_v22 = vrot.slane %v4069_v12, 7  ;;  %v1078_v26 = vld [vmem:[#allocation2 + $0x10] sm:$0xf]  ;;  %867 = vst.msk [vmem:[#allocation2 + $0x58] sm:$0xf] %vm592_vm7, %v814_v21  ;;  %v4071_v29 = vpack.c.bf16 %v724_v16, %v724_v16  ;;  %v4072_v30 = vpack.c.bf16 %v725_v17, %v725_v17  ;;  %vm1428_vm14 = vcmask 1045508  }
 0x14c   : > { %v4595_v27 = vld [vmem:[#allocation2 + $0x48] sm:$0xff]   ;;  %868 = vst.msk [vmem:[#allocation2 + $0x5c] sm:$0x1] %vm496_vm0, %v815_v13  ;;  %4276 = vmatpush3.bf16.msra.mxu0 %v1537_v61  ;;  %v788_v28 = vrot.slane %v4070_v15, 7  ;;  %v1129_v34 = vrot.slane %v1127_v24, 4  ;;  %v1134_v36 = vrot.slane %v1078_v26, 5  ;;  %v1128_v41 = vsel %vm5622_vm12, %v3860_v9, %v1127_v24  ;;  %vm5650_vm15 = vmor %vm1427_vm13, %vm1428_vm14 }
 0x14d   : > { %v787_v33 = vrot.slane %v786_v22, 4  ;;  %851 = vst.msk [vmem:[#allocation2 + $0x18] sm:$0xe] %vm590_vm5, %v786_v22  ;;  %v1079_v35 = vld [vmem:[#allocation2 + $0x14] sm:$0x1]  ;;  %4408 = vmatprep.subr.msk.bf16.mxu0 %vm957_vm2, %v5613_v19  ;;  %4253 = vmatprep.mubr.msk.bf16.mxu1 %vm932_vm9, %v4595_v27  ;;  %v791_v38 = vrot.slane %v4071_v29, 7 }
 0x14e   : > { %v790_v37 = vrot.slane %v788_v28, 4  ;;  %v793_v39 = vrot.slane %v4072_v30, 7  ;;  %v1380_v6 = vld [vmem:[#allocation2 + $0x4] sm:$0xf]  ;;  %v1131_v42 = vsel %vm5622_vm12, %v1129_v34, %v1130_v25  ;;  %v3861_v43 = vrot.slane %v1077_v20, 9 }
 0x14f   : > { %v789_v40 = vsel %vm5548_vm8, %v787_v33, %v788_v28  ;;  %v1382_v44 = vld [vmem:[#allocation2 + $0xc] sm:$0xc]  ;;  %v1383_v45 = vld [vmem:[#allocation2 + $0x10] sm:$0xf]  ;;  %v792_v46 = vrot.slane %v791_v38, 4  ;;  %v1136_v48 = vrot.slane %v1134_v36, 4  ;;  %v3868_v58 = vcombine.low %v1128_v41, %v1131_v42 }
 0x150   : > { %852 = vst.msk [vmem:[#allocation2 + $0x1c] sm:$0xf] %vm592_vm7, %v789_v40  ;;  %v795_v47 = vrot.slane %v793_v39, 4  ;;  %v1137_v49 = vrot.slane %v1079_v35, 5  ;;  %v5641_v50 = vld [vmem:[#allocation2 + $0x30] sm:$0xe]  ;;  %v1135_v4 = vsel %vm5622_vm12, %v3861_v43, %v1134_v36 }
 0x151   : > { %853 = vst.msk [vmem:[#allocation2 + $0x20] sm:$0x1] %vm496_vm0, %v790_v37  ;;  %v3884_v51 = vrot.slane %v1379_v31, 10  ;;  %v1432_v52 = vrot.slane %v1380_v6, 6  ;;  %v1435_v53 = vrot.slane %v1381_v32, 6  ;;  %v794_v56 = vsel %vm5548_vm8, %v792_v46, %v793_v39  ;;  %v5670_v22 = vld [vmem:[%s5466_s7 + $0x30] sm:$0xff]  }
 0x152   : > { %854 = vst.msk [vmem:[#allocation2 + $0x24] sm:$0xe] %vm590_vm5, %v791_v38  ;;  %v1384_v54 = vld [vmem:[#allocation2 + $0x14] sm:$0x3]  ;;  %v5643_v55 = vld [vmem:[#allocation2 + $0x3c] sm:$0xe]  ;;  %v1138_v5 = vsel %vm5622_vm12, %v1136_v48, %v1137_v49 }
 0x153   : > { %856 = vst.msk [vmem:[#allocation2 + $0x2c] sm:$0x1] %vm496_vm0, %v795_v47  ;;  %v1439_v61 = vrot.slane %v1383_v45, 6  ;;  %v1087_v62 = vld [vmem:[#allocation2 + $0x34] sm:$0xf]  ;;  %v1767_v1 = vsel %vm957_vm2, %v5601_v59, 0  ;;  %v1433_v10 = vsel %vm5650_vm15, %v3884_v51, %v1432_v52  ;;  %v3869_v24 = vcombine.low %v1135_v4, %v1138_v5 }
 0x154   : > { %v1088_v63 = vld [vmem:[#allocation2 + $0x38] sm:$0x1]  ;;  %855 = vst.msk [vmem:[#allocation2 + $0x28] sm:$0xf] %vm592_vm7, %v794_v56  ;;  %v1434_v3 = vrot.slane %v1432_v52, 4  ;;  %v3885_v8 = vrot.slane %v1382_v44, 10 }
 0x155   : > { %v4596_v0 = vld [vmem:[#allocation2 + $0x54] sm:$0xff]   ;;  %v1442_v9 = vrot.slane %v1384_v54, 6  ;;  %v3864_v12 = vrot.slane %v5641_v50, 9  ;;  %v1155_v13 = vrot.slane %v1087_v62, 5  ;;  %v1441_v16 = vrot.slane %v1439_v61, 4 }
 0x156   : > { %v1080_v7 = vld [vmem:[#allocation2 + $0x18] sm:$0xe]  ;;  %4254 = vmatmul.mubr.msk.bf16.gmra.mrb[4].mxu1 %vm932_vm9, %v4596_v0  ;;  %v1436_v11 = vsel %vm5650_vm15, %v1434_v3, %v1435_v53  ;;  %v1158_v17 = vrot.slane %v1088_v63, 5  ;;  %v3865_v18 = vrot.slane %v5643_v55, 9  ;;  %v5675_v35 = vsel %vm5650_vm15, %v3885_v8, %v1439_v61  ;;  %v5681_v39 = vld [vmem:[#allocation2 + $0x40] sm:$0xf] }
 0x157   : > { %v1385_v59 = vld [vmem:[#allocation2 + $0x18] sm:$0xc]  ;;  %4259 = vmatprep.mubr.msk.bf16.mxu1 %vm932_vm9, %v3868_v58  ;;  %v3862_v15 = vrot.slane %v1080_v7, 9  ;;  %v3892_v25 = vcombine.low %v1433_v10, %v1436_v11  ;;  %v1081_v26 = vld [vmem:[#allocation2 + $0x1c] sm:$0xf]  ;;  %v1157_v33 = vrot.slane %v1155_v13, 4  ;;  %v5679_v36 = vsel %vm5650_vm15, %v1441_v16, %v1442_v9 }
 0x158   : > { %v4597_v20 = vld [vmem:[#allocation2 + $0x18] sm:$0xff]   ;;  %v3886_v21 = vrot.slane %v1385_v59, 10  ;;  %v1082_v27 = vld [vmem:[#allocation2 + $0x20] sm:$0x1]  ;;  %v1141_v29 = vrot.slane %v1081_v26, 5  ;;  %v5690_v47 = vsel %vm5622_vm12, %v3864_v12, %v1155_v13  ;;  %v4143_v50 = vunpack.c.l.bf16 %v5670_v22 }
 0x159   : > { %v1083_v28 = vld [vmem:[#allocation2 + $0x24] sm:$0xe]  ;;  %4245 = vmatprep.mubr.msk.bf16.mxu0 %vm932_vm9, %v4597_v20  ;;  %v1144_v30 = vrot.slane %v1082_v27, 5  ;;  %v5683_v6 = vld [vmem:[#allocation13 + $0x14] sm:$0xf]  ;;  %v3893_v52 = vcombine.low %v5675_v35, %v5679_v36  ;;  %v1159_v54 = vsel %vm5622_vm12, %v1157_v33, %v1158_v17  ;;  %v1162_v10 = vrot.slane %v5681_v39, 5 }
 0x15a   : > { %v1085_v31 = vld [vmem:[#allocation2 + $0x2c] sm:$0x1]  ;;  %v3863_v32 = vrot.slane %v1083_v28, 9  ;;  %v1142_v40 = vsel %vm5622_vm12, %v3862_v15, %v1141_v29  ;;  %v1143_v41 = vrot.slane %v1141_v29, 4  ;;  %v1386_v43 = vld [vmem:[#allocation2 + $0x1c] sm:$0xf] }
 0x15b   : > { %v4598_v34 = vld [vmem:[#allocation2 + $0x24] sm:$0xff]   ;;  %v1151_v38 = vrot.slane %v1085_v31, 5  ;;  %v1387_v44 = vld [vmem:[#allocation2 + $0x20] sm:$0x3]  ;;  %v1446_v45 = vrot.slane %v1386_v43, 6  ;;  %v2069_v20 = vsel %vm957_vm2, %v5613_v19, 0 }
 0x15c   : > { %v1084_v37 = vld [vmem:[#allocation2 + $0x28] sm:$0xf]  ;;  %4246 = vmatmul.mubr.msk.bf16.gmra.mrb[4].mxu0 %vm932_vm9, %v4598_v34  ;;  %v1449_v46 = vrot.slane %v1387_v44, 6  ;;  %v1388_v48 = vld [vmem:[#allocation2 + $0x24] sm:$0xc]  ;;  %v1145_v51 = vsel %vm5622_vm12, %v1143_v41, %v1144_v30 }
 0x15d   : > { %v1148_v42 = vrot.slane %v1084_v37, 5  ;;  %v1389_v49 = vld [vmem:[#allocation2 + $0x28] sm:$0xf]  ;;  %4277 = vmatprep.mubr.msk.bf16.mxu0 %vm932_vm9, %v3892_v25  ;;  %v1390_v56 = vld [vmem:[#allocation2 + $0x2c] sm:$0x3]  ;;  %v3870_v62 = vcombine.low %v1142_v40, %v1145_v51  ;;  %v1448_v0 = vrot.slane %v1446_v45, 4  ;;  %v1447_v8 = vsel %vm5650_vm15, %v3886_v21, %v1446_v45 }
 0x15e   : > { %4260 = vmatmul.mubr.msk.bf16.vlgmr.msra.gmra.mrb[8].mxu1 %vm932_vm9, %v3869_v24  ;;  %v1091_v58 = vld [vmem:[#allocation2 + $0x44] sm:$0x1]  ;;  %v1391_v61 = vld [vmem:[#allocation2 + $0x30] sm:$0xc]  ;;  %v1453_v3 = vrot.slane %v1389_v49, 6  ;;  %v3887_v9 = vrot.slane %v1388_v48, 10  ;;  %v3872_v21 = vcombine.low %v5690_v47, %v1159_v54  ;;  %v702_v49 = vmul.f32 %v4143_v50, %v5503_v2 }
 0x15f   : > { %v1150_v53 = vrot.slane %v1148_v42, 4  ;;  %4294 = vmatpush3.bf16.msra.mxu1 %v1767_v1  ;;  %v1149_v63 = vsel %vm5622_vm12, %v3863_v32, %v1148_v42  ;;  %v1392_v4 = vld [vmem:[#allocation2 + $0x34] sm:$0xf]  ;;  %v1393_v5 = vld [vmem:[#allocation2 + $0x38] sm:$0x3]  ;;  %4263 = vmatprep.mubr.msk.bf16.mxu1 %vm932_vm9, %v3870_v62  ;;  %v1450_v1 = vsel %vm5650_vm15, %v1448_v0, %v1449_v46  ;;  %v1456_v13 = vrot.slane %v1390_v56, 6 }
 0x160   : > { %v1092_v11 = vld [vmem:[#allocation2 + $0x48] sm:$0xe]  ;;  %v1093_v59 = vld [vmem:[#allocation2 + $0x4c] sm:$0xf]  ;;  %4409 = vmatprep.subr.msk.bf16.mxu1 %vm957_vm2, %v5683_v6  ;;  %v1455_v12 = vrot.slane %v1453_v3, 4  ;;  %v1165_v15 = vrot.slane %v1091_v58, 5  ;;  %v3894_v25 = vcombine.low %v1447_v8, %v1450_v1  ;;  %v1454_v31 = vsel %vm5650_vm15, %v3887_v9, %v1453_v3 }
 0x161   : > { %v1152_v7 = vsel %vm5622_vm12, %v1150_v53, %v1151_v38  ;;  %v1094_v16 = vld [vmem:[#allocation2 + $0x50] sm:$0x1]  ;;  %v1164_v24 = vrot.slane %v1162_v10, 4  ;;  %v3888_v26 = vrot.slane %v1391_v61, 10  ;;  %v1460_v27 = vrot.slane %v1392_v4, 6  ;;  %v4157_v0 = vld [vmem:[%s5466_s7 + $0x38] sm:$0xff]  }
 0x162   : > { %v3871_v17 = vcombine.low %v1149_v63, %v1152_v7  ;;  %v1463_v28 = vrot.slane %v1393_v5, 6  ;;  %v1395_v29 = vld [vmem:[#allocation2 + $0x40] sm:$0xf]  ;;  %v5716_v30 = vld [vmem:[#allocation13 + $0x18] sm:$0xf]  ;;  %v3866_v32 = vrot.slane %v1092_v11, 9  ;;  %v1457_v19 = vsel %vm5650_vm15, %v1455_v12, %v1456_v13 }
 0x163   : > { %v1169_v33 = vrot.slane %v1093_v59, 5  ;;  %v1172_v34 = vrot.slane %v1094_v16, 5  ;;  %v1394_v35 = vld [vmem:[#allocation2 + $0x3c] sm:$0xc]  ;;  %v1396_v36 = vld [vmem:[#allocation2 + $0x44] sm:$0x3]  ;;  %v1163_v38 = vsel %vm5622_vm12, %v3865_v18, %v1162_v10  ;;  %v1166_v39 = vsel %vm5622_vm12, %v1164_v24, %v1165_v15 }
 0x164   : > { %v1096_v37 = vld [vmem:[#allocation2 + $0x58] sm:$0xf]  ;;  %4278 = vmatmul.mubr.msk.bf16.vlgmr.msra.gmra.mrb[8].mxu0 %vm932_vm9, %v3893_v52  ;;  %v1462_v40 = vrot.slane %v1460_v27, 4  ;;  %v1095_v41 = vld [vmem:[#allocation2 + $0x54] sm:$0xe]  ;;  %v1467_v44 = vrot.slane %v1395_v29, 6  ;;  %v4144_v46 = vunpack.c.h.bf16 %v5670_v22  ;;  %v1461_v55 = vsel %vm5650_vm15, %v3888_v26, %v1460_v27 }
 0x165   : > { %v1097_v42 = vld [vmem:[#allocation2 + $0x5c] sm:$0x1]  ;;  %4312 = vmatpush3.bf16.msra.mxu0 %v2069_v20  ;;  %v1171_v43 = vrot.slane %v1169_v33, 4  ;;  %v1397_v45 = vld [vmem:[#allocation2 + $0x48] sm:$0xc]  ;;  %4281 = vmatprep.mubr.msk.bf16.mxu0 %vm932_vm9, %v3894_v25  ;;  %v1176_v47 = vrot.slane %v1096_v37, 5  ;;  %v3895_v51 = vcombine.low %v1454_v31, %v1457_v19  ;;  %v3873_v52 = vcombine.low %v1163_v38, %v1166_v39 }
 0x166   : > { %4264 = vmatmul.mubr.msk.bf16.gmra.mrb[12].mxu1 %vm932_vm9, %v3871_v17  ;;  %v1464_v18 = vsel %vm5650_vm15, %v1462_v40, %v1463_v28  ;;  %v1398_v48 = vld [vmem:[#allocation2 + $0x4c] sm:$0xf]  ;;  %v1170_v53 = vsel %vm5622_vm12, %v3866_v32, %v1169_v33  ;;  %v1399_v56 = vld [vmem:[#allocation2 + $0x50] sm:$0x3]  ;;  %4410 = vmatprep.subr.msk.bf16.mxu0 %vm957_vm2, %v5716_v30  ;;  %v3889_v58 = vrot.slane %v1394_v35, 10  ;;  %v1470_v61 = vrot.slane %v1396_v36, 6 }
 0x167   : > { %4267 = vmatprep.mubr.msk.bf16.mxu1 %vm932_vm9, %v3872_v21  ;;  %v1173_v54 = vsel %vm5622_vm12, %v1171_v43, %v1172_v34  ;;  %v3867_v62 = vrot.slane %v1095_v41, 9  ;;  %v1179_v63 = vrot.slane %v1097_v42, 5  ;;  %v3896_v3 = vcombine.low %v1461_v55, %v1464_v18  ;;  %v1401_v5 = vld [vmem:[#allocation2 + $0x58] sm:$0xf]  ;;  %v1915_v11 = vld [vmem:[#allocation2 + $0x1c] sm:$0xf] }
 0x168   : > { %v1469_v22 = vrot.slane %v1467_v44, 4  ;;  %v1178_v50 = vrot.slane %v1176_v47, 4  ;;  %v1474_v4 = vrot.slane %v1398_v48, 6  ;;  %v3874_v7 = vcombine.low %v1170_v53, %v1173_v54  ;;  %v1400_v1 = vld [vmem:[#allocation2 + $0x54] sm:$0xc]  ;;  %v4599_v41 = vld [vmem:[#allocation2 + $0x18] sm:$0xff]  }
 0x169   : > { %v3890_v8 = vrot.slane %v1397_v45, 10  ;;  %v1477_v9 = vrot.slane %v1399_v56, 6  ;;  %v4147_v59 = vunpack.c.l.bf16 %v4157_v0  ;;  %v703_v12 = vmul.f32 %v4144_v46, %v5503_v2  ;;  %v1402_v21 = vld [vmem:[#allocation2 + $0x5c] sm:$0x3]  ;;  %v1914_v29 = vld [vmem:[#allocation2 + $0x18] sm:$0xe] }
 0x16a   : > { %v1476_v10 = vrot.slane %v1474_v4, 4  ;;  %v718_v13 = vadd.f32 %v5517_v14, %v702_v49  ;;  %v4148_v15 = vunpack.c.h.bf16 %v4157_v0  ;;  %v1468_v16 = vsel %vm5650_vm15, %v3889_v58, %v1467_v44  ;;  %v1916_v31 = vld [vmem:[#allocation2 + $0x20] sm:$0x1]  ;;  %v1918_v39 = vld [vmem:[#allocation2 + $0x28] sm:$0xf]  ;;  %s3547_s7 = scalar_lea.sflag [#allocation6], %s5461_s16 }
 0x16b   : > { %v1471_v17 = vsel %vm5650_vm15, %v1469_v22, %v1470_v61  ;;  %v1177_v20 = vsel %vm5622_vm12, %v3867_v62, %v1176_v47  ;;  %v1481_v24 = vrot.slane %v1401_v5, 6  ;;  %v1180_v25 = vsel %vm5622_vm12, %v1178_v50, %v1179_v63  ;;  %v5769_v18 = vld [vmem:[#allocation2 + $0x34] sm:$0xf]  ;;  %v1917_v49 = vld [vmem:[#allocation2 + $0x24] sm:$0xe] }
 0x16c   : > { %4282 = vmatmul.mubr.msk.bf16.gmra.mrb[12].mxu0 %vm932_vm9, %v3895_v51  ;;  %v1475_v26 = vsel %vm5650_vm15, %v3890_v8, %v1474_v4  ;;  %v1478_v27 = vsel %vm5650_vm15, %v1476_v10, %v1477_v9  ;;  %v1964_v28 = vrot.slane %v1915_v11, 5  ;;  %v704_v32 = vmul.f32 %v4147_v59, %v5503_v2  ;;  %v1919_v54 = vld [vmem:[#allocation2 + $0x2c] sm:$0x1]  ;;  %v1920_v61 = vld [vmem:[#allocation2 + $0x30] sm:$0xe]  ;;  %v4600_v50 = vld [vmem:[#allocation2 + $0x24] sm:$0xff]  }
 0x16d   : > { %4285 = vmatprep.mubr.msk.bf16.mxu0 %vm932_vm9, %v3896_v3  ;;  %v3897_v33 = vcombine.low %v1468_v16, %v1471_v17  ;;  %v3891_v34 = vrot.slane %v1400_v1, 10  ;;  %v1484_v35 = vrot.slane %v1402_v21, 6  ;;  %v705_v36 = vmul.f32 %v4148_v15, %v5503_v2  ;;  %v1922_v22 = vld [vmem:[#allocation2 + $0x38] sm:$0x1]  ;;  %v4601_v5 = vld [vmem:[#allocation2 + $0x30] sm:$0xff]  }
 0x16e   : > { %4268 = vmatmul.mubr.msk.bf16.gmra.mrb[16].mxu1 %vm932_vm9, %v3873_v52  ;;  %v3875_v37 = vcombine.low %v1177_v20, %v1180_v25  ;;  %v3898_v19 = vcombine.low %v1475_v26, %v1478_v27  ;;  %v1483_v38 = vrot.slane %v1481_v24, 4  ;;  %v734_v40 = vmax.f32 %v718_v13, 0.0  ;;  %v5793_v10 = vld [vmem:[%s422_s4] sm:$0xff]   ;;  %v5799_v17 = vld [vmem:[#allocation2 + $0x4c] sm:$0xf] }
 0x16f   : > { %4271 = vmatprep.mubr.msk.bf16.mxu1 %vm932_vm9, %v3874_v7  ;;  %v3924_v42 = vrot.slane %v1914_v29, 9  ;;  %v1966_v43 = vrot.slane %v1964_v28, 4  ;;  %v1967_v44 = vrot.slane %v1916_v31, 5  ;;  %v719_v45 = vadd.f32 %v5517_v14, %v703_v12  ;;  %v5797_v1 = vld [vmem:[#allocation2 + $0x40] sm:$0xf] }
 0x170   : > { %v4081_v46 = vpack.c.bf16 %v734_v40, %v734_v40  ;;  %v1971_v55 = vrot.slane %v1918_v39, 5  ;;  %v720_v2 = vadd.f32 %v5517_v14, %v704_v32  ;;  %v1482_v47 = vsel %vm5650_vm15, %v3891_v34, %v1481_v24  ;;  %v5804_v26 = vld [vmem:[#allocation13 + $0x1c] sm:$0xf]  ;;  %v1925_v29 = vld [vmem:[#allocation2 + $0x44] sm:$0x1] }
 0x171   : > { %v1485_v48 = vsel %vm5650_vm15, %v1483_v38, %v1484_v35  ;;  %v721_v51 = vadd.f32 %v5517_v14, %v705_v36  ;;  %v1965_v52 = vsel %vm5622_vm12, %v3924_v42, %v1964_v28  ;;  %v1968_v53 = vsel %vm5622_vm12, %v1966_v43, %v1967_v44  ;;  %v1923_v28 = vld [vmem:[#allocation2 + $0x3c] sm:$0xe]  ;;  %v1928_v34 = vld [vmem:[#allocation2 + $0x50] sm:$0x1] }
 0x172   : > { %v735_v56 = vmax.f32 %v719_v45, 0.0  ;;  %v816_v58 = vrot.slane %v4081_v46, 7  ;;  %v1978_v62 = vrot.slane %v5769_v18, 5  ;;  %v3899_v63 = vcombine.low %v1482_v47, %v1485_v48  ;;  %v5831_v43 = vld [vmem:[%s422_s4 + $0x8] sm:$0xff]   ;;  %v1929_v48 = vld [vmem:[#allocation2 + $0x54] sm:$0xe] }
 0x173   : > { %v3925_v0 = vrot.slane %v1917_v49, 9  ;;  %v1973_v3 = vrot.slane %v1971_v55, 4  ;;  %v3932_v4 = vcombine.low %v1965_v52, %v1968_v53  ;;  %v1974_v7 = vrot.slane %v1919_v54, 5  ;;  %v1931_v54 = vld [vmem:[#allocation2 + $0x5c] sm:$0x1]  ;;  %s4797_s4 = scalar_lea.vmem %s4796_s20, 2048 }
 0x174   : > { %4286 = vmatmul.mubr.msk.bf16.gmra.mrb[16].mxu0 %vm932_vm9, %v3897_v33  ;;  %v4082_v14 = vpack.c.bf16 %v735_v56, %v735_v56  ;;  %869 = vst.msk [vmem:[#allocation2 + $0x60] sm:$0xe] %vm590_vm5, %v816_v58  ;;  %v817_v8 = vrot.slane %v816_v58, 4  ;;  %v736_v9 = vmax.f32 %v720_v2, 0.0  ;;  %v2371_v11 = vsel %vm957_vm2, %v5683_v6, 0  ;;  %p4799_p1 = scmp.lt.s32.totalorder %s4797_s4, %s4791_s3 }
 0x175   : > { %4289 = vmatprep.mubr.msk.bf16.mxu0 %vm932_vm9, %v3898_v19  ;;  %v3926_v59 = vrot.slane %v1920_v61, 9  ;;  %v737_v13 = vmax.f32 %v721_v51, 0.0  ;;  %v1980_v15 = vrot.slane %v1978_v62, 4  ;;  %v1981_v16 = vrot.slane %v1922_v22, 5  ;;  %v1926_v33 = vld [vmem:[#allocation2 + $0x48] sm:$0xe] }
 0x176   : > { %4272 = vmatmul.mubr.msk.bf16.gmra.mrb[20].mxu1 %vm932_vm9, %v3875_v37  ;;  %v818_v12 = vrot.slane %v4082_v14, 7  ;;  %v4083_v20 = vpack.c.bf16 %v736_v9, %v736_v9  ;;  %v1972_v6 = vsel %vm5622_vm12, %v3925_v0, %v1971_v55  ;;  %v1975_v27 = vsel %vm5622_vm12, %v1973_v3, %v1974_v7  ;;  %v4602_v19 = vld [vmem:[#allocation2 + $0x3c] sm:$0xff]   ;;  %v4603_v55 = vld [vmem:[#allocation2 + $0x48] sm:$0xff]   ;;  %v5838_v58 = vld [vmem:[#allocation13 + $0x20] sm:$0xf]  ;;  %p4800_p2 = por %p4799_p1, %p4798_p7 }
 0x177   : > { %4295 = vmatprep.mubr.msk.bf16.mxu1 %vm932_vm9, %v4599_v41  ;;  %v4084_v25 = vpack.c.bf16 %v737_v13, %v737_v13  ;;  %v1985_v31 = vrot.slane %v5797_v1, 5  ;;  %v1992_v35 = vrot.slane %v5799_v17, 5  ;;  %v4111_v37 = vunpack.c.l.bf16 %v5793_v10  ;;  %v5824_v41 = vld [vmem:[#allocation2 + $0x58] sm:$0xf]  ;;  %v2217_v56 = vld [vmem:[#allocation2 + $0x1c] sm:$0xf] }
 0x178   : > { %v819_v21 = vsel %vm5548_vm8, %v817_v8, %v818_v12  ;;  %v820_v24 = vrot.slane %v818_v12, 4  ;;  %v821_v32 = vrot.slane %v4083_v20, 7  ;;  %v2602_v38 = vsel %vm957_vm2, %v5716_v30, 0  ;;  %v4615_v0 = vld [vmem:[#allocation10] ss:$0 sm:$0xff]  ;;  %v4604_v12 = vld [vmem:[#allocation2 + $0x54] sm:$0xff]   ;;  %p4801_p11 = pnand %p4800_p2, %p4794_p0 }
 0x179   : > { %870 = vst.msk [vmem:[#allocation2 + $0x64] sm:$0xf] %vm592_vm7, %v819_v21  ;;  %v823_v36 = vrot.slane %v4084_v25, 7  ;;  %v1979_v39 = vsel %vm5622_vm12, %v3926_v59, %v1978_v62  ;;  %v1982_v40 = vsel %vm5622_vm12, %v1980_v15, %v1981_v16  ;;  %v3933_v44 = vcombine.low %v1972_v6, %v1975_v27  ;;  %v2218_v7 = vld [vmem:[#allocation2 + $0x20] sm:$0x3] }
 0x17a   : > { %871 = vst.msk [vmem:[#allocation2 + $0x68] sm:$0x1] %vm496_vm0, %v820_v24  ;;  %v822_v42 = vrot.slane %v821_v32, 4  ;;  %v3927_v45 = vrot.slane %v1923_v28, 9  ;;  %v4112_v46 = vunpack.c.h.bf16 %v5793_v10  ;;  %v1987_v18 = vrot.slane %v1985_v31, 4 }
 0x17b   : > { %872 = vst.msk [vmem:[#allocation2 + $0x6c] sm:$0xe] %vm590_vm5, %v821_v32  ;;  %v825_v30 = vrot.slane %v823_v36, 4  ;;  %v1988_v2 = vrot.slane %v1925_v29, 5  ;;  %v3928_v47 = vrot.slane %v1926_v33, 9  ;;  %v3934_v51 = vcombine.low %v1979_v39, %v1982_v40 }
 0x17c   : > { %4290 = vmatmul.mubr.msk.bf16.gmra.mrb[20].mxu0 %vm932_vm9, %v3899_v63  ;;  %v824_v49 = vsel %vm5548_vm8, %v822_v42, %v823_v36  ;;  %v1994_v52 = vrot.slane %v1992_v35, 4  ;;  %v1995_v53 = vrot.slane %v1928_v34, 5  ;;  %v1999_v61 = vrot.slane %v5824_v41, 5  ;;  %v2216_v63 = vld [vmem:[#allocation2 + $0x18] sm:$0xc] }
 0x17d   : > { %4313 = vmatprep.mubr.msk.bf16.mxu0 %vm932_vm9, %v3932_v4  ;;  %873 = vst.msk [vmem:[#allocation2 + $0x70] sm:$0xf] %vm592_vm7, %v824_v49  ;;  %v606_v3 = vmul.f32 %v4615_v0, %v4111_v37  ;;  %v607_v22 = vmul.f32 %v4615_v0, %v4112_v46  ;;  %v4115_v14 = vunpack.c.l.bf16 %v5831_v43  ;;  %v1989_v4 = vsel %vm5622_vm12, %v1987_v18, %v1988_v2  ;;  %v1932_v59 = vld [vmem:[#allocation2 + $0x60] sm:$0xe]  ;;  %v5857_v17 = vld [vmem:[#allocation2 + $0x24] sm:$0xc] }
 0x17e   : > { %4296 = vmatmul.mubr.msk.bf16.vlgmr.msra.gmra.mrb[24].mxu1 %vm932_vm9, %v4600_v50  ;;  %874 = vst.msk [vmem:[#allocation2 + $0x74] sm:$0x1] %vm496_vm0, %v825_v30  ;;  %v1986_v50 = vsel %vm5622_vm12, %v3927_v45, %v1985_v31  ;;  %v2266_v8 = vrot.slane %v2217_v56, 6  ;;  %v1993_v9 = vsel %vm5622_vm12, %v3928_v47, %v1992_v35  ;;  %v1996_v10 = vsel %vm5622_vm12, %v1994_v52, %v1995_v53  ;;  %v5862_v24 = vld [vmem:[#allocation2 + $0x28] sm:$0xf] }
 0x17f   : > { %4330 = vmatpush3.bf16.msra.mxu1 %v2371_v11  ;;  %4299 = vmatprep.mubr.msk.bf16.mxu1 %vm932_vm9, %v4601_v5  ;;  %v3929_v5 = vrot.slane %v1929_v48, 9  ;;  %v2002_v11 = vrot.slane %v1931_v54, 5  ;;  %v2001_v13 = vrot.slane %v1999_v61, 4  ;;  %v3948_v16 = vrot.slane %v2216_v63, 10  ;;  %v5864_v25 = vld [vmem:[#allocation2 + $0x2c] sm:$0x3] }
 0x180   : > { %4411 = vmatprep.subr.msk.bf16.mxu1 %vm957_vm2, %v5804_v26  ;;  %v5842_v62 = vld [vmem:[#allocation2 + $0x64] sm:$0xf]  ;;  %v4116_v20 = vunpack.c.h.bf16 %v5831_v43  ;;  %v3935_v21 = vcombine.low %v1986_v50, %v1989_v4  ;;  %v4616_v6 = vld [vmem:[#allocation12] ss:$0 sm:$0xff]  ;;  %v621_v28 = vstv %s5789_s19  ;;  %v608_v29 = vmul.f32 %v4615_v0, %v4115_v14  ;;  %v2223_v41 = vld [vmem:[#allocation2 + $0x34] sm:$0xf] }
 0x181   : > { %v2006_v1 = vrot.slane %v5842_v62, 5  ;;  %v1934_v15 = vld [vmem:[#allocation2 + $0x68] sm:$0x1]  ;;  %v610_v27 = vadd.f32 %v4616_v6, %v606_v3  ;;  %v3936_v31 = vcombine.low %v1993_v9, %v1996_v10  ;;  %v4605_v32 = vld [vmem:[#allocation2 + $0x60] sm:$0xff]   ;;  %v3930_v33 = vrot.slane %v1932_v59, 9 }
 0x182   : > { %v2268_v34 = vrot.slane %v2266_v8, 4  ;;  %v2269_v35 = vrot.slane %v2218_v7, 6  ;;  %v2009_v37 = vrot.slane %v1934_v15, 5  ;;  %v2000_v39 = vsel %vm5622_vm12, %v3929_v5, %v1999_v61  ;;  %v2222_v53 = vld [vmem:[#allocation2 + $0x30] sm:$0xc] }
 0x183   : > { %v2008_v36 = vrot.slane %v2006_v1, 4  ;;  %v2003_v40 = vsel %vm5622_vm12, %v2001_v13, %v2002_v11  ;;  %vm5871_vm1 = vcmp.eq.s32.totalorder %v621_v28, 1  ;;  %v609_v43 = vmul.f32 %v4615_v0, %v4116_v20  ;;  %v2224_v62 = vld [vmem:[#allocation2 + $0x38] sm:$0x3]  ;;  %v2229_v20 = vld [vmem:[#allocation2 + $0x4c] sm:$0xf] }
 0x184   : > { %4314 = vmatmul.mubr.msk.bf16.vlgmr.msra.gmra.mrb[24].mxu0 %vm932_vm9, %v3933_v44  ;;  %v2267_v44 = vsel %vm5650_vm15, %v3948_v16, %v2266_v8  ;;  %v3949_v45 = vrot.slane %v5857_v17, 10  ;;  %v2273_v30 = vrot.slane %v5862_v24, 6  ;;  %v614_v46 = vmax.f32 %v610_v27, 0.0  ;;  %v4606_v50 = vld [vmem:[#allocation2 + $0x6c] sm:$0xff]  }
 0x185   : > { %4348 = vmatpush3.bf16.msra.mxu0 %v2602_v38  ;;  %4317 = vmatprep.mubr.msk.bf16.mxu0 %vm932_vm9, %v3934_v51  ;;  %v611_v38 = vadd.f32 %v4616_v6, %v607_v22  ;;  %v2270_v2 = vsel %vm5650_vm15, %v2268_v34, %v2269_v35  ;;  %v2276_v47 = vrot.slane %v5864_v25, 6  ;;  %v612_v48 = vadd.f32 %v4616_v6, %v608_v29  ;;  %v1937_v52 = vld [vmem:[#allocation2 + $0x74] sm:$0x1] }
 0x186   : > { %4300 = vmatmul.mubr.msk.bf16.gmra.mrb[28].mxu1 %vm932_vm9, %v4602_v19  ;;  %4412 = vmatprep.subr.msk.bf16.mxu0 %vm957_vm2, %v5838_v58  ;;  %v1936_v19 = vld [vmem:[#allocation2 + $0x70] sm:$0xf]  ;;  %v2007_v49 = vsel %vm5622_vm12, %v3930_v33, %v2006_v1  ;;  %v2010_v51 = vsel %vm5622_vm12, %v2008_v36, %v2009_v37  ;;  %v2280_v54 = vrot.slane %v2223_v41, 6  ;;  %v3937_v61 = vcombine.low %v2000_v39, %v2003_v40  ;;  %v2226_v1 = vld [vmem:[#allocation2 + $0x40] sm:$0xf] }
 0x187   : > { %4303 = vmatprep.mubr.msk.bf16.mxu1 %vm932_vm9, %v4603_v55  ;;  %v1935_v55 = vld [vmem:[#allocation2 + $0x6c] sm:$0xe]  ;;  %v2013_v18 = vrot.slane %v1936_v19, 5  ;;  %v615_v56 = vmax.f32 %v611_v38, 0.0  ;;  %v613_v63 = vadd.f32 %v4616_v6, %v609_v43  ;;  %v3956_v3 = vcombine.low %v2267_v44, %v2270_v2  ;;  %v2228_v38 = vld [vmem:[#allocation2 + $0x48] sm:$0xc] }
 0x188   : > { %v3931_v0 = vrot.slane %v1935_v55, 9  ;;  %v2275_v22 = vrot.slane %v2273_v30, 4  ;;  %v3938_v4 = vcombine.low %v2007_v49, %v2010_v51  ;;  %v2016_v7 = vrot.slane %v1937_v52, 5  ;;  %v2230_v39 = vld [vmem:[#allocation2 + $0x50] sm:$0x3] }
 0x189   : > { %v618_v14 = vpack.c.bf16 %v615_v56, %v614_v46  ;;  %v2015_v5 = vrot.slane %v2013_v18, 4  ;;  %v616_v8 = vmax.f32 %v612_v48, 0.0  ;;  %v3950_v9 = vrot.slane %v2222_v53, 10  ;;  %v4607_v44 = vld [vmem:[#allocation2 + $0x30] sm:$0xff]   ;;  %v2232_v2 = vld [vmem:[#allocation2 + $0x58] sm:$0xf] }
 0x18a   : > { %v2282_v10 = vrot.slane %v2280_v54, 4  ;;  %v2283_v11 = vrot.slane %v2224_v62, 6  ;;  %v617_v15 = vmax.f32 %v613_v63, 0.0  ;;  %v2014_v16 = vsel %vm5622_vm12, %v3931_v0, %v2013_v18  ;;  %v2235_v53 = vld [vmem:[#allocation2 + $0x64] sm:$0xf] }
 0x18b   : > { %v623_v59 = vsel %vm5871_vm1, 0, %v618_v14  ;;  %v2274_v17 = vsel %vm5650_vm15, %v3949_v45, %v2273_v30  ;;  %v2277_v27 = vsel %vm5650_vm15, %v2275_v22, %v2276_v47  ;;  %v2281_v28 = vsel %vm5650_vm15, %v3950_v9, %v2280_v54  ;;  %v2233_v0 = vld [vmem:[#allocation2 + $0x5c] sm:$0x3] }
 0x18c   : > { %4318 = vmatmul.mubr.msk.bf16.gmra.mrb[28].mxu0 %vm932_vm9, %v3935_v21  ;;  %v3825_v13 = vcombine.high %v623_v59, %v623_v59  ;;  %v2017_v21 = vsel %vm5622_vm12, %v2015_v5, %v2016_v7  ;;  %v619_v6 = vpack.c.bf16 %v617_v15, %v616_v8  ;;  %v2284_v29 = vsel %vm5650_vm15, %v2282_v10, %v2283_v11  ;;  %v2236_v5 = vld [vmem:[#allocation2 + $0x68] sm:$0x3]  ;;  %v4608_v7 = vld [vmem:[#allocation2 + $0x3c] sm:$0xff]  }
 0x18d   : > { %4321 = vmatprep.mubr.msk.bf16.mxu0 %vm932_vm9, %v3936_v31  ;;  %v2225_v31 = vld [vmem:[#allocation2 + $0x3c] sm:$0xc]  ;;  %v2287_v33 = vrot.slane %v2226_v1, 6  ;;  %v2294_v34 = vrot.slane %v2229_v20, 6  ;;  %v3939_v19 = vcombine.low %v2014_v16, %v2017_v21  ;;  %v3957_v43 = vcombine.low %v2274_v17, %v2277_v27  ;;  %v2238_v16 = vld [vmem:[#allocation2 + $0x70] sm:$0xf] }
 0x18e   : > { %4304 = vmatmul.mubr.msk.bf16.gmra.mrb[32].mxu1 %vm932_vm9, %v4604_v12  ;;  %v3824_v12 = vcombine.low %v623_v59, %v623_v59  ;;  %v637_v25 = vrot.slane %v3825_v13, 7  ;;  %v624_v37 = vsel %vm5871_vm1, 0, %v619_v6  ;;  %v3951_v45 = vrot.slane %v2225_v31, 10  ;;  %v4609_v59 = vld [vmem:[#allocation2 + $0x48] sm:$0xff]   ;;  %v2750_v17 = vld [vmem:[#allocation2 + $0x34] sm:$0xf] }
 0x18f   : > { %4307 = vmatprep.mubr.msk.bf16.mxu1 %vm932_vm9, %v4605_v32  ;;  %v2227_v32 = vld [vmem:[#allocation2 + $0x44] sm:$0x3]  ;;  %v3826_v40 = vcombine.low %v624_v37, %v624_v37  ;;  %v3827_v41 = vcombine.high %v624_v37, %v624_v37  ;;  %v3958_v55 = vcombine.low %v2281_v28, %v2284_v29  ;;  %v2289_v18 = vrot.slane %v2287_v33, 4  ;;  %v2237_v21 = vld [vmem:[#allocation2 + $0x6c] sm:$0xc] }
 0x190   : > { %v635_v24 = vrot.slane %v3824_v12, 7  ;;  %v639_v36 = vrot.slane %v637_v25, 4  ;;  %v2290_v30 = vrot.slane %v2227_v32, 6  ;;  %v2904_v48 = vsel %vm957_vm2, %v5804_v26, 0  ;;  %v2239_v6 = vld [vmem:[#allocation2 + $0x74] sm:$0x3] }
 0x191   : > { %v640_v42 = vrot.slane %v3826_v40, 7  ;;  %v642_v47 = vrot.slane %v3827_v41, 7  ;;  %v3952_v49 = vrot.slane %v2228_v38, 10  ;;  %v2296_v51 = vrot.slane %v2294_v34, 4  ;;  %v2749_v29 = vld [vmem:[#allocation2 + $0x30] sm:$0xe] }
 0x192   : > { %v636_v35 = vrot.slane %v635_v24, 4  ;;  %652 = vst.msk [vmem:[#allocation2 + $0x78] sm:$0xe] %vm590_vm5, %v635_v24  ;;  %v2297_v52 = vrot.slane %v2230_v39, 6  ;;  %v2301_v62 = vrot.slane %v2232_v2, 6  ;;  %v2288_v26 = vsel %vm5650_vm15, %v3951_v45, %v2287_v33  ;;  %v4610_v32 = vld [vmem:[#allocation2 + $0x54] sm:$0xff]  }
 0x193   : > { %654 = vst.msk [vmem:[#allocation2 + $0x80] sm:$0x1] %vm496_vm0, %v639_v36  ;;  %v641_v54 = vrot.slane %v640_v42, 4  ;;  %v644_v56 = vrot.slane %v642_v47, 4  ;;  %v2291_v63 = vsel %vm5650_vm15, %v2289_v18, %v2290_v30  ;;  %v2295_v14 = vsel %vm5650_vm15, %v3952_v49, %v2294_v34  ;;  %v2751_v31 = vld [vmem:[#allocation2 + $0x38] sm:$0x1] }
 0x194   : > { %4322 = vmatmul.mubr.msk.bf16.gmra.mrb[32].mxu0 %vm932_vm9, %v3937_v61  ;;  %v638_v46 = vsel %vm5548_vm8, %v636_v35, %v637_v25  ;;  %655 = vst.msk [vmem:[#allocation2 + $0x84] sm:$0xe] %vm590_vm5, %v640_v42  ;;  %v2231_v61 = vld [vmem:[#allocation2 + $0x54] sm:$0xc]  ;;  %v3206_v8 = vsel %vm957_vm2, %v5838_v58, 0  ;;  %v3959_v9 = vcombine.low %v2288_v26, %v2291_v63  ;;  %v2303_v57 = vrot.slane %v2301_v62, 4 }
 0x195   : > { %4325 = vmatprep.mubr.msk.bf16.mxu0 %vm932_vm9, %v3938_v4  ;;  %653 = vst.msk [vmem:[#allocation2 + $0x7c] sm:$0xf] %vm592_vm7, %v638_v46  ;;  %v643_v22 = vsel %vm5548_vm8, %v641_v54, %v642_v47  ;;  %v2234_v4 = vld [vmem:[#allocation2 + $0x60] sm:$0xc]  ;;  %v3953_v10 = vrot.slane %v2231_v61, 10  ;;  %v2304_v11 = vrot.slane %v2233_v0, 6 }
 0x196   : > { %4308 = vmatmul.mubr.msk.bf16.gmra.mrb[36].mxu1 %vm932_vm9, %v4606_v50  ;;  %657 = vst.msk [vmem:[#allocation2 + $0x8c] sm:$0x1] %vm496_vm0, %v644_v56  ;;  %v2298_v50 = vsel %vm5650_vm15, %v2296_v51, %v2297_v52  ;;  %v3954_v12 = vrot.slane %v2234_v4, 10  ;;  %v2311_v15 = vrot.slane %v2236_v5, 6  ;;  %v2315_v27 = vrot.slane %v2238_v16, 6  ;;  %v4611_v34 = vld [vmem:[#allocation2 + $0x60] sm:$0xff]  }
 0x197   : > { %4331 = vmatprep.mubr.msk.bf16.mxu1 %vm932_vm9, %v3956_v3  ;;  %v2308_v3 = vrot.slane %v2235_v53, 6  ;;  %656 = vst.msk [vmem:[#allocation2 + $0x88] sm:$0xf] %vm592_vm7, %v643_v22  ;;  %v3960_v1 = vcombine.low %v2295_v14, %v2298_v50  ;;  %v2302_v20 = vsel %vm5650_vm15, %v3953_v10, %v2301_v62  ;;  %v2305_v58 = vsel %vm5650_vm15, %v2303_v57, %v2304_v11  ;;  %v2756_v30 = vld [vmem:[#allocation2 + $0x4c] sm:$0xf] }
 0x198   : > { %v2799_v28 = vrot.slane %v2750_v17, 5  ;;  %v3961_v33 = vcombine.low %v2302_v20, %v2305_v58  ;;  %v3955_v36 = vrot.slane %v2237_v21, 10  ;;  %v2318_v37 = vrot.slane %v2239_v6, 6  ;;  %v4612_v18 = vld [vmem:[#allocation2 + $0x6c] sm:$0xff]   ;;  %v3053_v49 = vld [vmem:[#allocation2 + $0x38] sm:$0x3] }
 0x199   : > { %v2310_v13 = vrot.slane %v2308_v3, 4  ;;  %v2309_v24 = vsel %vm5650_vm15, %v3954_v12, %v2308_v3  ;;  %v2317_v38 = vrot.slane %v2315_v27, 4  ;;  %v3988_v39 = vrot.slane %v2749_v29, 9  ;;  %v2755_v53 = vld [vmem:[#allocation2 + $0x48] sm:$0xe] }
 0x19a   : > { %v2801_v40 = vrot.slane %v2799_v28, 4  ;;  %v2802_v41 = vrot.slane %v2751_v31, 5  ;;  %v2316_v46 = vsel %vm5650_vm15, %v3955_v36, %v2315_v27  ;;  %v2813_v54 = vrot.slane %v2756_v30, 5  ;;  %v3055_v56 = vld [vmem:[#allocation2 + $0x40] sm:$0xf] }
 0x19b   : > { %v2312_v25 = vsel %vm5650_vm15, %v2310_v13, %v2311_v15  ;;  %v2319_v2 = vsel %vm5650_vm15, %v2317_v38, %v2318_v37  ;;  %v2800_v42 = vsel %vm5622_vm12, %v3988_v39, %v2799_v28  ;;  %v2757_v26 = vld [vmem:[#allocation2 + $0x50] sm:$0x1]  ;;  %v2759_v63 = vld [vmem:[#allocation2 + $0x58] sm:$0xf]  ;;  %v3054_v50 = vld [vmem:[#allocation2 + $0x3c] sm:$0xc] }
 0x19c   : > { %4326 = vmatmul.mubr.msk.bf16.gmra.mrb[36].mxu0 %vm932_vm9, %v3939_v19  ;;  %v3962_v35 = vcombine.low %v2309_v24, %v2312_v25  ;;  %v2753_v19 = vld [vmem:[#allocation2 + $0x40] sm:$0xf]  ;;  %v2803_v47 = vsel %vm5622_vm12, %v2801_v40, %v2802_v41  ;;  %v3963_v0 = vcombine.low %v2316_v46, %v2319_v2  ;;  %v4613_v3 = vld [vmem:[#allocation2 + $0x78] sm:$0xff]   ;;  %v3058_v4 = vld [vmem:[#allocation2 + $0x4c] sm:$0xf]  ;;  %v3108_v10 = vrot.slane %v3055_v56, 6 }
 0x19d   : > { %4349 = vmatprep.mubr.msk.bf16.mxu0 %vm932_vm9, %v4607_v44  ;;  %v2752_v44 = vld [vmem:[#allocation2 + $0x3c] sm:$0xe]  ;;  %v2806_v45 = vrot.slane %v2753_v19, 5  ;;  %v3996_v22 = vcombine.low %v2800_v42, %v2803_v47  ;;  %v2815_v57 = vrot.slane %v2813_v54, 4  ;;  %v2816_v11 = vrot.slane %v2757_v26, 5 }
 0x19e   : > { %4332 = vmatmul.mubr.msk.bf16.vlgmr.msra.gmra.mrb[40].mxu1 %vm932_vm9, %v3957_v43  ;;  %v3052_v43 = vld [vmem:[#allocation2 + $0x34] sm:$0xf]  ;;  %v3989_v52 = vrot.slane %v2752_v44, 9  ;;  %v2760_v13 = vld [vmem:[#allocation2 + $0x5c] sm:$0x1]  ;;  %v3115_v15 = vrot.slane %v3058_v4, 6 }
 0x19f   : > { %4366 = vmatpush3.bf16.msra.mxu1 %v2904_v48  ;;  %4335 = vmatprep.mubr.msk.bf16.mxu1 %vm932_vm9, %v3958_v55  ;;  %v2754_v55 = vld [vmem:[#allocation2 + $0x44] sm:$0x1]  ;;  %v3051_v48 = vld [vmem:[#allocation2 + $0x30] sm:$0xc]  ;;  %v3101_v51 = vrot.slane %v3052_v43, 6  ;;  %v2808_v61 = vrot.slane %v2806_v45, 4  ;;  %v2817_v31 = vsel %vm5622_vm12, %v2815_v57, %v2816_v11 }
 0x1a0   : > { %v2809_v62 = vrot.slane %v2754_v55, 5  ;;  %v4012_v14 = vrot.slane %v3051_v48, 10  ;;  %v2807_v12 = vsel %vm5622_vm12, %v3989_v52, %v2806_v45  ;;  %v2762_v16 = vld [vmem:[#allocation2 + $0x64] sm:$0xf]  ;;  %v4013_v58 = vrot.slane %v3054_v50, 10 }
 0x1a1   : > { %v3103_v5 = vrot.slane %v3101_v51, 4  ;;  %v3057_v24 = vld [vmem:[#allocation2 + $0x48] sm:$0xc]  ;;  %v3059_v25 = vld [vmem:[#allocation2 + $0x50] sm:$0x3]  ;;  %v3110_v28 = vrot.slane %v3108_v10, 4 }
 0x1a2   : > { %v2810_v17 = vsel %vm5622_vm12, %v2808_v61, %v2809_v62  ;;  %v3102_v20 = vsel %vm5650_vm15, %v4012_v14, %v3101_v51  ;;  %v4614_v36 = vld [vmem:[#allocation2 + $0x84] sm:$0xff]   ;;  %v4014_v37 = vrot.slane %v3057_v24, 10  ;;  %v3117_v19 = vrot.slane %v3115_v15, 4  ;;  %v3061_v43 = vld [vmem:[#allocation2 + $0x58] sm:$0xf] }
 0x1a3   : > { %v3118_v38 = vrot.slane %v3059_v25, 6  ;;  %v2763_v39 = vld [vmem:[#allocation2 + $0x68] sm:$0x1]  ;;  %v3997_v40 = vcombine.low %v2807_v12, %v2810_v17  ;;  %v3109_v45 = vsel %vm5650_vm15, %v4013_v58, %v3108_v10  ;;  %v2765_v55 = vld [vmem:[#allocation2 + $0x70] sm:$0xf]  ;;  %v3122_v56 = vrot.slane %v3061_v43, 6 }
 0x1a4   : > { %4350 = vmatmul.mubr.msk.bf16.vlgmr.msra.gmra.mrb[40].mxu0 %vm932_vm9, %v4608_v7  ;;  %v3104_v7 = vrot.slane %v3053_v49, 6  ;;  %v2830_v48 = vrot.slane %v2763_v39, 5  ;;  %v2768_v49 = vld [vmem:[#allocation2 + $0x7c] sm:$0xf]  ;;  %v3116_v51 = vsel %vm5650_vm15, %v4014_v37, %v3115_v15  ;;  %v2764_v61 = vld [vmem:[#allocation2 + $0x6c] sm:$0xe] }
 0x1a5   : > { %4384 = vmatpush3.bf16.msra.mxu0 %v3206_v8  ;;  %4353 = vmatprep.mubr.msk.bf16.mxu0 %vm932_vm9, %v4609_v59  ;;  %v3990_v8 = vrot.slane %v2755_v53, 9  ;;  %v2758_v59 = vld [vmem:[#allocation2 + $0x54] sm:$0xe]  ;;  %v3119_v52 = vsel %vm5650_vm15, %v3117_v19, %v3118_v38  ;;  %v2766_v62 = vld [vmem:[#allocation2 + $0x74] sm:$0x1]  ;;  %v2834_v26 = vrot.slane %v2765_v55, 5 }
 0x1a6   : > { %4336 = vmatmul.mubr.msk.bf16.gmra.mrb[44].mxu1 %vm932_vm9, %v3959_v9  ;;  %v3056_v9 = vld [vmem:[#allocation2 + $0x44] sm:$0x3]  ;;  %v3105_v6 = vsel %vm5650_vm15, %v3103_v5, %v3104_v7  ;;  %v3991_v29 = vrot.slane %v2758_v59, 9  ;;  %v3060_v53 = vld [vmem:[#allocation2 + $0x54] sm:$0xc]  ;;  %v2841_v50 = vrot.slane %v2768_v49, 5  ;;  %v4022_v4 = vcombine.low %v3116_v51, %v3119_v52 }
 0x1a7   : > { %4339 = vmatprep.mubr.msk.bf16.mxu1 %vm932_vm9, %v3960_v1  ;;  %v2820_v1 = vrot.slane %v2759_v63, 5  ;;  %v3111_v21 = vrot.slane %v3056_v9, 6  ;;  %v2814_v27 = vsel %vm5622_vm12, %v3990_v8, %v2813_v54  ;;  %v4020_v41 = vcombine.low %v3102_v20, %v3105_v6  ;;  %v3062_v54 = vld [vmem:[#allocation2 + $0x5c] sm:$0x3]  ;;  %v3065_v14 = vld [vmem:[#allocation2 + $0x68] sm:$0x3] }
 0x1a8   : > { %v3998_v44 = vcombine.low %v2814_v27, %v2817_v31  ;;  %v4015_v8 = vrot.slane %v3060_v53, 10  ;;  %v2767_v9 = vld [vmem:[#allocation2 + $0x78] sm:$0xe]  ;;  %v2769_v10 = vld [vmem:[#allocation2 + $0x80] sm:$0x1]  ;;  %v3124_v57 = vrot.slane %v3122_v56, 4 }
 0x1a9   : > { %v3112_v30 = vsel %vm5650_vm15, %v3110_v28, %v3111_v21  ;;  %v2821_v46 = vsel %vm5622_vm12, %v3991_v29, %v2820_v1  ;;  %v3125_v11 = vrot.slane %v3062_v54, 6  ;;  %v3993_v59 = vrot.slane %v2764_v61, 9  ;;  %v3067_v24 = vld [vmem:[#allocation2 + $0x70] sm:$0xf]  ;;  %v2771_v25 = vld [vmem:[#allocation2 + $0x88] sm:$0xf] }
 0x1aa   : > { %v2836_v12 = vrot.slane %v2834_v26, 4  ;;  %v3994_v20 = vrot.slane %v2767_v9, 9  ;;  %v2843_v58 = vrot.slane %v2841_v50, 4  ;;  %v2844_v21 = vrot.slane %v2769_v10, 5  ;;  %v3070_v6 = vld [vmem:[#allocation2 + $0x7c] sm:$0xf] }
 0x1ab   : > { %v3123_v27 = vsel %vm5650_vm15, %v4015_v8, %v3122_v56  ;;  %v3126_v28 = vsel %vm5650_vm15, %v3124_v57, %v3125_v11  ;;  %v2835_v29 = vsel %vm5622_vm12, %v3993_v59, %v2834_v26  ;;  %v2770_v38 = vld [vmem:[#allocation2 + $0x84] sm:$0xe]  ;;  %v2772_v39 = vld [vmem:[#allocation2 + $0x8c] sm:$0x1]  ;;  %v3073_v54 = vld [vmem:[#allocation2 + $0x88] sm:$0xf] }
 0x1ac   : > { %4354 = vmatmul.mubr.msk.bf16.gmra.mrb[44].mxu0 %vm932_vm9, %v4610_v32  ;;  %v2822_v32 = vrot.slane %v2820_v1, 4  ;;  %v2837_v1 = vrot.slane %v2766_v62, 5  ;;  %v2842_v37 = vsel %vm5622_vm12, %v3994_v20, %v2841_v50  ;;  %v2845_v19 = vsel %vm5622_vm12, %v2843_v58, %v2844_v21  ;;  %v3072_v62 = vld [vmem:[#allocation2 + $0x84] sm:$0xc] }
 0x1ad   : > { %4357 = vmatprep.mubr.msk.bf16.mxu0 %vm932_vm9, %v4611_v34  ;;  %v2761_v34 = vld [vmem:[#allocation2 + $0x60] sm:$0xe]  ;;  %v4023_v43 = vcombine.low %v3123_v27, %v3126_v28  ;;  %v3150_v26 = vrot.slane %v3073_v54, 6 }
 0x1ae   : > { %4340 = vmatmul.mubr.msk.bf16.gmra.mrb[48].mxu1 %vm932_vm9, %v3961_v33  ;;  %v2823_v33 = vrot.slane %v2760_v13, 5  ;;  %v3992_v42 = vrot.slane %v2761_v34, 9  ;;  %v2838_v31 = vsel %vm5622_vm12, %v2836_v12, %v2837_v1  ;;  %v3066_v34 = vld [vmem:[#allocation2 + $0x6c] sm:$0xc] }
 0x1af   : > { %4343 = vmatprep.mubr.msk.bf16.mxu1 %vm932_vm9, %v3962_v35  ;;  %v2827_v35 = vrot.slane %v2762_v16, 5  ;;  %v3132_v16 = vrot.slane %v3065_v14, 6  ;;  %v4017_v55 = vrot.slane %v3066_v34, 10  ;;  %v3074_v14 = vld [vmem:[#allocation2 + $0x8c] sm:$0x3]  ;;  %v3152_v8 = vrot.slane %v3150_v26, 4 }
 0x1b0   : > { %v2824_v2 = vsel %vm5622_vm12, %v2822_v32, %v2823_v33  ;;  %v3153_v9 = vrot.slane %v3074_v14, 6 }
 0x1b1   : > { %v2829_v47 = vrot.slane %v2827_v35, 4  ;;  %v2828_v5 = vsel %vm5622_vm12, %v3992_v42, %v2827_v35  ;;  %v3068_v35 = vld [vmem:[#allocation2 + $0x74] sm:$0x3] }
 0x1b2   : > { %v3154_v10 = vsel %vm5650_vm15, %v3152_v8, %v3153_v9 }
 0x1b3   : > { %v2831_v7 = vsel %vm5622_vm12, %v2829_v47, %v2830_v48  ;;  %v3995_v47 = vrot.slane %v2770_v38, 9  ;;  %v2851_v48 = vrot.slane %v2772_v39, 5 }
 0x1b4   : > { %4358 = vmatmul.mubr.msk.bf16.gmra.mrb[48].mxu0 %vm932_vm9, %v4612_v18  ;;  %v3064_v18 = vld [vmem:[#allocation2 + $0x64] sm:$0xf]  ;;  %v4000_v17 = vcombine.low %v2828_v5, %v2831_v7 }
 0x1b5   : > { %4361 = vmatprep.mubr.msk.bf16.mxu0 %vm932_vm9, %v4613_v3  ;;  %v3129_v63 = vrot.slane %v3064_v18, 6  ;;  %v3999_v3 = vcombine.low %v2821_v46, %v2824_v2  ;;  %v3139_v18 = vrot.slane %v3068_v35, 6  ;;  %v4002_v2 = vcombine.low %v2842_v37, %v2845_v19 }
 0x1b6   : > { %4344 = vmatmul.mubr.msk.bf16.gmra.mrb[52].mxu1 %vm932_vm9, %v3963_v0  ;;  %v4021_v0 = vcombine.low %v3109_v45, %v3112_v30  ;;  %v3071_v45 = vld [vmem:[#allocation2 + $0x80] sm:$0x3]  ;;  %v4001_v30 = vcombine.low %v2835_v29, %v2838_v31 }
 0x1b7   : > { %4367 = vmatprep.mubr.msk.bf16.mxu1 %vm932_vm9, %v3996_v22  ;;  %v3063_v22 = vld [vmem:[#allocation2 + $0x60] sm:$0xc]  ;;  %v3131_v15 = vrot.slane %v3129_v63, 4  ;;  %v3146_v53 = vrot.slane %v3071_v45, 6 }
 0x1b8   : > { %v4016_v13 = vrot.slane %v3063_v22, 10 }
 0x1b9   : > { %v3133_v33 = vsel %vm5650_vm15, %v3131_v15, %v3132_v16 }
 0x1ba   : > { %v3130_v32 = vsel %vm5650_vm15, %v4016_v13, %v3129_v63 }
 0x1bb   : > { %v4024_v46 = vcombine.low %v3130_v32, %v3133_v33 }
 0x1bc   : > { %4362 = vmatmul.mubr.msk.bf16.gmra.mrb[52].mxu0 %vm932_vm9, %v4614_v36  ;;  %v3136_v36 = vrot.slane %v3067_v24, 6 }
 0x1bd   : > { %4385 = vmatprep.mubr.msk.bf16.mxu0 %vm932_vm9, %v4020_v41  ;;  %v3143_v41 = vrot.slane %v3070_v6, 6 }
 0x1be   : > { %4368 = vmatmul.mubr.msk.bf16.vlgmr.msra.gmra.mrb[56].mxu1 %vm932_vm9, %v3997_v40  ;;  %v2848_v40 = vrot.slane %v2771_v25, 5  ;;  %v3138_v42 = vrot.slane %v3136_v36, 4  ;;  %v3137_v56 = vsel %vm5650_vm15, %v4017_v55, %v3136_v36 }
 0x1bf   : > { %4371 = vmatprep.mubr.msk.bf16.mxu1 %vm932_vm9, %v3998_v44  ;;  %v3069_v44 = vld [vmem:[#allocation2 + $0x78] sm:$0xc]  ;;  %v3145_v52 = vrot.slane %v3143_v41, 4 }
 0x1c0   : > { %v2850_v49 = vrot.slane %v2848_v40, 4  ;;  %v4018_v51 = vrot.slane %v3069_v44, 10  ;;  %v3140_v61 = vsel %vm5650_vm15, %v3138_v42, %v3139_v18  ;;  %v2849_v63 = vsel %vm5622_vm12, %v3995_v47, %v2848_v40 }
 0x1c1   : > { %v3147_v22 = vsel %vm5650_vm15, %v3145_v52, %v3146_v53  ;;  %v4025_v50 = vcombine.low %v3137_v56, %v3140_v61 }
 0x1c4   : > { %4386 = vmatmul.mubr.msk.bf16.vlgmr.msra.gmra.mrb[56].mxu0 %vm932_vm9, %v4021_v0  ;;  %v2852_v0 = vsel %vm5622_vm12, %v2850_v49, %v2851_v48 }
 0x1c5   : > { %4389 = vmatprep.mubr.msk.bf16.mxu0 %vm932_vm9, %v4022_v4  ;;  %v4019_v4 = vrot.slane %v3072_v62, 10  ;;  %v4003_v5 = vcombine.low %v2849_v63, %v2852_v0 }
 0x1c6   : > { %4372 = vmatmul.mubr.msk.bf16.gmra.mrb[60].mxu1 %vm932_vm9, %v3999_v3  ;;  %v3144_v3 = vsel %vm5650_vm15, %v4018_v51, %v3143_v41 }
 0x1c7   : > { %4375 = vmatprep.mubr.msk.bf16.mxu1 %vm932_vm9, %v4000_v17  ;;  %v4026_v7 = vcombine.low %v3144_v3, %v3147_v22  ;;  %v3151_v23 = vsel %vm5650_vm15, %v4019_v4, %v3150_v26 }
 0x1c8   : > { %v4027_v57 = vcombine.low %v3151_v23, %v3154_v10 }
 0x1cc   : > { %4390 = vmatmul.mubr.msk.bf16.gmra.mrb[60].mxu0 %vm932_vm9, %v4023_v43 }
 0x1cd   : > { %4393 = vmatprep.mubr.msk.bf16.mxu0 %vm932_vm9, %v4024_v46 }
 0x1ce   : > { %4376 = vmatmul.mubr.msk.bf16.gmra.mrb[64].mxu1 %vm932_vm9, %v4001_v30 }
 0x1cf   : > { %4379 = vmatprep.mubr.msk.bf16.mxu1 %vm932_vm9, %v4002_v2 }
 0x1d4   : > { %4394 = vmatmul.mubr.msk.bf16.gmra.mrb[64].mxu0 %vm932_vm9, %v4025_v50 }
 0x1d5   : > { %4397 = vmatprep.mubr.msk.bf16.mxu0 %vm932_vm9, %v4026_v7 }
 0x1d6   : > { %4380 = vmatmul.mubr.msk.bf16.gmra.mrb[68].mxu1 %vm932_vm9, %v4003_v5 }
 0x1dc   : > { %4398 = vmatmul.mubr.msk.bf16.gmra.mrb[68].mxu0 %vm932_vm9, %v4027_v57 }
 0x218   : > { %v4251_v11 = vpop.f32.mrb[0].mxu1 }
 0x219   : > { %1068 = vst.msk [vmem:[#allocation3 + $0x50] sm:$0xff] %vm932_vm9, %v4251_v11  ;;  %v1027_v59 = vpop.f32.mrb[1].mxu1 }
 0x21a   : > { %1066 = vst.msk [vmem:[#allocation3 + $0x40] sm:$0xff] %vm932_vm9, %v1027_v59  ;;  %v4252_v1 = vpop.f32.mrb[2].mxu1 }
 0x21b   : > { %1069 = vst.msk [vmem:[#allocation3 + $0x58] sm:$0xff] %vm932_vm9, %v4252_v1  ;;  %v1030_v12 = vpop.f32.mrb[3].mxu1 }
 0x21c   : > { %1067 = vst.msk [vmem:[#allocation3 + $0x48] sm:$0xff] %vm932_vm9, %v1030_v12 }
 0x21e   : > { %v4243_v13 = vpop.f32.mrb[0].mxu0 }
 0x21f   : > { %1060 = vst.msk [vmem:[#allocation3 + $0x10] sm:$0xff] %vm932_vm9, %v4243_v13  ;;  %v995_v60 = vpop.f32.mrb[1].mxu0 }
 0x220   : > { %1058 = vst.msk [vmem:[#allocation3] sm:$0xff] %vm932_vm9, %v995_v60  ;;  %v4244_v15 = vpop.f32.mrb[2].mxu0  ;;  %v1341_v14 = vld [vmem:[#allocation3 + $0x50] sm:$0xff] }
 0x221   : > { %1061 = vst.msk [vmem:[#allocation3 + $0x18] sm:$0xff] %vm932_vm9, %v4244_v15  ;;  %v998_v16 = vpop.f32.mrb[3].mxu0  ;;  %v1339_v7 = vld [vmem:[#allocation3 + $0x40] sm:$0xff] }
 0x222   : > { %1059 = vst.msk [vmem:[#allocation3 + $0x8] sm:$0xff] %vm932_vm9, %v998_v16  ;;  %v1342_v57 = vld [vmem:[#allocation3 + $0x58] sm:$0xff] }
 0x223   : > { %v1340_v60 = vld [vmem:[#allocation3 + $0x48] sm:$0xff] }
 0x226   : > { %v1333_v24 = vld [vmem:[#allocation3 + $0x10] sm:$0xff] }
 0x227   : > { %v1331_v6 = vld [vmem:[#allocation3] sm:$0xff] }
 0x228   : > { %v1334_v29 = vld [vmem:[#allocation3 + $0x18] sm:$0xff] }
 0x229   : > { %v4255_v17 = vpop.f32.mrb[4].mxu1  ;;  %v1332_v34 = vld [vmem:[#allocation3 + $0x8] sm:$0xff] }
 0x22a   : > { %1072 = vst.msk [vmem:[#allocation3 + $0x70] sm:$0xff] %vm932_vm9, %v4255_v17  ;;  %v1043_v20 = vpop.f32.mrb[5].mxu1 }
 0x22b   : > { %1070 = vst.msk [vmem:[#allocation3 + $0x60] sm:$0xff] %vm932_vm9, %v1043_v20  ;;  %v4256_v58 = vpop.f32.mrb[6].mxu1 }
 0x22c   : > { %1073 = vst.msk [vmem:[#allocation3 + $0x78] sm:$0xff] %vm932_vm9, %v4256_v58  ;;  %v1046_v21 = vpop.f32.mrb[7].mxu1 }
 0x22d   : > { %1071 = vst.msk [vmem:[#allocation3 + $0x68] sm:$0xff] %vm932_vm9, %v1046_v21 }
 0x22f   : > { %v4247_v25 = vpop.f32.mrb[4].mxu0 }
 0x230   : > { %1064 = vst.msk [vmem:[#allocation3 + $0x30] sm:$0xff] %vm932_vm9, %v4247_v25  ;;  %v1011_v27 = vpop.f32.mrb[5].mxu0 }
 0x231   : > { %v4261_v28 = vpop.f32.mrb[8].mxu1  ;;  %1062 = vst.msk [vmem:[#allocation3 + $0x20] sm:$0xff] %vm932_vm9, %v1011_v27  ;;  %v4248_v32 = vpop.f32.mrb[6].mxu0 }
 0x232   : > { %v1349_v31 = vadd.f32 %v4261_v28, %v1333_v24  ;;  %v1268_v33 = vpop.f32.mrb[9].mxu1  ;;  %1065 = vst.msk [vmem:[#allocation3 + $0x38] sm:$0xff] %vm932_vm9, %v4248_v32  ;;  %v1014_v36 = vpop.f32.mrb[7].mxu0 }
 0x233   : > { %v1347_v35 = vadd.f32 %v1331_v6, %v1268_v33  ;;  %v4262_v37 = vpop.f32.mrb[10].mxu1  ;;  %1063 = vst.msk [vmem:[#allocation3 + $0x28] sm:$0xff] %vm932_vm9, %v1014_v36  ;;  %v1345_v6 = vld [vmem:[#allocation3 + $0x70] sm:$0xff]  ;;  %v1346_v36 = vld [vmem:[#allocation3 + $0x78] sm:$0xff] }
 0x234   : > { %1365 = vst.msk [vmem:[#allocation3 + $0x10] sm:$0xff] %vm932_vm9, %v1349_v31  ;;  %v1350_v19 = vadd.f32 %v4262_v37, %v1334_v29  ;;  %v1271_v38 = vpop.f32.mrb[11].mxu1  ;;  %v1343_v31 = vld [vmem:[#allocation3 + $0x60] sm:$0xff] }
 0x235   : > { %1363 = vst.msk [vmem:[#allocation3] sm:$0xff] %vm932_vm9, %v1347_v35  ;;  %v1348_v39 = vadd.f32 %v1332_v34, %v1271_v38 }
 0x236   : > { %1366 = vst.msk [vmem:[#allocation3 + $0x18] sm:$0xff] %vm932_vm9, %v1350_v19 }
 0x237   : > { %1364 = vst.msk [vmem:[#allocation3 + $0x8] sm:$0xff] %vm932_vm9, %v1348_v39  ;;  %v4279_v40 = vpop.f32.mrb[8].mxu0  ;;  %v1337_v41 = vld [vmem:[#allocation3 + $0x30] sm:$0xff] }
 0x238   : > { %v1573_v44 = vpop.f32.mrb[9].mxu0  ;;  %v1335_v45 = vld [vmem:[#allocation3 + $0x20] sm:$0xff] }
 0x239   : > { %v4265_v43 = vpop.f32.mrb[12].mxu1  ;;  %v4280_v55 = vpop.f32.mrb[10].mxu0  ;;  %v1338_v18 = vld [vmem:[#allocation3 + $0x38] sm:$0xff] }
 0x23a   : > { %v1353_v30 = vadd.f32 %v4265_v43, %v1337_v41  ;;  %v1284_v46 = vpop.f32.mrb[13].mxu1  ;;  %v1576_v48 = vpop.f32.mrb[11].mxu0  ;;  %v1336_v49 = vld [vmem:[#allocation3 + $0x28] sm:$0xff] }
 0x23b   : > { %v1638_v2 = vld [vmem:[#allocation3 + $0x10] sm:$0xff]  ;;  %v1351_v42 = vadd.f32 %v1335_v45, %v1284_v46  ;;  %v4266_v47 = vpop.f32.mrb[14].mxu1  ;;  %v1344_v41 = vld [vmem:[#allocation3 + $0x68] sm:$0xff] }
 0x23c   : > { %v1654_v51 = vadd.f32 %v4279_v40, %v1638_v2  ;;  %1369 = vst.msk [vmem:[#allocation3 + $0x30] sm:$0xff] %vm932_vm9, %v1353_v30  ;;  %v1636_v52 = vld [vmem:[#allocation3] sm:$0xff]  ;;  %v1354_v53 = vadd.f32 %v4266_v47, %v1338_v18  ;;  %v1287_v54 = vpop.f32.mrb[15].mxu1 }
 0x23d   : > { %v1652_v56 = vadd.f32 %v1636_v52, %v1573_v44  ;;  %1367 = vst.msk [vmem:[#allocation3 + $0x20] sm:$0xff] %vm932_vm9, %v1351_v42  ;;  %v1639_v61 = vld [vmem:[#allocation3 + $0x18] sm:$0xff]  ;;  %v1352_v62 = vadd.f32 %v1336_v49, %v1287_v54 }
 0x23e   : > { %1670 = vst.msk [vmem:[#allocation3 + $0x10] sm:$0xff] %vm932_vm9, %v1654_v51  ;;  %v1655_v26 = vadd.f32 %v4280_v55, %v1639_v61  ;;  %1370 = vst.msk [vmem:[#allocation3 + $0x38] sm:$0xff] %vm932_vm9, %v1354_v53  ;;  %v1637_v63 = vld [vmem:[#allocation3 + $0x8] sm:$0xff] }
 0x23f   : > { %1668 = vst.msk [vmem:[#allocation3] sm:$0xff] %vm932_vm9, %v1652_v56  ;;  %v1653_v0 = vadd.f32 %v1637_v63, %v1576_v48  ;;  %1368 = vst.msk [vmem:[#allocation3 + $0x28] sm:$0xff] %vm932_vm9, %v1352_v62  ;;  %v4283_v3 = vpop.f32.mrb[12].mxu0 }
 0x240   : > { %1671 = vst.msk [vmem:[#allocation3 + $0x18] sm:$0xff] %vm932_vm9, %v1655_v26  ;;  %v1589_v50 = vpop.f32.mrb[13].mxu0 }
 0x241   : > { %1669 = vst.msk [vmem:[#allocation3 + $0x8] sm:$0xff] %vm932_vm9, %v1653_v0  ;;  %v4269_v22 = vpop.f32.mrb[16].mxu1  ;;  %v4284_v8 = vpop.f32.mrb[14].mxu0 }
 0x242   : > { %v1357_v4 = vadd.f32 %v4269_v22, %v1341_v14  ;;  %v1300_v5 = vpop.f32.mrb[17].mxu1  ;;  %v1592_v11 = vpop.f32.mrb[15].mxu0 }
 0x243   : > { %v1642_v9 = vld [vmem:[#allocation3 + $0x30] sm:$0xff]  ;;  %v1355_v23 = vadd.f32 %v1339_v7, %v1300_v5  ;;  %v4270_v10 = vpop.f32.mrb[18].mxu1 }
 0x244   : > { %v1658_v59 = vadd.f32 %v4283_v3, %v1642_v9  ;;  %1373 = vst.msk [vmem:[#allocation3 + $0x50] sm:$0xff] %vm932_vm9, %v1357_v4  ;;  %v1640_v1 = vld [vmem:[#allocation3 + $0x20] sm:$0xff]  ;;  %v1358_v12 = vadd.f32 %v4270_v10, %v1342_v57  ;;  %v1303_v13 = vpop.f32.mrb[19].mxu1 }
 0x245   : > { %v1656_v15 = vadd.f32 %v1640_v1, %v1589_v50  ;;  %1371 = vst.msk [vmem:[#allocation3 + $0x40] sm:$0xff] %vm932_vm9, %v1355_v23  ;;  %v1643_v16 = vld [vmem:[#allocation3 + $0x38] sm:$0xff]  ;;  %v1356_v17 = vadd.f32 %v1340_v60, %v1303_v13  ;;  %v1868_v47 = vld [vmem:[#allocation3 + $0x10] sm:$0xff] }
 0x246   : > { %1674 = vst.msk [vmem:[#allocation3 + $0x30] sm:$0xff] %vm932_vm9, %v1658_v59  ;;  %v1659_v20 = vadd.f32 %v4284_v8, %v1643_v16  ;;  %1374 = vst.msk [vmem:[#allocation3 + $0x58] sm:$0xff] %vm932_vm9, %v1358_v12  ;;  %v1641_v58 = vld [vmem:[#allocation3 + $0x28] sm:$0xff]  ;;  %v1866_v52 = vld [vmem:[#allocation3] sm:$0xff] }
 0x247   : > { %1672 = vst.msk [vmem:[#allocation3 + $0x20] sm:$0xff] %vm932_vm9, %v1656_v15  ;;  %v1657_v21 = vadd.f32 %v1641_v58, %v1592_v11  ;;  %1372 = vst.msk [vmem:[#allocation3 + $0x48] sm:$0xff] %vm932_vm9, %v1356_v17  ;;  %v4287_v24 = vpop.f32.mrb[16].mxu0  ;;  %v1869_v62 = vld [vmem:[#allocation3 + $0x18] sm:$0xff] }
 0x248   : > { %1675 = vst.msk [vmem:[#allocation3 + $0x38] sm:$0xff] %vm932_vm9, %v1659_v20  ;;  %v1605_v27 = vpop.f32.mrb[17].mxu0  ;;  %v1867_v22 = vld [vmem:[#allocation3 + $0x8] sm:$0xff] }
 0x249   : > { %1673 = vst.msk [vmem:[#allocation3 + $0x28] sm:$0xff] %vm932_vm9, %v1657_v21  ;;  %v4273_v25 = vpop.f32.mrb[20].mxu1  ;;  %v4288_v32 = vpop.f32.mrb[18].mxu0 }
 0x24a   : > { %v1361_v28 = vadd.f32 %v4273_v25, %v1345_v6  ;;  %v1316_v29 = vpop.f32.mrb[21].mxu1  ;;  %v1608_v37 = vpop.f32.mrb[19].mxu0 }
 0x24b   : > { %v1646_v33 = vld [vmem:[#allocation3 + $0x50] sm:$0xff]  ;;  %v1359_v34 = vadd.f32 %v1343_v31, %v1316_v29  ;;  %v4274_v35 = vpop.f32.mrb[22].mxu1 }
 0x24c   : > { %v1662_v19 = vadd.f32 %v4287_v24, %v1646_v33  ;;  %1377 = vst.msk [vmem:[#allocation3 + $0x70] sm:$0xff] %vm932_vm9, %v1361_v28  ;;  %v1644_v38 = vld [vmem:[#allocation3 + $0x40] sm:$0xff]  ;;  %v1362_v39 = vadd.f32 %v4274_v35, %v1346_v36  ;;  %v1319_v40 = vpop.f32.mrb[23].mxu1 }
 0x24d   : > { %v1660_v43 = vadd.f32 %v1644_v38, %v1605_v27  ;;  %1375 = vst.msk [vmem:[#allocation3 + $0x60] sm:$0xff] %vm932_vm9, %v1359_v34  ;;  %v1647_v44 = vld [vmem:[#allocation3 + $0x58] sm:$0xff]  ;;  %v1360_v45 = vadd.f32 %v1344_v41, %v1319_v40  ;;  %v1872_v10 = vld [vmem:[#allocation3 + $0x30] sm:$0xff] }
 0x24e   : > { %1678 = vst.msk [vmem:[#allocation3 + $0x50] sm:$0xff] %vm932_vm9, %v1662_v19  ;;  %v1663_v30 = vadd.f32 %v4288_v32, %v1647_v44  ;;  %1378 = vst.msk [vmem:[#allocation3 + $0x78] sm:$0xff] %vm932_vm9, %v1362_v39  ;;  %v1645_v46 = vld [vmem:[#allocation3 + $0x48] sm:$0xff]  ;;  %v1870_v1 = vld [vmem:[#allocation3 + $0x20] sm:$0xff] }
 0x24f   : > { %1676 = vst.msk [vmem:[#allocation3 + $0x40] sm:$0xff] %vm932_vm9, %v1660_v43  ;;  %v1661_v55 = vadd.f32 %v1645_v46, %v1608_v37  ;;  %1376 = vst.msk [vmem:[#allocation3 + $0x68] sm:$0xff] %vm932_vm9, %v1360_v45  ;;  %v4291_v18 = vpop.f32.mrb[20].mxu0  ;;  %v1873_v16 = vld [vmem:[#allocation3 + $0x38] sm:$0xff] }
 0x250   : > { %1679 = vst.msk [vmem:[#allocation3 + $0x58] sm:$0xff] %vm932_vm9, %v1663_v30  ;;  %v1621_v2 = vpop.f32.mrb[21].mxu0  ;;  %v1871_v25 = vld [vmem:[#allocation3 + $0x28] sm:$0xff] }
 0x251   : > { %1677 = vst.msk [vmem:[#allocation3 + $0x48] sm:$0xff] %vm932_vm9, %v1661_v55  ;;  %v4297_v42 = vpop.f32.mrb[24].mxu1  ;;  %v4292_v49 = vpop.f32.mrb[22].mxu0 }
 0x252   : > { %v1884_v48 = vadd.f32 %v4297_v42, %v1868_v47  ;;  %v1803_v51 = vpop.f32.mrb[25].mxu1  ;;  %v1624_v56 = vpop.f32.mrb[23].mxu0 }
 0x253   : > { %v1650_v53 = vld [vmem:[#allocation3 + $0x70] sm:$0xff]  ;;  %v1882_v54 = vadd.f32 %v1866_v52, %v1803_v51  ;;  %v4298_v61 = vpop.f32.mrb[26].mxu1 }
 0x254   : > { %v1666_v26 = vadd.f32 %v4291_v18, %v1650_v53  ;;  %v1648_v63 = vld [vmem:[#allocation3 + $0x60] sm:$0xff]  ;;  %1900 = vst.msk [vmem:[#allocation3 + $0x10] sm:$0xff] %vm932_vm9, %v1884_v48  ;;  %v1885_v0 = vadd.f32 %v4298_v61, %v1869_v62  ;;  %v1806_v3 = vpop.f32.mrb[27].mxu1 }
 0x255   : > { %v1664_v14 = vadd.f32 %v1648_v63, %v1621_v2  ;;  %v1651_v50 = vld [vmem:[#allocation3 + $0x78] sm:$0xff]  ;;  %1898 = vst.msk [vmem:[#allocation3] sm:$0xff] %vm932_vm9, %v1882_v54  ;;  %v1883_v4 = vadd.f32 %v1867_v22, %v1806_v3  ;;  %v1876_v35 = vld [vmem:[#allocation3 + $0x50] sm:$0xff] }
 0x256   : > { %1682 = vst.msk [vmem:[#allocation3 + $0x70] sm:$0xff] %vm932_vm9, %v1666_v26  ;;  %v1667_v5 = vadd.f32 %v4292_v49, %v1651_v50  ;;  %v1649_v7 = vld [vmem:[#allocation3 + $0x68] sm:$0xff]  ;;  %1901 = vst.msk [vmem:[#allocation3 + $0x18] sm:$0xff] %vm932_vm9, %v1885_v0  ;;  %v1874_v38 = vld [vmem:[#allocation3 + $0x40] sm:$0xff] }
 0x257   : > { %1680 = vst.msk [vmem:[#allocation3 + $0x60] sm:$0xff] %vm932_vm9, %v1664_v14  ;;  %v1665_v8 = vadd.f32 %v1649_v7, %v1624_v56  ;;  %1899 = vst.msk [vmem:[#allocation3 + $0x8] sm:$0xff] %vm932_vm9, %v1883_v4  ;;  %v4315_v9 = vpop.f32.mrb[24].mxu0  ;;  %v1877_v44 = vld [vmem:[#allocation3 + $0x58] sm:$0xff] }
 0x258   : > { %1683 = vst.msk [vmem:[#allocation3 + $0x78] sm:$0xff] %vm932_vm9, %v1667_v5  ;;  %v2105_v57 = vpop.f32.mrb[25].mxu0  ;;  %v1875_v2 = vld [vmem:[#allocation3 + $0x48] sm:$0xff] }
 0x259   : > { %1681 = vst.msk [vmem:[#allocation3 + $0x68] sm:$0xff] %vm932_vm9, %v1665_v8  ;;  %v4301_v23 = vpop.f32.mrb[28].mxu1  ;;  %v4316_v12 = vpop.f32.mrb[26].mxu0 }
 0x25a   : > { %v1888_v11 = vadd.f32 %v4301_v23, %v1872_v10  ;;  %v1819_v59 = vpop.f32.mrb[29].mxu1  ;;  %v2108_v17 = vpop.f32.mrb[27].mxu0 }
 0x25b   : > { %v2170_v13 = vld [vmem:[#allocation3 + $0x10] sm:$0xff]  ;;  %v1886_v60 = vadd.f32 %v1870_v1, %v1819_v59  ;;  %v4302_v15 = vpop.f32.mrb[30].mxu1 }
 0x25c   : > { %v2186_v20 = vadd.f32 %v4315_v9, %v2170_v13  ;;  %1904 = vst.msk [vmem:[#allocation3 + $0x30] sm:$0xff] %vm932_vm9, %v1888_v11  ;;  %v2168_v58 = vld [vmem:[#allocation3] sm:$0xff]  ;;  %v1889_v21 = vadd.f32 %v4302_v15, %v1873_v16  ;;  %v1822_v24 = vpop.f32.mrb[31].mxu1 }
 0x25d   : > { %v2184_v6 = vadd.f32 %v2168_v58, %v2105_v57  ;;  %1902 = vst.msk [vmem:[#allocation3 + $0x20] sm:$0xff] %vm932_vm9, %v1886_v60  ;;  %v2171_v27 = vld [vmem:[#allocation3 + $0x18] sm:$0xff]  ;;  %v1887_v28 = vadd.f32 %v1871_v25, %v1822_v24  ;;  %v1880_v56 = vld [vmem:[#allocation3 + $0x70] sm:$0xff] }
 0x25e   : > { %2202 = vst.msk [vmem:[#allocation3 + $0x10] sm:$0xff] %vm932_vm9, %v2186_v20  ;;  %v2187_v29 = vadd.f32 %v4316_v12, %v2171_v27  ;;  %1905 = vst.msk [vmem:[#allocation3 + $0x38] sm:$0xff] %vm932_vm9, %v1889_v21  ;;  %v2169_v31 = vld [vmem:[#allocation3 + $0x8] sm:$0xff]  ;;  %v1878_v63 = vld [vmem:[#allocation3 + $0x60] sm:$0xff] }
 0x25f   : > { %2200 = vst.msk [vmem:[#allocation3] sm:$0xff] %vm932_vm9, %v2184_v6  ;;  %v2185_v32 = vadd.f32 %v2169_v31, %v2108_v17  ;;  %1903 = vst.msk [vmem:[#allocation3 + $0x28] sm:$0xff] %vm932_vm9, %v1887_v28  ;;  %v4319_v33 = vpop.f32.mrb[28].mxu0  ;;  %v1881_v50 = vld [vmem:[#allocation3 + $0x78] sm:$0xff] }
 0x260   : > { %2203 = vst.msk [vmem:[#allocation3 + $0x18] sm:$0xff] %vm932_vm9, %v2187_v29  ;;  %v2121_v36 = vpop.f32.mrb[29].mxu0  ;;  %v1879_v23 = vld [vmem:[#allocation3 + $0x68] sm:$0xff] }
 0x261   : > { %2201 = vst.msk [vmem:[#allocation3 + $0x8] sm:$0xff] %vm932_vm9, %v2185_v32  ;;  %v4305_v34 = vpop.f32.mrb[32].mxu1  ;;  %v4320_v39 = vpop.f32.mrb[30].mxu0 }
 0x262   : > { %v1892_v37 = vadd.f32 %v4305_v34, %v1876_v35  ;;  %v1835_v19 = vpop.f32.mrb[33].mxu1  ;;  %v2124_v45 = vpop.f32.mrb[31].mxu0 }
 0x263   : > { %v2174_v40 = vld [vmem:[#allocation3 + $0x30] sm:$0xff]  ;;  %v1890_v41 = vadd.f32 %v1874_v38, %v1835_v19  ;;  %v4306_v43 = vpop.f32.mrb[34].mxu1 }
 0x264   : > { %v2190_v30 = vadd.f32 %v4319_v33, %v2174_v40  ;;  %1908 = vst.msk [vmem:[#allocation3 + $0x50] sm:$0xff] %vm932_vm9, %v1892_v37  ;;  %v2172_v46 = vld [vmem:[#allocation3 + $0x20] sm:$0xff]  ;;  %v1893_v55 = vadd.f32 %v4306_v43, %v1877_v44  ;;  %v1838_v18 = vpop.f32.mrb[35].mxu1 }
 0x265   : > { %v2188_v42 = vadd.f32 %v2172_v46, %v2121_v36  ;;  %1906 = vst.msk [vmem:[#allocation3 + $0x40] sm:$0xff] %vm932_vm9, %v1890_v41  ;;  %v2175_v47 = vld [vmem:[#allocation3 + $0x38] sm:$0xff]  ;;  %v1891_v48 = vadd.f32 %v1875_v2, %v1838_v18  ;;  %v2472_v16 = vld [vmem:[#allocation3 + $0x10] sm:$0xff] }
 0x266   : > { %2206 = vst.msk [vmem:[#allocation3 + $0x30] sm:$0xff] %vm932_vm9, %v2190_v30  ;;  %v2191_v49 = vadd.f32 %v4320_v39, %v2175_v47  ;;  %1909 = vst.msk [vmem:[#allocation3 + $0x58] sm:$0xff] %vm932_vm9, %v1893_v55  ;;  %v2173_v51 = vld [vmem:[#allocation3 + $0x28] sm:$0xff]  ;;  %v2470_v21 = vld [vmem:[#allocation3] sm:$0xff] }
 0x267   : > { %2204 = vst.msk [vmem:[#allocation3 + $0x20] sm:$0xff] %vm932_vm9, %v2188_v42  ;;  %v2189_v52 = vadd.f32 %v2173_v51, %v2124_v45  ;;  %1907 = vst.msk [vmem:[#allocation3 + $0x48] sm:$0xff] %vm932_vm9, %v1891_v48  ;;  %v4323_v53 = vpop.f32.mrb[32].mxu0  ;;  %v2473_v28 = vld [vmem:[#allocation3 + $0x18] sm:$0xff] }
 0x268   : > { %2207 = vst.msk [vmem:[#allocation3 + $0x38] sm:$0xff] %vm932_vm9, %v2191_v49  ;;  %v2137_v61 = vpop.f32.mrb[33].mxu0  ;;  %v2471_v34 = vld [vmem:[#allocation3 + $0x8] sm:$0xff] }
 0x269   : > { %2205 = vst.msk [vmem:[#allocation3 + $0x28] sm:$0xff] %vm932_vm9, %v2189_v52  ;;  %v4309_v54 = vpop.f32.mrb[36].mxu1  ;;  %v4324_v0 = vpop.f32.mrb[34].mxu0 }
 0x26a   : > { %v1896_v62 = vadd.f32 %v4309_v54, %v1880_v56  ;;  %v1851_v26 = vpop.f32.mrb[37].mxu1  ;;  %v2140_v4 = vpop.f32.mrb[35].mxu0 }
 0x26b   : > { %v2178_v3 = vld [vmem:[#allocation3 + $0x50] sm:$0xff]  ;;  %v1894_v22 = vadd.f32 %v1878_v63, %v1851_v26  ;;  %v4310_v14 = vpop.f32.mrb[38].mxu1 }
 0x26c   : > { %v2194_v5 = vadd.f32 %v4323_v53, %v2178_v3  ;;  %1912 = vst.msk [vmem:[#allocation3 + $0x70] sm:$0xff] %vm932_vm9, %v1896_v62  ;;  %v2176_v7 = vld [vmem:[#allocation3 + $0x40] sm:$0xff]  ;;  %v1897_v8 = vadd.f32 %v4310_v14, %v1881_v50  ;;  %v1854_v9 = vpop.f32.mrb[39].mxu1 }
 0x26d   : > { %v2192_v10 = vadd.f32 %v2176_v7, %v2137_v61  ;;  %1910 = vst.msk [vmem:[#allocation3 + $0x60] sm:$0xff] %vm932_vm9, %v1894_v22  ;;  %v2179_v57 = vld [vmem:[#allocation3 + $0x58] sm:$0xff]  ;;  %v1895_v11 = vadd.f32 %v1879_v23, %v1854_v9  ;;  %v2476_v43 = vld [vmem:[#allocation3 + $0x30] sm:$0xff] }
 0x26e   : > { %2210 = vst.msk [vmem:[#allocation3 + $0x50] sm:$0xff] %vm932_vm9, %v2194_v5  ;;  %v2195_v59 = vadd.f32 %v4324_v0, %v2179_v57  ;;  %1913 = vst.msk [vmem:[#allocation3 + $0x78] sm:$0xff] %vm932_vm9, %v1897_v8  ;;  %v2177_v1 = vld [vmem:[#allocation3 + $0x48] sm:$0xff]  ;;  %v2474_v46 = vld [vmem:[#allocation3 + $0x20] sm:$0xff] }
 0x26f   : > { %2208 = vst.msk [vmem:[#allocation3 + $0x40] sm:$0xff] %vm932_vm9, %v2192_v10  ;;  %v2193_v12 = vadd.f32 %v2177_v1, %v2140_v4  ;;  %1911 = vst.msk [vmem:[#allocation3 + $0x68] sm:$0xff] %vm932_vm9, %v1895_v11  ;;  %v4327_v13 = vpop.f32.mrb[36].mxu0  ;;  %v2477_v47 = vld [vmem:[#allocation3 + $0x38] sm:$0xff] }
 0x270   : > { %2211 = vst.msk [vmem:[#allocation3 + $0x58] sm:$0xff] %vm932_vm9, %v2195_v59  ;;  %v2153_v60 = vpop.f32.mrb[37].mxu0  ;;  %v2475_v54 = vld [vmem:[#allocation3 + $0x28] sm:$0xff] }
 0x271   : > { %2209 = vst.msk [vmem:[#allocation3 + $0x48] sm:$0xff] %vm932_vm9, %v2193_v12  ;;  %v4333_v15 = vpop.f32.mrb[40].mxu1  ;;  %v4328_v20 = vpop.f32.mrb[38].mxu0 }
 0x272   : > { %v2488_v17 = vadd.f32 %v4333_v15, %v2472_v16  ;;  %v2407_v58 = vpop.f32.mrb[41].mxu1  ;;  %v2156_v6 = vpop.f32.mrb[39].mxu0 }
 0x273   : > { %v2182_v24 = vld [vmem:[#allocation3 + $0x70] sm:$0xff]  ;;  %v2486_v25 = vadd.f32 %v2470_v21, %v2407_v58  ;;  %v4334_v27 = vpop.f32.mrb[42].mxu1 }
 0x274   : > { %v2198_v29 = vadd.f32 %v4327_v13, %v2182_v24  ;;  %v2180_v31 = vld [vmem:[#allocation3 + $0x60] sm:$0xff]  ;;  %2504 = vst.msk [vmem:[#allocation3 + $0x10] sm:$0xff] %vm932_vm9, %v2488_v17  ;;  %v2489_v32 = vadd.f32 %v4334_v27, %v2473_v28  ;;  %v2410_v33 = vpop.f32.mrb[43].mxu1 }
 0x275   : > { %v2196_v35 = vadd.f32 %v2180_v31, %v2153_v60  ;;  %v2183_v36 = vld [vmem:[#allocation3 + $0x78] sm:$0xff]  ;;  %2502 = vst.msk [vmem:[#allocation3] sm:$0xff] %vm932_vm9, %v2486_v25  ;;  %v2487_v37 = vadd.f32 %v2471_v34, %v2410_v33  ;;  %v2480_v14 = vld [vmem:[#allocation3 + $0x50] sm:$0xff] }
 0x276   : > { %2214 = vst.msk [vmem:[#allocation3 + $0x70] sm:$0xff] %vm932_vm9, %v2198_v29  ;;  %v2199_v19 = vadd.f32 %v4328_v20, %v2183_v36  ;;  %v2181_v38 = vld [vmem:[#allocation3 + $0x68] sm:$0xff]  ;;  %2505 = vst.msk [vmem:[#allocation3 + $0x18] sm:$0xff] %vm932_vm9, %v2489_v32  ;;  %v2478_v7 = vld [vmem:[#allocation3 + $0x40] sm:$0xff] }
 0x277   : > { %2212 = vst.msk [vmem:[#allocation3 + $0x60] sm:$0xff] %vm932_vm9, %v2196_v35  ;;  %v2197_v39 = vadd.f32 %v2181_v38, %v2156_v6  ;;  %2503 = vst.msk [vmem:[#allocation3 + $0x8] sm:$0xff] %vm932_vm9, %v2487_v37  ;;  %v4351_v40 = vpop.f32.mrb[40].mxu0  ;;  %v2481_v57 = vld [vmem:[#allocation3 + $0x58] sm:$0xff] }
 0x278   : > { %2215 = vst.msk [vmem:[#allocation3 + $0x78] sm:$0xff] %vm932_vm9, %v2199_v19  ;;  %v2638_v44 = vpop.f32.mrb[41].mxu0  ;;  %v2479_v60 = vld [vmem:[#allocation3 + $0x48] sm:$0xff] }
 0x279   : > { %2213 = vst.msk [vmem:[#allocation3 + $0x68] sm:$0xff] %vm932_vm9, %v2197_v39  ;;  %v4337_v41 = vpop.f32.mrb[44].mxu1  ;;  %v4352_v55 = vpop.f32.mrb[42].mxu0 }
 0x27a   : > { %v2492_v45 = vadd.f32 %v4337_v41, %v2476_v43  ;;  %v2423_v30 = vpop.f32.mrb[45].mxu1  ;;  %v2641_v48 = vpop.f32.mrb[43].mxu0 }
 0x27b   : > { %v2703_v18 = vld [vmem:[#allocation3 + $0x10] sm:$0xff]  ;;  %v2490_v2 = vadd.f32 %v2474_v46, %v2423_v30  ;;  %v4338_v42 = vpop.f32.mrb[46].mxu1 }
 0x27c   : > { %v2719_v49 = vadd.f32 %v4351_v40, %v2703_v18  ;;  %2508 = vst.msk [vmem:[#allocation3 + $0x30] sm:$0xff] %vm932_vm9, %v2492_v45  ;;  %v2701_v51 = vld [vmem:[#allocation3] sm:$0xff]  ;;  %v2493_v52 = vadd.f32 %v4338_v42, %v2477_v47  ;;  %v2426_v53 = vpop.f32.mrb[47].mxu1 }
 0x27d   : > { %v2717_v56 = vadd.f32 %v2701_v51, %v2638_v44  ;;  %2506 = vst.msk [vmem:[#allocation3 + $0x20] sm:$0xff] %vm932_vm9, %v2490_v2  ;;  %v2704_v61 = vld [vmem:[#allocation3 + $0x18] sm:$0xff]  ;;  %v2491_v62 = vadd.f32 %v2475_v54, %v2426_v53  ;;  %v2484_v6 = vld [vmem:[#allocation3 + $0x70] sm:$0xff] }
 0x27e   : > { %2735 = vst.msk [vmem:[#allocation3 + $0x10] sm:$0xff] %vm932_vm9, %v2719_v49  ;;  %v2720_v26 = vadd.f32 %v4352_v55, %v2704_v61  ;;  %2509 = vst.msk [vmem:[#allocation3 + $0x38] sm:$0xff] %vm932_vm9, %v2493_v52  ;;  %v2702_v63 = vld [vmem:[#allocation3 + $0x8] sm:$0xff]  ;;  %v2482_v31 = vld [vmem:[#allocation3 + $0x60] sm:$0xff] }
 0x27f   : > { %2733 = vst.msk [vmem:[#allocation3] sm:$0xff] %vm932_vm9, %v2717_v56  ;;  %v2718_v0 = vadd.f32 %v2702_v63, %v2641_v48  ;;  %2507 = vst.msk [vmem:[#allocation3 + $0x28] sm:$0xff] %vm932_vm9, %v2491_v62  ;;  %v4355_v3 = vpop.f32.mrb[44].mxu0  ;;  %v2485_v36 = vld [vmem:[#allocation3 + $0x78] sm:$0xff] }
 0x280   : > { %2736 = vst.msk [vmem:[#allocation3 + $0x18] sm:$0xff] %vm932_vm9, %v2720_v26  ;;  %v2654_v50 = vpop.f32.mrb[45].mxu0  ;;  %v2483_v41 = vld [vmem:[#allocation3 + $0x68] sm:$0xff] }
 0x281   : > { %2734 = vst.msk [vmem:[#allocation3 + $0x8] sm:$0xff] %vm932_vm9, %v2718_v0  ;;  %v4341_v22 = vpop.f32.mrb[48].mxu1  ;;  %v4356_v8 = vpop.f32.mrb[46].mxu0 }
 0x282   : > { %v2496_v4 = vadd.f32 %v4341_v22, %v2480_v14  ;;  %v2439_v5 = vpop.f32.mrb[49].mxu1  ;;  %v2657_v11 = vpop.f32.mrb[47].mxu0 }
 0x283   : > { %v2707_v9 = vld [vmem:[#allocation3 + $0x30] sm:$0xff]  ;;  %v2494_v23 = vadd.f32 %v2478_v7, %v2439_v5  ;;  %v4342_v10 = vpop.f32.mrb[50].mxu1 }
 0x284   : > { %v2723_v59 = vadd.f32 %v4355_v3, %v2707_v9  ;;  %2512 = vst.msk [vmem:[#allocation3 + $0x50] sm:$0xff] %vm932_vm9, %v2496_v4  ;;  %v2705_v1 = vld [vmem:[#allocation3 + $0x20] sm:$0xff]  ;;  %v2497_v12 = vadd.f32 %v4342_v10, %v2481_v57  ;;  %v2442_v13 = vpop.f32.mrb[51].mxu1 }
 0x285   : > { %v2721_v15 = vadd.f32 %v2705_v1, %v2654_v50  ;;  %2510 = vst.msk [vmem:[#allocation3 + $0x40] sm:$0xff] %vm932_vm9, %v2494_v23  ;;  %v2708_v16 = vld [vmem:[#allocation3 + $0x38] sm:$0xff]  ;;  %v2495_v17 = vadd.f32 %v2479_v60, %v2442_v13  ;;  %v3005_v47 = vld [vmem:[#allocation3 + $0x10] sm:$0xff] }
 0x286   : > { %2739 = vst.msk [vmem:[#allocation3 + $0x30] sm:$0xff] %vm932_vm9, %v2723_v59  ;;  %v2724_v20 = vadd.f32 %v4356_v8, %v2708_v16  ;;  %2513 = vst.msk [vmem:[#allocation3 + $0x58] sm:$0xff] %vm932_vm9, %v2497_v12  ;;  %v2706_v58 = vld [vmem:[#allocation3 + $0x28] sm:$0xff]  ;;  %v3003_v52 = vld [vmem:[#allocation3] sm:$0xff] }
 0x287   : > { %2737 = vst.msk [vmem:[#allocation3 + $0x20] sm:$0xff] %vm932_vm9, %v2721_v15  ;;  %v2722_v21 = vadd.f32 %v2706_v58, %v2657_v11  ;;  %2511 = vst.msk [vmem:[#allocation3 + $0x48] sm:$0xff] %vm932_vm9, %v2495_v17  ;;  %v4359_v24 = vpop.f32.mrb[48].mxu0  ;;  %v3006_v62 = vld [vmem:[#allocation3 + $0x18] sm:$0xff] }
 0x288   : > { %2740 = vst.msk [vmem:[#allocation3 + $0x38] sm:$0xff] %vm932_vm9, %v2724_v20  ;;  %v2670_v27 = vpop.f32.mrb[49].mxu0  ;;  %v3004_v22 = vld [vmem:[#allocation3 + $0x8] sm:$0xff] }
 0x289   : > { %2738 = vst.msk [vmem:[#allocation3 + $0x28] sm:$0xff] %vm932_vm9, %v2722_v21  ;;  %v4345_v25 = vpop.f32.mrb[52].mxu1  ;;  %v4360_v32 = vpop.f32.mrb[50].mxu0 }
 0x28a   : > { %v2500_v28 = vadd.f32 %v4345_v25, %v2484_v6  ;;  %v2455_v29 = vpop.f32.mrb[53].mxu1  ;;  %v2673_v37 = vpop.f32.mrb[51].mxu0 }
 0x28b   : > { %v2711_v33 = vld [vmem:[#allocation3 + $0x50] sm:$0xff]  ;;  %v2498_v34 = vadd.f32 %v2482_v31, %v2455_v29  ;;  %v4346_v35 = vpop.f32.mrb[54].mxu1 }
 0x28c   : > { %v2727_v19 = vadd.f32 %v4359_v24, %v2711_v33  ;;  %2516 = vst.msk [vmem:[#allocation3 + $0x70] sm:$0xff] %vm932_vm9, %v2500_v28  ;;  %v2709_v38 = vld [vmem:[#allocation3 + $0x40] sm:$0xff]  ;;  %v2501_v39 = vadd.f32 %v4346_v35, %v2485_v36  ;;  %v2458_v40 = vpop.f32.mrb[55].mxu1 }
 0x28d   : > { %v2725_v43 = vadd.f32 %v2709_v38, %v2670_v27  ;;  %2514 = vst.msk [vmem:[#allocation3 + $0x60] sm:$0xff] %vm932_vm9, %v2498_v34  ;;  %v2712_v44 = vld [vmem:[#allocation3 + $0x58] sm:$0xff]  ;;  %v2499_v45 = vadd.f32 %v2483_v41, %v2458_v40  ;;  %v3009_v10 = vld [vmem:[#allocation3 + $0x30] sm:$0xff] }
 0x28e   : > { %2743 = vst.msk [vmem:[#allocation3 + $0x50] sm:$0xff] %vm932_vm9, %v2727_v19  ;;  %v2728_v30 = vadd.f32 %v4360_v32, %v2712_v44  ;;  %2517 = vst.msk [vmem:[#allocation3 + $0x78] sm:$0xff] %vm932_vm9, %v2501_v39  ;;  %v2710_v46 = vld [vmem:[#allocation3 + $0x48] sm:$0xff]  ;;  %v3007_v1 = vld [vmem:[#allocation3 + $0x20] sm:$0xff] }
 0x28f   : > { %2741 = vst.msk [vmem:[#allocation3 + $0x40] sm:$0xff] %vm932_vm9, %v2725_v43  ;;  %v2726_v55 = vadd.f32 %v2710_v46, %v2673_v37  ;;  %2515 = vst.msk [vmem:[#allocation3 + $0x68] sm:$0xff] %vm932_vm9, %v2499_v45  ;;  %v4363_v18 = vpop.f32.mrb[52].mxu0  ;;  %v3010_v16 = vld [vmem:[#allocation3 + $0x38] sm:$0xff] }
 0x290   : > { %2744 = vst.msk [vmem:[#allocation3 + $0x58] sm:$0xff] %vm932_vm9, %v2728_v30  ;;  %v2686_v2 = vpop.f32.mrb[53].mxu0  ;;  %v3008_v25 = vld [vmem:[#allocation3 + $0x28] sm:$0xff] }
 0x291   : > { %2742 = vst.msk [vmem:[#allocation3 + $0x48] sm:$0xff] %vm932_vm9, %v2726_v55  ;;  %v4369_v42 = vpop.f32.mrb[56].mxu1  ;;  %v4364_v49 = vpop.f32.mrb[54].mxu0 }
 0x292   : > { %v3021_v48 = vadd.f32 %v4369_v42, %v3005_v47  ;;  %v2940_v51 = vpop.f32.mrb[57].mxu1  ;;  %v2689_v56 = vpop.f32.mrb[55].mxu0 }
 0x293   : > { %v2715_v53 = vld [vmem:[#allocation3 + $0x70] sm:$0xff]  ;;  %v3019_v54 = vadd.f32 %v3003_v52, %v2940_v51  ;;  %v4370_v61 = vpop.f32.mrb[58].mxu1 }
 0x294   : > { %v2731_v26 = vadd.f32 %v4363_v18, %v2715_v53  ;;  %v2713_v63 = vld [vmem:[#allocation3 + $0x60] sm:$0xff]  ;;  %3037 = vst.msk [vmem:[#allocation3 + $0x10] sm:$0xff] %vm932_vm9, %v3021_v48  ;;  %v3022_v0 = vadd.f32 %v4370_v61, %v3006_v62  ;;  %v2943_v3 = vpop.f32.mrb[59].mxu1 }
 0x295   : > { %v2729_v14 = vadd.f32 %v2713_v63, %v2686_v2  ;;  %v2716_v50 = vld [vmem:[#allocation3 + $0x78] sm:$0xff]  ;;  %3035 = vst.msk [vmem:[#allocation3] sm:$0xff] %vm932_vm9, %v3019_v54  ;;  %v3020_v4 = vadd.f32 %v3004_v22, %v2943_v3  ;;  %v3013_v35 = vld [vmem:[#allocation3 + $0x50] sm:$0xff] }
 0x296   : > { %2747 = vst.msk [vmem:[#allocation3 + $0x70] sm:$0xff] %vm932_vm9, %v2731_v26  ;;  %v2732_v5 = vadd.f32 %v4364_v49, %v2716_v50  ;;  %v2714_v7 = vld [vmem:[#allocation3 + $0x68] sm:$0xff]  ;;  %3038 = vst.msk [vmem:[#allocation3 + $0x18] sm:$0xff] %vm932_vm9, %v3022_v0  ;;  %v3011_v38 = vld [vmem:[#allocation3 + $0x40] sm:$0xff] }
 0x297   : > { %2745 = vst.msk [vmem:[#allocation3 + $0x60] sm:$0xff] %vm932_vm9, %v2729_v14  ;;  %v2730_v8 = vadd.f32 %v2714_v7, %v2689_v56  ;;  %3036 = vst.msk [vmem:[#allocation3 + $0x8] sm:$0xff] %vm932_vm9, %v3020_v4  ;;  %v4387_v9 = vpop.f32.mrb[56].mxu0  ;;  %v3014_v44 = vld [vmem:[#allocation3 + $0x58] sm:$0xff] }
 0x298   : > { %2748 = vst.msk [vmem:[#allocation3 + $0x78] sm:$0xff] %vm932_vm9, %v2732_v5  ;;  %v3242_v57 = vpop.f32.mrb[57].mxu0  ;;  %v3012_v2 = vld [vmem:[#allocation3 + $0x48] sm:$0xff] }
 0x299   : > { %2746 = vst.msk [vmem:[#allocation3 + $0x68] sm:$0xff] %vm932_vm9, %v2730_v8  ;;  %v4373_v23 = vpop.f32.mrb[60].mxu1  ;;  %v4388_v12 = vpop.f32.mrb[58].mxu0 }
 0x29a   : > { %v3025_v11 = vadd.f32 %v4373_v23, %v3009_v10  ;;  %v2956_v59 = vpop.f32.mrb[61].mxu1  ;;  %v3245_v17 = vpop.f32.mrb[59].mxu0 }
 0x29b   : > { %v3307_v13 = vld [vmem:[#allocation3 + $0x10] sm:$0xff]  ;;  %v3023_v60 = vadd.f32 %v3007_v1, %v2956_v59  ;;  %v4374_v15 = vpop.f32.mrb[62].mxu1 }
 0x29c   : > { %v3323_v20 = vadd.f32 %v4387_v9, %v3307_v13  ;;  %3041 = vst.msk [vmem:[#allocation3 + $0x30] sm:$0xff] %vm932_vm9, %v3025_v11  ;;  %v3305_v58 = vld [vmem:[#allocation3] sm:$0xff]  ;;  %v3026_v21 = vadd.f32 %v4374_v15, %v3010_v16  ;;  %v2959_v24 = vpop.f32.mrb[63].mxu1 }
 0x29d   : > { %v3321_v6 = vadd.f32 %v3305_v58, %v3242_v57  ;;  %3039 = vst.msk [vmem:[#allocation3 + $0x20] sm:$0xff] %vm932_vm9, %v3023_v60  ;;  %v3308_v27 = vld [vmem:[#allocation3 + $0x18] sm:$0xff]  ;;  %v3024_v28 = vadd.f32 %v3008_v25, %v2959_v24  ;;  %v3017_v4 = vld [vmem:[#allocation3 + $0x70] sm:$0xff] }
 0x29e   : > { %3339 = vst.msk [vmem:[#allocation3 + $0x10] sm:$0xff] %vm932_vm9, %v3323_v20  ;;  %v3324_v29 = vadd.f32 %v4388_v12, %v3308_v27  ;;  %3042 = vst.msk [vmem:[#allocation3 + $0x38] sm:$0xff] %vm932_vm9, %v3026_v21  ;;  %v3306_v31 = vld [vmem:[#allocation3 + $0x8] sm:$0xff]  ;;  %v3015_v57 = vld [vmem:[#allocation3 + $0x60] sm:$0xff] }
 0x29f   : > { %3337 = vst.msk [vmem:[#allocation3] sm:$0xff] %vm932_vm9, %v3321_v6  ;;  %v3322_v32 = vadd.f32 %v3306_v31, %v3245_v17  ;;  %3040 = vst.msk [vmem:[#allocation3 + $0x28] sm:$0xff] %vm932_vm9, %v3024_v28  ;;  %v4391_v33 = vpop.f32.mrb[60].mxu0  ;;  %v3018_v59 = vld [vmem:[#allocation3 + $0x78] sm:$0xff] }
 0x2a0   : > { %3340 = vst.msk [vmem:[#allocation3 + $0x18] sm:$0xff] %vm932_vm9, %v3324_v29  ;;  %v3258_v36 = vpop.f32.mrb[61].mxu0  ;;  %v3016_v27 = vld [vmem:[#allocation3 + $0x68] sm:$0xff] }
 0x2a1   : > { %3338 = vst.msk [vmem:[#allocation3 + $0x8] sm:$0xff] %vm932_vm9, %v3322_v32  ;;  %v4377_v34 = vpop.f32.mrb[64].mxu1  ;;  %v4392_v39 = vpop.f32.mrb[62].mxu0 }
 0x2a2   : > { %v3029_v37 = vadd.f32 %v4377_v34, %v3013_v35  ;;  %v2972_v19 = vpop.f32.mrb[65].mxu1  ;;  %v3261_v45 = vpop.f32.mrb[63].mxu0 }
 0x2a3   : > { %v3311_v40 = vld [vmem:[#allocation3 + $0x30] sm:$0xff]  ;;  %v3027_v41 = vadd.f32 %v3011_v38, %v2972_v19  ;;  %v4378_v43 = vpop.f32.mrb[66].mxu1 }
 0x2a4   : > { %v3327_v30 = vadd.f32 %v4391_v33, %v3311_v40  ;;  %3045 = vst.msk [vmem:[#allocation3 + $0x50] sm:$0xff] %vm932_vm9, %v3029_v37  ;;  %v3309_v46 = vld [vmem:[#allocation3 + $0x20] sm:$0xff]  ;;  %v3030_v55 = vadd.f32 %v4378_v43, %v3014_v44  ;;  %v2975_v18 = vpop.f32.mrb[67].mxu1 }
 0x2a5   : > { %v3325_v42 = vadd.f32 %v3309_v46, %v3258_v36  ;;  %3043 = vst.msk [vmem:[#allocation3 + $0x40] sm:$0xff] %vm932_vm9, %v3027_v41  ;;  %v3312_v47 = vld [vmem:[#allocation3 + $0x38] sm:$0xff]  ;;  %v3028_v48 = vadd.f32 %v3012_v2, %v2975_v18  ;;  %v3355_v49 = vld [vmem:[#allocation3 + $0x10] sm:$0xff] }
 0x2a6   : > { %v3353_v51 = vld [vmem:[#allocation3] sm:$0xff]  ;;  %3343 = vst.msk [vmem:[#allocation3 + $0x30] sm:$0xff] %vm932_vm9, %v3327_v30  ;;  %v3328_v52 = vadd.f32 %v4392_v39, %v3312_v47  ;;  %3046 = vst.msk [vmem:[#allocation3 + $0x58] sm:$0xff] %vm932_vm9, %v3030_v55  ;;  %v3310_v53 = vld [vmem:[#allocation3 + $0x28] sm:$0xff]  ;;  %v4087_v54 = vpack.c.bf16 %v3355_v49, %v3355_v49  ;;  %v3488_v22 = vmul.f32 %v3355_v49, %v3355_v49  ;;  %v3452_v58 = vsel %vm932_vm9, %v3355_v49, 0.0 }
 0x2a7   : > { %v4085_v56 = vpack.c.bf16 %v3353_v51, %v3353_v51  ;;  %3341 = vst.msk [vmem:[#allocation3 + $0x20] sm:$0xff] %vm932_vm9, %v3325_v42  ;;  %v3326_v61 = vadd.f32 %v3310_v53, %v3261_v45  ;;  %3044 = vst.msk [vmem:[#allocation3 + $0x48] sm:$0xff] %vm932_vm9, %v3028_v48  ;;  %v3356_v62 = vld [vmem:[#allocation3 + $0x18] sm:$0xff]  ;;  %v3486_v26 = vmul.f32 %v3353_v51, %v3353_v51  ;;  %v4395_v0 = vpop.f32.mrb[64].mxu0  ;;  %v3449_v8 = vsel %vm932_vm9, %v3353_v51, 0.0 }
 0x2a8   : > { %v3354_v63 = vld [vmem:[#allocation3 + $0x8] sm:$0xff]  ;;  %3344 = vst.msk [vmem:[#allocation3 + $0x38] sm:$0xff] %vm932_vm9, %v3328_v52  ;;  %v4088_v3 = vpack.c.bf16 %v3356_v62, %v3356_v62  ;;  %v3274_v5 = vpop.f32.mrb[65].mxu0  ;;  %v3489_v1 = vmul.f32 %v3356_v62, %v3356_v62  ;;  %v3505_v35 = vsel %vm932_vm9, %v3488_v22, 0.0  ;;  %v3454_v36 = vsel %vm932_vm9, %v3356_v62, 0.0 }
 0x2a9   : > { %3435 = vst.msk [vmem:[%s6173_s24 + $0x8] sm:$0xf] %vm592_vm7, %v4087_v54  ;;  %3433 = vst.msk [vmem:[%s6173_s24] sm:$0xf] %vm592_vm7, %v4085_v56  ;;  %v4086_v14 = vpack.c.bf16 %v3354_v63, %v3354_v63  ;;  %v4381_v50 = vpop.f32.mrb[68].mxu1  ;;  %v3487_v7 = vmul.f32 %v3354_v63, %v3354_v63  ;;  %v3450_v9 = vsel %vm932_vm9, %v3354_v63, 0.0 }
 0x2aa   : > { %3342 = vst.msk [vmem:[#allocation3 + $0x28] sm:$0xff] %vm932_vm9, %v3326_v61  ;;  %v3033_v23 = vadd.f32 %v4381_v50, %v3017_v4  ;;  %v2988_v10 = vpop.f32.mrb[69].mxu1  ;;  %v4396_v11 = vpop.f32.mrb[66].mxu0  ;;  %v3451_v12 = vadd.f32 %v3450_v9, %v3449_v8  ;;  %v3502_v17 = vsel %vm932_vm9, %v3486_v26, 0.0  ;;  %v3507_v41 = vsel %vm932_vm9, %v3489_v1, 0.0 }
 0x2ab   : > { %3436 = vst.msk [vmem:[%s6173_s24 + $0xc] sm:$0xf] %vm592_vm7, %v4088_v3  ;;  %3434 = vst.msk [vmem:[%s6173_s24 + $0x4] sm:$0xf] %vm592_vm7, %v4086_v14  ;;  %v3315_v13 = vld [vmem:[#allocation3 + $0x50] sm:$0xff]  ;;  %v3031_v60 = vadd.f32 %v3015_v57, %v2988_v10  ;;  %v4382_v15 = vpop.f32.mrb[70].mxu1 }
 0x2ac   : > { %v3277_v16 = vpop.f32.mrb[67].mxu0  ;;  %v3503_v20 = vsel %vm932_vm9, %v3487_v7, 0.0  ;;  %v3331_v21 = vadd.f32 %v4395_v0, %v3315_v13  ;;  %3049 = vst.msk [vmem:[#allocation3 + $0x70] sm:$0xff] %vm932_vm9, %v3033_v23  ;;  %v3313_v24 = vld [vmem:[#allocation3 + $0x40] sm:$0xff]  ;;  %v3034_v25 = vadd.f32 %v4382_v15, %v3018_v59  ;;  %v2991_v6 = vpop.f32.mrb[71].mxu1  ;;  %v3453_v29 = vadd.f32 %v3452_v58, %v3451_v12 }
 0x2ad   : > { %v3504_v28 = vadd.f32 %v3503_v20, %v3502_v17  ;;  %v3329_v31 = vadd.f32 %v3313_v24, %v3274_v5  ;;  %3047 = vst.msk [vmem:[#allocation3 + $0x60] sm:$0xff] %vm932_vm9, %v3031_v60  ;;  %v3316_v32 = vld [vmem:[#allocation3 + $0x58] sm:$0xff]  ;;  %v3032_v33 = vadd.f32 %v3016_v27, %v2991_v6  ;;  %v3359_v34 = vld [vmem:[#allocation3 + $0x30] sm:$0xff] }
 0x2ae   : > { %3347 = vst.msk [vmem:[#allocation3 + $0x50] sm:$0xff] %vm932_vm9, %v3331_v21  ;;  %v3332_v37 = vadd.f32 %v4396_v11, %v3316_v32  ;;  %3050 = vst.msk [vmem:[#allocation3 + $0x78] sm:$0xff] %vm932_vm9, %v3034_v25  ;;  %v3314_v19 = vld [vmem:[#allocation3 + $0x48] sm:$0xff]  ;;  %v3357_v38 = vld [vmem:[#allocation3 + $0x20] sm:$0xff]  ;;  %v4091_v39 = vpack.c.bf16 %v3359_v34, %v3359_v34  ;;  %v3455_v46 = vadd.f32 %v3454_v36, %v3453_v29  ;;  %v3460_v12 = vsel %vm932_vm9, %v3359_v34, 0.0 }
 0x2af   : > { %v3506_v40 = vadd.f32 %v3505_v35, %v3504_v28  ;;  %3345 = vst.msk [vmem:[#allocation3 + $0x40] sm:$0xff] %vm932_vm9, %v3329_v31  ;;  %v3330_v43 = vadd.f32 %v3314_v19, %v3277_v16  ;;  %3048 = vst.msk [vmem:[#allocation3 + $0x68] sm:$0xff] %vm932_vm9, %v3032_v33  ;;  %v3360_v44 = vld [vmem:[#allocation3 + $0x38] sm:$0xff]  ;;  %v4089_v45 = vpack.c.bf16 %v3357_v38, %v3357_v38  ;;  %v4399_v55 = vpop.f32.mrb[68].mxu0  ;;  %v3456_v54 = vsel %vm932_vm9, %v3357_v38, 0.0 }
 0x2b0   : > { %v3490_v30 = vmul.f32 %v3357_v38, %v3357_v38  ;;  %3348 = vst.msk [vmem:[#allocation3 + $0x58] sm:$0xff] %vm932_vm9, %v3332_v37  ;;  %v4092_v2 = vpack.c.bf16 %v3360_v44, %v3360_v44  ;;  %v3492_v42 = vmul.f32 %v3359_v34, %v3359_v34  ;;  %v3493_v47 = vmul.f32 %v3360_v44, %v3360_v44  ;;  %v3290_v49 = vpop.f32.mrb[69].mxu0 }
 0x2b1   : > { %v3358_v18 = vld [vmem:[#allocation3 + $0x28] sm:$0xff]  ;;  %3439 = vst.msk [vmem:[%s6173_s24 + $0x18] sm:$0xf] %vm592_vm7, %v4091_v39  ;;  %v3508_v48 = vadd.f32 %v3507_v41, %v3506_v40  ;;  %3437 = vst.msk [vmem:[%s6173_s24 + $0x10] sm:$0xf] %vm592_vm7, %v4089_v45  ;;  %v4400_v56 = vpop.f32.mrb[70].mxu0  ;;  %v3457_v62 = vadd.f32 %v3456_v54, %v3455_v46 }
 0x2b2   : > { %3346 = vst.msk [vmem:[#allocation3 + $0x48] sm:$0xff] %vm932_vm9, %v3330_v43  ;;  %v4090_v51 = vpack.c.bf16 %v3358_v18, %v3358_v18  ;;  %v3491_v52 = vmul.f32 %v3358_v18, %v3358_v18  ;;  %v3509_v53 = vsel %vm932_vm9, %v3490_v30, 0.0  ;;  %v3458_v26 = vsel %vm932_vm9, %v3358_v18, 0.0  ;;  %v3293_v0 = vpop.f32.mrb[71].mxu0 }
 0x2b3   : > { %3440 = vst.msk [vmem:[%s6173_s24 + $0x1c] sm:$0xf] %vm592_vm7, %v4092_v2  ;;  %v3510_v61 = vadd.f32 %v3509_v53, %v3508_v48  ;;  %v3319_v63 = vld [vmem:[#allocation3 + $0x70] sm:$0xff]  ;;  %v3459_v4 = vadd.f32 %v3458_v26, %v3457_v62  ;;  %v3513_v9 = vsel %vm932_vm9, %v3492_v42, 0.0  ;;  %v3515_v23 = vsel %vm932_vm9, %v3493_v47, 0.0 }
 0x2b4   : > { %3438 = vst.msk [vmem:[%s6173_s24 + $0x14] sm:$0xf] %vm592_vm7, %v4090_v51  ;;  %v3511_v3 = vsel %vm932_vm9, %v3491_v52, 0.0  ;;  %v3335_v22 = vadd.f32 %v4399_v55, %v3319_v63  ;;  %v3317_v14 = vld [vmem:[#allocation3 + $0x60] sm:$0xff]  ;;  %v3462_v25 = vsel %vm932_vm9, %v3360_v44, 0.0 }
 0x2b5   : > { %v3512_v50 = vadd.f32 %v3511_v3, %v3510_v61  ;;  %v3333_v5 = vadd.f32 %v3317_v14, %v3290_v49  ;;  %v3320_v7 = vld [vmem:[#allocation3 + $0x78] sm:$0xff]  ;;  %v3363_v8 = vld [vmem:[#allocation3 + $0x50] sm:$0xff]  ;;  %v3461_v17 = vadd.f32 %v3460_v12, %v3459_v4 }
 0x2b6   : > { %3351 = vst.msk [vmem:[#allocation3 + $0x70] sm:$0xff] %vm932_vm9, %v3335_v22  ;;  %v3336_v10 = vadd.f32 %v4400_v56, %v3320_v7  ;;  %v3318_v57 = vld [vmem:[#allocation3 + $0x68] sm:$0xff]  ;;  %v3361_v11 = vld [vmem:[#allocation3 + $0x40] sm:$0xff]  ;;  %v4095_v59 = vpack.c.bf16 %v3363_v8, %v3363_v8  ;;  %v3496_v21 = vmul.f32 %v3363_v8, %v3363_v8  ;;  %v3468_v45 = vsel %vm932_vm9, %v3363_v8, 0.0 }
 0x2b7   : > { %v3514_v1 = vadd.f32 %v3513_v9, %v3512_v50  ;;  %3349 = vst.msk [vmem:[#allocation3 + $0x60] sm:$0xff] %vm932_vm9, %v3333_v5  ;;  %v3334_v13 = vadd.f32 %v3318_v57, %v3293_v0  ;;  %v3364_v60 = vld [vmem:[#allocation3 + $0x58] sm:$0xff]  ;;  %v4093_v15 = vpack.c.bf16 %v3361_v11, %v3361_v11  ;;  %v3494_v16 = vmul.f32 %v3361_v11, %v3361_v11 }
 0x2b8   : > { %3352 = vst.msk [vmem:[#allocation3 + $0x78] sm:$0xff] %vm932_vm9, %v3336_v10  ;;  %v4096_v58 = vpack.c.bf16 %v3364_v60, %v3364_v60  ;;  %v3463_v29 = vadd.f32 %v3462_v25, %v3461_v17  ;;  %v3497_v31 = vmul.f32 %v3364_v60, %v3364_v60  ;;  %v3464_v33 = vsel %vm932_vm9, %v3361_v11, 0.0 }
 0x2b9   : > { %v3362_v20 = vld [vmem:[#allocation3 + $0x48] sm:$0xff]  ;;  %3443 = vst.msk [vmem:[%s6173_s24 + $0x28] sm:$0xf] %vm592_vm7, %v4095_v59  ;;  %v3516_v24 = vadd.f32 %v3515_v23, %v3514_v1  ;;  %3441 = vst.msk [vmem:[%s6173_s24 + $0x20] sm:$0xf] %vm592_vm7, %v4093_v15  ;;  %v3517_v28 = vsel %vm932_vm9, %v3494_v16, 0.0 }
 0x2ba   : > { %3350 = vst.msk [vmem:[#allocation3 + $0x68] sm:$0xff] %vm932_vm9, %v3334_v13  ;;  %v4094_v6 = vpack.c.bf16 %v3362_v20, %v3362_v20  ;;  %v3495_v27 = vmul.f32 %v3362_v20, %v3362_v20  ;;  %v3466_v34 = vsel %vm932_vm9, %v3362_v20, 0.0  ;;  %v3465_v36 = vadd.f32 %v3464_v33, %v3463_v29 }
 0x2bb   : > { %3444 = vst.msk [vmem:[%s6173_s24 + $0x2c] sm:$0xf] %vm592_vm7, %v4096_v58  ;;  %v3518_v32 = vadd.f32 %v3517_v28, %v3516_v24  ;;  %v3521_v38 = vsel %vm932_vm9, %v3496_v21, 0.0  ;;  %v3523_v44 = vsel %vm932_vm9, %v3497_v31, 0.0  ;;  %v3470_v2 = vsel %vm932_vm9, %v3364_v60, 0.0 }
 0x2bc   : > { %3442 = vst.msk [vmem:[%s6173_s24 + $0x24] sm:$0xf] %vm592_vm7, %v4094_v6  ;;  %v3519_v35 = vsel %vm932_vm9, %v3495_v27, 0.0  ;;  %v3467_v39 = vadd.f32 %v3466_v34, %v3465_v36 }
 0x2bd   : > { %v3520_v37 = vadd.f32 %v3519_v35, %v3518_v32  ;;  %v3367_v19 = vld [vmem:[#allocation3 + $0x70] sm:$0xff] }
 0x2be   : > { %v3365_v40 = vld [vmem:[#allocation3 + $0x60] sm:$0xff]  ;;  %v4099_v41 = vpack.c.bf16 %v3367_v19, %v3367_v19  ;;  %v3469_v18 = vadd.f32 %v3468_v45, %v3467_v39  ;;  %v3500_v48 = vmul.f32 %v3367_v19, %v3367_v19  ;;  %v3476_v4 = vsel %vm932_vm9, %v3367_v19, 0.0 }
 0x2bf   : > { %v3522_v43 = vadd.f32 %v3521_v38, %v3520_v37  ;;  %v3368_v30 = vld [vmem:[#allocation3 + $0x78] sm:$0xff]  ;;  %v4097_v46 = vpack.c.bf16 %v3365_v40, %v3365_v40  ;;  %v3498_v55 = vmul.f32 %v3365_v40, %v3365_v40  ;;  %v3472_v51 = vsel %vm932_vm9, %v3365_v40, 0.0 }
 0x2c0   : > { %v4100_v47 = vpack.c.bf16 %v3368_v30, %v3368_v30  ;;  %3447 = vst.msk [vmem:[%s6173_s24 + $0x38] sm:$0xf] %vm592_vm7, %v4099_v41  ;;  %v3471_v56 = vadd.f32 %v3470_v2, %v3469_v18  ;;  %v3501_v26 = vmul.f32 %v3368_v30, %v3368_v30  ;;  %v3529_v22 = vsel %vm932_vm9, %v3500_v48, 0.0 }
 0x2c1   : > { %v3366_v42 = vld [vmem:[#allocation3 + $0x68] sm:$0xff]  ;;  %v3524_v49 = vadd.f32 %v3523_v44, %v3522_v43  ;;  %3445 = vst.msk [vmem:[%s6173_s24 + $0x30] sm:$0xf] %vm592_vm7, %v4097_v46  ;;  %v3525_v54 = vsel %vm932_vm9, %v3498_v55, 0.0  ;;  %v3478_v9 = vsel %vm932_vm9, %v3368_v30, 0.0 }
 0x2c2   : > { %v4098_v52 = vpack.c.bf16 %v3366_v42, %v3366_v42  ;;  %v3499_v53 = vmul.f32 %v3366_v42, %v3366_v42  ;;  %3448 = vst.msk [vmem:[%s6173_s24 + $0x3c] sm:$0xf] %vm592_vm7, %v4100_v47  ;;  %v3474_v62 = vsel %vm932_vm9, %v3366_v42, 0.0  ;;  %v3473_v0 = vadd.f32 %v3472_v51, %v3471_v56 }
 0x2c3   : > { %v3526_v61 = vadd.f32 %v3525_v54, %v3524_v49  ;;  %v3531_v5 = vsel %vm932_vm9, %v3501_v26, 0.0 }
 0x2c4   : > { %3446 = vst.msk [vmem:[%s6173_s24 + $0x34] sm:$0xf] %vm592_vm7, %v4098_v52  ;;  %v3527_v63 = vsel %vm932_vm9, %v3499_v53, 0.0  ;;  %v3475_v14 = vadd.f32 %v3474_v62, %v3473_v0 }
 0x2c5   : > { %v3528_v3 = vadd.f32 %v3527_v63, %v3526_v61 }
 0x2c6   : > { %v3477_v7 = vadd.f32 %v3476_v4, %v3475_v14 }
 0x2c7   : > { %v3530_v50 = vadd.f32 %v3529_v22, %v3528_v3 }
 0x2c8   : > { %v3479_v23 = vadd.f32 %v3478_v9, %v3477_v7 }
 0x2c9   : > { %v3532_v8 = vadd.f32 %v3531_v5, %v3530_v50 }
 0x2cb   : > { %v3533_v10 = vrot.slane %v3532_v8, 4 }
 0x2cd   : > { %v3534_v57 = vadd.f32 %v3533_v10, %v3532_v8 }
 0x2cf   : > { %v3535_v11 = vrot.slane %v3534_v57, 2 }
 0x2d0   : > { %4804 = shalt.err (!%p4801_p11)
}
 0x2d1   : > { %s4805_s15 = scalar_lea.hbm %s6260_s25, 1024  ;;  %s4809_s27 = scalar_lea.hbm %s6496_s5, 4096 }
 0x2d2   : > { %p4806_p3 = scmp.ne.s32.totalorder %s6260_s25, %s4805_s15  ;;  %p4810_p13 = scmp.lt.u32.totalorder %s6260_s25, %s6496_s5 }
 0x2d3   : > { %p4811_p6 = scmp.lt.u32.totalorder %s4809_s27, %s4805_s15  ;;  %p4813_p5 = scmp.lt.u32.totalorder %s4805_s15, %s6260_s25 }
 0x2d4   : > { %p4807_p10 = pnand %p4806_p3, %p6497_p9 }
 0x2d5   : > { %p4812_p8 = por %p4811_p6, %p4810_p13 }
 0x2d6   : > { %p4808_p4 = pneg %p4807_p10 }
 0x2d7   : > { %p4814_p12 = por %p4813_p5, %p4812_p8 }
 0x2d9   : > { %p4815_p0 = pnand %p4814_p12, %p4808_p4 }
 0x2db   : > { %4818 = shalt.err (!%p4815_p0)
}
 0x2dc   : > { %s4997_s30 = smov 64   ;;  %s4998_s17 = smov 4   ;;  %v3536_v59 = vadd.f32 %v3535_v11, %v3534_v57  ;;  %v3480_v13 = vrot.slane %v3479_v23, 4  ;;  %vm3544_vm0 = vcmask 122880  }
 0x2dd   : > { %4431 = dma.vmem_to_hbm [thread:$0]  (%p6497_p9), %s6255_s0, 1024, %s6260_s25, %s3547_s7, %s4997_s30, %s4997_s30, %s4998_s17  }
 0x2de   : > { %v3537_v1 = vrot.slane %v3536_v59, 1  ;;  %s4999_s10 = smov 8   ;;  %v3481_v60 = vadd.f32 %v3480_v13, %v3479_v23  ;;  %s4056_s3 = sshll.u32 %s6494_s23, 1 }
 0x2df   : > { %s3580_s2 = sadd.s32 %s6483_s22, %s4056_s3  ;;  %s478_s4 = scalar_lea.vmem [#allocation16], %s5461_s16 }
 0x2e0   : > { %v3538_v12 = vadd.f32 %v3537_v1, %v3536_v59  ;;  %v3482_v15 = vrot.slane %v3481_v60, 2  ;;  %s4057_s20 = sshll.u32 %s3580_s2, 4  ;;  %s3584_s15 = sshll.u32 %s478_s4, 4  ;;  %s6294_s15 = int_to_ptr.vmem [resolvable:$true] %s3584_s15 }
 0x2e1   : > { %s6498_s7 = sld [smem:[#allocation46_spill]]  ;;  %s3552_s22 = scalar_lea.sflag [#allocation17], %s5461_s16 }
 0x2e2   : > { %3540 = vrot.lane.b32.xlu0 %v3538_v12, %s4999_s10  ;;  %v3483_v16 = vadd.f32 %v3482_v15, %v3481_v60  ;;  %s4819_s23 = scalar_lea.vmem %s6294_s15, 16  ;;  %s5000_s24 = smov [#allocation16]  }
 0x2e3   : > { %p4820_p7 = scmp.ne.s32.totalorder %s6294_s15, %s4819_s23  ;;  %s4823_s27 = sshll.u32 %s5000_s24, 4  ;;  %s4824_s27 = int_to_ptr.vmem [resolvable:$false] %s4823_s27 }
 0x2e4   : > { %v3484_v17 = vrot.slane %v3483_v16, 1  ;;  %s4825_s6 = scalar_lea.vmem %s4824_s27, 32  ;;  %p4826_p11 = scmp.lt.s32.totalorder %s6294_s15, %s4824_s27 }
 0x2e5   : > { %p4821_p1 = pnand %p4820_p7, %p6497_p9  ;;  %p4827_p3 = scmp.lt.s32.totalorder %s4825_s6, %s4819_s23 }
 0x2e6   : > { %v3485_v20 = vadd.f32 %v3484_v17, %v3483_v16 }
 0x2e7   : > { %s6292_s19 = scalar_lea.hbm %s6498_s7, %s4057_s20  ;;  %p4822_p2 = pneg %p4821_p1 }
 0x2e8   : > { %p4828_p10 = por %p4827_p3, %p4826_p11 }
 0x2ea   : > { %p4829_p4 = pnand %p4828_p10, %p4822_p2 }
 0x354   : > { %v3541_v58 = vpop.permute.xlu0 %3540 }
 0x355   : > { %v3543_v21 = vsel %vm932_vm9, %v3485_v20, %v3541_v58 }
 0x356   : > { %3545 = vst.msk [vmem:[%s478_s4] sm:$0x1] %vm3544_vm0, %v3543_v21 }
 0x357   : > { %4832 = shalt.err (!%p4829_p4)
}
 0x358   : > { %s4833_s16 = scalar_lea.hbm %s6292_s19, 16  ;;  %s4837_s17 = scalar_lea.hbm %s6498_s7, 64 }
 0x359   : > { %p4834_p13 = scmp.ne.s32.totalorder %s6292_s19, %s4833_s16  ;;  %p4838_p5 = scmp.lt.u32.totalorder %s6292_s19, %s6498_s7 }
 0x35a   : > { %p4839_p12 = scmp.lt.u32.totalorder %s4837_s17, %s4833_s16  ;;  %p4841_p7 = scmp.lt.u32.totalorder %s4833_s16, %s6292_s19 }
 0x35b   : > { %p4835_p6 = pnand %p4834_p13, %p6497_p9 }
 0x35c   : > { %p4840_p0 = por %p4839_p12, %p4838_p5 }
 0x35d   : > { %p4836_p8 = pneg %p4835_p6 }
 0x35e   : > { %p4842_p1 = por %p4841_p7, %p4840_p0 }
 0x360   : > { %p4843_p2 = pnand %p4842_p1, %p4836_p8 }
 0x362   : > { %4846 = shalt.err (!%p4843_p2)
}
 0x363   : > { %4432 = dma.vmem_to_hbm [thread:$0]  (%p6497_p9), %s6294_s15, 16, %s6292_s19, %s3552_s22  }
 0x364 PF: > { %s6499_s2 = sld [smem:[#allocation28_spill]]  ;;  %s6500_s20 = sld [smem:[#allocation36_spill]] }
 0x365   : > { %p4469_p11 = scmp.ge.s32.totalorder %s4985_s14, 2 }
 0x36a   : > { %s3596_s4 = sand.u32 1, %s6499_s2   ;;  %p6501_p3 = scmp.ne.s32.totalorder %s6500_s20, 0 }
 0x36b   : > { %s3597_s0 = scalar_lea.sflag [#allocation6], %s3596_s4 }
 0x36c   : > { %p4456_p10 = pnand %p4469_p11, %p6501_p3 }
 0x36e   : > { %4924 = dma.done.wait (!%p4456_p10), %s3597_s0, 1024  }
 0x36f   : > { %4926 = vsyncadd (!%p4456_p10), %s3597_s0, 4294966272  ;;  %s3606_s25 = scalar_lea.sflag [#allocation17], %s3596_s4 }
 0x370   : > { %4928 = dma.done.wait (!%p4456_p10), %s3606_s25, 16  }
 0x371   : > { %4930 = vsyncadd (!%p4456_p10), %s3606_s25, 4294967280  ;;  %s32_s14 = sadd.s32 1, %s4985_s14   ;;  %s6503_s24 = sld [smem:[#allocation26_spill]] }
 0x372   : > { %p6324_p4 = scmp.ge.s32.totalorder %s32_s14, 6   ;;  %s6504_s25 = sld [smem:[#allocation27_spill]] }
 0x373   : > { %s6505_s27 = sld [smem:[#allocation29_spill]]  ;;  %s6506_s15 = smov %s5328_s26 }
 0x374   : > { %s6507_s19 = smov %s5323_s28  ;;  %s6508_s22 = sld [smem:[#allocation33_spill]] }
 0x375   : > { %s6509_s23 = sld [smem:[#allocation37_spill]]  ;;  %s6510_s26 = smov %s6535_s18 }
 0x376   : > { %s6511_s28 = smov %s4953_s29  ;;  %s6512_s29 = smov %s6506_s15 }
 0x377   : > { %s6513_s30 = smov %s4961_s8  ;;  %s6514_s8 = smov %s4965_s9 }
 0x378   : > { %s6515_s9 = smov %s6507_s19  ;;  %s6516_s10 = smov %s4977_s12 }
 0x379   : > { %s6517_s11 = smov %s4981_s13  ;;  %31 = sbr.rel (!%p6324_p4) target bundleno = 25 (0x19), region = 153 }
 0x37a   : > { %s6518_s12 = smov %s6508_s22 }
 0x37b   : > { %s6519_s13 = smov %s6509_s23 }
 0x380   :  { %3610 = vsyncpa [#allocation5], 1 }
 0x381   :  { %3612 = vsyncpa [#allocation5 + $0x1], 1 }
 0x382   :  { %3613 = vsyncpa [#allocation8], 1 }
 0x383   :  { %3615 = vsyncpa [#allocation8 + $0x1], 1 }
 0x384   :  { %3616 = vsyncpa [#allocation11], 1 }
 0x385   :  { %3617 = vsyncpa [#allocation14], 1 }
 0x386   :  { %3618 = vsyncpa [#allocation6], 1 }
 0x387   :  { %3620 = vsyncpa [#allocation6 + $0x1], 1 }
 0x388   :  { %3621 = vsyncpa [#allocation17], 1 }
 0x389   :  { %3623 = vsyncpa [#allocation17 + $0x1], 1 }

</bundles_post_ra>
